<compile_context>
chip_gen: v7x
topology: tpu7x:2x2x1
jax: 0.10.0
libtpu: 0.0.40
codegen_flags: <defaults>
</compile_context>

<pallas_src>
import functools

import jax
import jax.numpy as jnp
from jax.experimental import pallas as pl
from jax.experimental.pallas import tpu as pltpu


_VMEM_SPEC = pl.BlockSpec(memory_space=pltpu.MemorySpace.VMEM)


def _leaky(v):
    # nn.LeakyReLU(0.1)
    return jnp.where(v > 0, v, 0.1 * v)


def _make_fused_kernel(T: int, Bp: int, H: int, num_layers: int):
    """Single fused kernel: all GRU layers + classification head.

    Ref layout (positional):
      inputs : x (T*Bp, D_emb), h0 (2L, Bp, H),
               per layer (6 refs):
                 w_in_f (D_in, 3H), b_in_f (1, 3H),     gate cols [r|z|n]
                 w_in_b (D_in, 3H), b_in_b (1, 3H),
                 w_blk  (2H, 6H)   block-diag, cols [r_f r_b z_f z_b n_f n_b]
                 bhn    (1, 2H)    = [b_hn_fwd | b_hn_bwd]
               head: w1 (2H,H), b1 (1,H), w2 (H,H/2), b2 (1,H/2),
                     w3 (H/2, Cp), b3 (1, Cp)
      outputs: logits (T*Bp, Cp), h_out (2L, Bp, H)
      scratch: gxf (T*Bp, 3H), gxb (T*Bp, 3H), out_cat (T*Bp, 2H)

    Gate order follows PyTorch nn.GRU: [r, z, n].  Biases b_ih+b_hh are folded
    into the input projection for r/z; b_hn is applied inside r*(.) per PyTorch.
    """
    N = T * Bp
    n_gru = num_layers * 6
    f32 = jnp.float32

    def kernel(*refs):
        x_ref, h0_ref = refs[0], refs[1]
        gru_refs = refs[2:2 + n_gru]
        (w1_ref, b1_ref, w2_ref, b2_ref,
         w3_ref, b3_ref) = refs[2 + n_gru:8 + n_gru]
        logits_ref = refs[8 + n_gru]
        h_out_ref = refs[9 + n_gru]
        gxf_scr = refs[10 + n_gru]
        gxb_scr = refs[11 + n_gru]
        out_scr = refs[12 + n_gru]

        for layer in range(num_layers):
            (win_f, bin_f, win_b, bin_b,
             wblk_ref, bhn_ref) = gru_refs[layer * 6:(layer + 1) * 6]

            # ---- input projection, hoisted out of the recurrence ------------
            # One wide (N, D_in) @ (D_in, 3H) matmul per direction; 96-lane
            # dense stores.  Layer>0 input is the merged (N, 2H) output scratch,
            # so the fwd/bwd concat is a single K=2H contraction.
            if layer == 0:
                x_in = x_ref[...]                                   # (N, D_emb)
            else:
                x_in = out_scr[...]                                 # (N, 2H)
            gxf_scr[...] = (jnp.dot(x_in, win_f[...], preferred_element_type=f32)
                            + bin_f[...])
            gxb_scr[...] = (jnp.dot(x_in, win_b[...], preferred_element_type=f32)
                            + bin_b[...])

            # ---- recurrence: packed register-carried state, fully unrolled --
            w_blk = wblk_ref[...]                                   # (2H, 6H)
            bhn = bhn_ref[...]                                      # (1, 2H)
            h_cat = jnp.concatenate(
                [h0_ref[2 * layer], h0_ref[2 * layer + 1]], axis=-1)  # (Bp, 2H)

            for t in range(T):             # static unroll: fwd t || bwd T-1-t
                tr = T - 1 - t
                gf = gxf_scr[t * Bp:(t + 1) * Bp, :]                # (Bp, 3H)
                gb = gxb_scr[tr * Bp:(tr + 1) * Bp, :]              # (Bp, 3H)

                # Re-pack input-side gate terms to match the packed recurrent
                # layout.  No dependence on h_cat -> off the serial chain.
                grz = jnp.concatenate(
                    [gf[:, :H], gb[:, :H], gf[:, H:2 * H], gb[:, H:2 * H]],
                    axis=-1)                                        # (Bp, 4H)
                gn = jnp.concatenate(
                    [gf[:, 2 * H:], gb[:, 2 * H:]], axis=-1)        # (Bp, 2H)

                # ONE MXU push for both directions and all three gates.
                rec = jnp.dot(h_cat, w_blk, preferred_element_type=f32)  # (Bp, 6H)

                rz = jax.nn.sigmoid(grz + rec[:, :4 * H])           # 1 EUP, 128 lanes
                r_cat = rz[:, :2 * H]                               # [r_f | r_b]
                z_cat = rz[:, 2 * H:]                               # [z_f | z_b]
                n_cat = jnp.tanh(gn + r_cat * (rec[:, 4 * H:] + bhn))  # 1 EUP, 64 lanes
                h_cat = (1.0 - z_cat) * n_cat + z_cat * h_cat       # (Bp, 2H)

                out_scr[t * Bp:(t + 1) * Bp, :H] = h_cat[:, :H]
                out_scr[tr * Bp:(tr + 1) * Bp, H:] = h_cat[:, H:]

            h_out_ref[2 * layer] = h_cat[:, :H]
            h_out_ref[2 * layer + 1] = h_cat[:, H:]

        # ---- fused classification head (dropout = identity at inference) ----
        # PyTorch order: LeakyReLU -> layer1 -> LeakyReLU -> layer2 -> LeakyReLU -> out
        xcat = _leaky(out_scr[...])                                 # (N, 2H)
        h1 = _leaky(jnp.dot(xcat, w1_ref[...], preferred_element_type=f32)
                    + b1_ref[...])
        h2 = _leaky(jnp.dot(h1, w2_ref[...], preferred_element_type=f32)
                    + b2_ref[...])
        logits_ref[...] = (jnp.dot(h2, w3_ref[...], preferred_element_type=f32)
                           + b3_ref[...])

    return kernel


# ----------------------------------------------------------------------------
# Model wrapper: embedding gather (time-major), batch padding, one pallas_call.
# ----------------------------------------------------------------------------

@functools.partial(jax.jit, static_argnames=("num_layers", "num_class"))
def seq_classifier_forward(params, tokens, h0, *, num_layers, num_class):
    """Replicates SeqClassifier.forward.  Returns (logits, h)."""
    B, T = tokens.shape
    H = h0.shape[-1]
    Bp = ((B + 7) // 8) * 8                          # pad batch to 8 sublanes
    emb_table = params["embeddings"]
    D = emb_table.shape[1]
    Cp = params["head"][-1].shape[-1]                # lane-padded class dim

    # Time-major gather directly (no separate transpose of the embedded tensor).
    # TODO(synk): at large B*T, move this gather in-kernel (scalar-prefetched
    # token ids + VMEM embedding table) to skip the HBM round-trip.
    tokens_p = jnp.zeros((Bp, T), dtype=tokens.dtype).at[:B, :].set(tokens)
    x = emb_table[tokens_p.T]                        # (T, Bp, D)
    x = x.reshape(T * Bp, D)                         # row t*Bp + b

    h0_p = jnp.zeros((2 * num_layers, Bp, H), h0.dtype).at[:, :B, :].set(h0)

    flat_gru = [w for layer_params in params["gru"] for w in layer_params]
    n_inputs = 2 + len(flat_gru) + 6

    kernel = _make_fused_kernel(T=T, Bp=Bp, H=H, num_layers=num_layers)

    logits_pad, h_out = pl.pallas_call(
        kernel,
        out_shape=(
            jax.ShapeDtypeStruct((T * Bp, Cp), jnp.float32),
            jax.ShapeDtypeStruct((2 * num_layers, Bp, H), jnp.float32),
        ),
        in_specs=[_VMEM_SPEC] * n_inputs,
        out_specs=(_VMEM_SPEC, _VMEM_SPEC),
        scratch_shapes=[
            pltpu.VMEM((T * Bp, 3 * H), jnp.float32),   # fwd gate inputs (lane-dense)
            pltpu.VMEM((T * Bp, 3 * H), jnp.float32),   # bwd gate inputs (lane-dense)
            pltpu.VMEM((T * Bp, 2 * H), jnp.float32),   # merged fwd|bwd layer outputs
        ],
    )(x, h0_p, *flat_gru, *params["head"])

    logits = logits_pad.reshape(T, Bp, Cp)[:, :B, :num_class]
    logits = jnp.transpose(logits, (1, 0, 2))        # (B, T, num_class)
    h = h_out[:, :B, :]                              # (2*num_layers, B, H)
    return logits, h


# ----------------------------------------------------------------------------
# Deterministic parameter initialization (shapes from SeqClassifier.__init__),
# repacked for the kernel: per-direction (D_in, 3H) input weights with folded
# biases, block-diagonal (2H, 6H) recurrent weights, lane-padded head.
# ----------------------------------------------------------------------------

def init_params(key, vocab, emb_dim, hidden_size, num_layers, num_class):
    H = hidden_size
    keys = iter(jax.random.split(key, 256))

    def uniform(shape, k):
        return jax.random.uniform(next(keys), shape, jnp.float32, -k, k)

    params = {}
    params["embeddings"] = jax.random.normal(next(keys), (vocab, emb_dim),
                                             jnp.float32) * 0.1

    k_gru = 1.0 / float(H) ** 0.5
    gru_layers = []
    for layer in range(num_layers):
        d_in = emb_dim if layer == 0 else 2 * H
        w_blk = jnp.zeros((2 * H, 6 * H), jnp.float32)
        bhn_cat = jnp.zeros((1, 2 * H), jnp.float32)
        in_packed = []
        for d in range(2):  # 0 = forward, 1 = backward
            # PyTorch-native shapes: weight_ih (3H, d_in), weight_hh (3H, H),
            # bias_ih (3H,), bias_hh (3H,); gate rows [r; z; n].
            w_ih = uniform((3 * H, d_in), k_gru)
            w_hh = uniform((3 * H, H), k_gru)
            b_ih = uniform((3 * H,), k_gru)
            b_hh = uniform((3 * H,), k_gru)

            # Packed input projection: (d_in, 3H), cols [r|z|n];
            # r/z biases fold b_ih+b_hh, n keeps only b_in (b_hn applied in-kernel).
            w_in = w_ih.T
            b_in = jnp.concatenate(
                [b_ih[:2 * H] + b_hh[:2 * H], b_ih[2 * H:]]).reshape(1, 3 * H)
            in_packed.append((w_in, b_in))

            # Block-diagonal recurrent weight, cols [r_f r_b z_f z_b n_f n_b].
            whh_t = w_hh.T                                   # (H, 3H) cols [r|z|n]
            r0 = d * H
            w_blk = w_blk.at[r0:r0 + H, d * H:(d + 1) * H].set(whh_t[:, :H])
            w_blk = w_blk.at[r0:r0 + H, 2 * H + d * H:2 * H + (d + 1) * H].set(
                whh_t[:, H:2 * H])
            w_blk = w_blk.at[r0:r0 + H, 4 * H + d * H:4 * H + (d + 1) * H].set(
                whh_t[:, 2 * H:])
            bhn_cat = bhn_cat.at[0, d * H:(d + 1) * H].set(b_hh[2 * H:])

        (w_in_f, b_in_f), (w_in_b, b_in_b) = in_packed
        gru_layers.append((w_in_f, b_in_f, w_in_b, b_in_b, w_blk, bhn_cat))
    params["gru"] = gru_layers

    def linear_t(in_f, out_f):
        k = 1.0 / float(in_f) ** 0.5
        w = uniform((out_f, in_f), k)
        b = uniform((out_f,), k)
        return w.T, b.reshape(1, out_f)              # x @ W layout

    w1, b1 = linear_t(2 * H, H)                      # layer1 (single K=2H matmul)
    w2, b2 = linear_t(H, H // 2)                     # layer2
    w3, b3 = linear_t(H // 2, num_class)             # out
    Cp = ((num_class + 127) // 128) * 128            # lane-dense logits store
    w3p = jnp.zeros((H // 2, Cp), jnp.float32).at[:, :num_class].set(w3)
    b3p = jnp.zeros((1, Cp), jnp.float32).at[:, :num_class].set(b3)
    params["head"] = (w1, b1, w2, b2, w3p, b3p)
    return params


# ----------------------------------------------------------------------------
# Main
# ----------------------------------------------------------------------------

if __name__ == "__main__":
    VOCAB = 50
    EMB_DIM = 300        # fixed by nn.GRU(300, ...)
    HIDDEN = 32
    NUM_LAYERS = 2
    NUM_CLASS = 10
    B, T = 2, 8

    key = jax.random.PRNGKey(0)
    k_params, k_tokens = jax.random.split(key)

    params = init_params(k_params, VOCAB, EMB_DIM, HIDDEN, NUM_LAYERS, NUM_CLASS)
    tokens = jax.random.randint(k_tokens, (B, T), 0, VOCAB, dtype=jnp.int32)
    h0 = jnp.zeros((2 * NUM_LAYERS, B, HIDDEN), jnp.float32)  # init_hidden

    logits, h = seq_classifier_forward(params, tokens, h0,
                                       num_layers=NUM_LAYERS, num_class=NUM_CLASS)
    jax.block_until_ready((logits, h))

    assert logits.shape == (B, T, NUM_CLASS)
    assert h.shape == (2 * NUM_LAYERS, B, HIDDEN)
    assert bool(jnp.all(jnp.isfinite(logits))) and bool(jnp.all(jnp.isfinite(h)))
    print("KERNEL_OK")
</pallas_src>

<mosaic_0001>
module attributes {stable_mosaic.version = 11 : i64} {
  func.func @kernel(%arg0: memref<64x300xf32, #tpu.memory_space<vmem>>, %arg1: memref<4x8x32xf32, #tpu.memory_space<vmem>>, %arg2: memref<300x96xf32, #tpu.memory_space<vmem>>, %arg3: memref<1x96xf32, #tpu.memory_space<vmem>>, %arg4: memref<300x96xf32, #tpu.memory_space<vmem>>, %arg5: memref<1x96xf32, #tpu.memory_space<vmem>>, %arg6: memref<64x192xf32, #tpu.memory_space<vmem>>, %arg7: memref<1x64xf32, #tpu.memory_space<vmem>>, %arg8: memref<64x96xf32, #tpu.memory_space<vmem>>, %arg9: memref<1x96xf32, #tpu.memory_space<vmem>>, %arg10: memref<64x96xf32, #tpu.memory_space<vmem>>, %arg11: memref<1x96xf32, #tpu.memory_space<vmem>>, %arg12: memref<64x192xf32, #tpu.memory_space<vmem>>, %arg13: memref<1x64xf32, #tpu.memory_space<vmem>>, %arg14: memref<64x32xf32, #tpu.memory_space<vmem>>, %arg15: memref<1x32xf32, #tpu.memory_space<vmem>>, %arg16: memref<32x16xf32, #tpu.memory_space<vmem>>, %arg17: memref<1x16xf32, #tpu.memory_space<vmem>>, %arg18: memref<16x128xf32, #tpu.memory_space<vmem>>, %arg19: memref<1x128xf32, #tpu.memory_space<vmem>>, %arg20: memref<64x128xf32, #tpu.memory_space<vmem>>, %arg21: memref<4x8x32xf32, #tpu.memory_space<vmem>>, %arg22: memref<64x96xf32, #tpu.memory_space<vmem>>, %arg23: memref<64x96xf32, #tpu.memory_space<vmem>>, %arg24: memref<64x64xf32, #tpu.memory_space<vmem>>) attributes {dimension_semantics = [], scalar_prefetch = 0 : i64, scratch_operands = 3 : i64, tpu.core_type = #tpu.core_type<tc>} {
    %c0 = arith.constant 0 : index
    %c0_0 = arith.constant 0 : index
    %0 = vector.load %arg0[%c0, %c0_0] : memref<64x300xf32, #tpu.memory_space<vmem>>, vector<64x300xf32>
    %c0_1 = arith.constant 0 : index
    %c0_2 = arith.constant 0 : index
    %1 = vector.load %arg2[%c0_1, %c0_2] : memref<300x96xf32, #tpu.memory_space<vmem>>, vector<300x96xf32>
    %cst = arith.constant dense<0.000000e+00> : vector<64x96xf32>
    %2 = tpu.matmul %0, %1, %cst {dimension_numbers = #tpu.dot_dimension_numbers<[1], [0], [0], [1], [0, 0, 1, 1], [], []>} : vector<64x300xf32>, vector<300x96xf32>, vector<64x96xf32> -> vector<64x96xf32>
    %c0_3 = arith.constant 0 : index
    %c0_4 = arith.constant 0 : index
    %3 = vector.load %arg3[%c0_3, %c0_4] : memref<1x96xf32, #tpu.memory_space<vmem>>, vector<1x96xf32>
    %4 = vector.broadcast %3 : vector<1x96xf32> to vector<64x96xf32>
    %5 = arith.addf %2, %4 : vector<64x96xf32>
    %c0_5 = arith.constant 0 : index
    %c0_6 = arith.constant 0 : index
    %6 = vector.load %arg22[%c0_5, %c0_6] : memref<64x96xf32, #tpu.memory_space<vmem>>, vector<64x96xf32>
    tpu.vector_store %arg22[%c0_5, %c0_6], %5 {strides = array<i32>} : memref<64x96xf32, #tpu.memory_space<vmem>>, vector<64x96xf32>,
    %c0_7 = arith.constant 0 : index
    %c0_8 = arith.constant 0 : index
    %7 = vector.load %arg4[%c0_7, %c0_8] : memref<300x96xf32, #tpu.memory_space<vmem>>, vector<300x96xf32>
    %cst_9 = arith.constant dense<0.000000e+00> : vector<64x96xf32>
    %8 = tpu.matmul %0, %7, %cst_9 {dimension_numbers = #tpu.dot_dimension_numbers<[1], [0], [0], [1], [0, 0, 1, 1], [], []>} : vector<64x300xf32>, vector<300x96xf32>, vector<64x96xf32> -> vector<64x96xf32>
    %c0_10 = arith.constant 0 : index
    %c0_11 = arith.constant 0 : index
    %9 = vector.load %arg5[%c0_10, %c0_11] : memref<1x96xf32, #tpu.memory_space<vmem>>, vector<1x96xf32>
    %10 = vector.broadcast %9 : vector<1x96xf32> to vector<64x96xf32>
    %11 = arith.addf %8, %10 : vector<64x96xf32>
    %c0_12 = arith.constant 0 : index
    %c0_13 = arith.constant 0 : index
    %12 = vector.load %arg23[%c0_12, %c0_13] : memref<64x96xf32, #tpu.memory_space<vmem>>, vector<64x96xf32>
    tpu.vector_store %arg23[%c0_12, %c0_13], %11 {strides = array<i32>} : memref<64x96xf32, #tpu.memory_space<vmem>>, vector<64x96xf32>,
    %c0_14 = arith.constant 0 : index
    %c0_15 = arith.constant 0 : index
    %13 = vector.load %arg6[%c0_14, %c0_15] : memref<64x192xf32, #tpu.memory_space<vmem>>, vector<64x192xf32>
    %c0_16 = arith.constant 0 : index
    %c0_17 = arith.constant 0 : index
    %14 = vector.load %arg7[%c0_16, %c0_17] : memref<1x64xf32, #tpu.memory_space<vmem>>, vector<1x64xf32>
    %c0_18 = arith.constant 0 : index
    %c0_19 = arith.constant 0 : index
    %c0_20 = arith.constant 0 : index
    %15 = vector.load %arg1[%c0_18, %c0_19, %c0_20] : memref<4x8x32xf32, #tpu.memory_space<vmem>>, vector<1x8x32xf32>
    %16 = vector.shape_cast %15 : vector<1x8x32xf32> to vector<8x32xf32>
    %c1 = arith.constant 1 : index
    %c0_21 = arith.constant 0 : index
    %c0_22 = arith.constant 0 : index
    %17 = vector.load %arg1[%c1, %c0_21, %c0_22] : memref<4x8x32xf32, #tpu.memory_space<vmem>>, vector<1x8x32xf32>
    %18 = vector.shape_cast %17 : vector<1x8x32xf32> to vector<8x32xf32>
    %19 = tpu.concatenate %16, %18 in 1 : vector<8x32xf32>, vector<8x32xf32> -> vector<8x64xf32>
    %c0_23 = arith.constant 0 : index
    %c0_24 = arith.constant 0 : index
    %20 = vector.load %arg22[%c0_23, %c0_24] : memref<64x96xf32, #tpu.memory_space<vmem>>, vector<8x96xf32>
    %c56 = arith.constant 56 : index
    %c0_25 = arith.constant 0 : index
    %21 = vector.load %arg23[%c56, %c0_25] : memref<64x96xf32, #tpu.memory_space<vmem>>, vector<8x96xf32>
    %22 = vector.extract_strided_slice %20 {offsets = [0, 0], sizes = [8, 32], strides = [1, 1]} : vector<8x96xf32> to vector<8x32xf32>
    %23 = vector.extract_strided_slice %21 {offsets = [0, 0], sizes = [8, 32], strides = [1, 1]} : vector<8x96xf32> to vector<8x32xf32>
    %24 = vector.extract_strided_slice %20 {offsets = [0, 32], sizes = [8, 32], strides = [1, 1]} : vector<8x96xf32> to vector<8x32xf32>
    %25 = vector.extract_strided_slice %21 {offsets = [0, 32], sizes = [8, 32], strides = [1, 1]} : vector<8x96xf32> to vector<8x32xf32>
    %26 = tpu.concatenate %22, %23, %24, %25 in 1 : vector<8x32xf32>, vector<8x32xf32>, vector<8x32xf32>, vector<8x32xf32> -> vector<8x128xf32>
    %27 = vector.extract_strided_slice %20 {offsets = [0, 64], sizes = [8, 32], strides = [1, 1]} : vector<8x96xf32> to vector<8x32xf32>
    %28 = vector.extract_strided_slice %21 {offsets = [0, 64], sizes = [8, 32], strides = [1, 1]} : vector<8x96xf32> to vector<8x32xf32>
    %29 = tpu.concatenate %27, %28 in 1 : vector<8x32xf32>, vector<8x32xf32> -> vector<8x64xf32>
    %cst_26 = arith.constant dense<0.000000e+00> : vector<8x192xf32>
    %30 = tpu.matmul %19, %13, %cst_26 {dimension_numbers = #tpu.dot_dimension_numbers<[1], [0], [0], [1], [0, 0, 1, 1], [], []>} : vector<8x64xf32>, vector<64x192xf32>, vector<8x192xf32> -> vector<8x192xf32>
    %31 = vector.extract_strided_slice %30 {offsets = [0, 0], sizes = [8, 128], strides = [1, 1]} : vector<8x192xf32> to vector<8x128xf32>
    %32 = arith.addf %26, %31 : vector<8x128xf32>
    %33 = arith.negf %32 : vector<8x128xf32>
    %34 = math.exp %33 : vector<8x128xf32>
    %cst_27 = arith.constant 1.000000e+00 : f32
    %35 = vector.broadcast %cst_27 : f32 to vector<8x128xf32>
    %36 = arith.addf %35, %34 : vector<8x128xf32>
    %37 = arith.divf %35, %36 : vector<8x128xf32>
    %38 = vector.extract_strided_slice %37 {offsets = [0, 0], sizes = [8, 64], strides = [1, 1]} : vector<8x128xf32> to vector<8x64xf32>
    %39 = vector.extract_strided_slice %37 {offsets = [0, 64], sizes = [8, 64], strides = [1, 1]} : vector<8x128xf32> to vector<8x64xf32>
    %40 = vector.extract_strided_slice %30 {offsets = [0, 128], sizes = [8, 64], strides = [1, 1]} : vector<8x192xf32> to vector<8x64xf32>
    %41 = vector.broadcast %14 : vector<1x64xf32> to vector<8x64xf32>
    %42 = arith.addf %40, %41 : vector<8x64xf32>
    %43 = arith.mulf %38, %42 : vector<8x64xf32>
    %44 = arith.addf %29, %43 : vector<8x64xf32>
    %45 = math.tanh %44 : vector<8x64xf32>
    %cst_28 = arith.constant 1.000000e+00 : f32
    %46 = vector.broadcast %cst_28 : f32 to vector<8x64xf32>
    %47 = arith.subf %46, %39 : vector<8x64xf32>
    %48 = arith.mulf %47, %45 : vector<8x64xf32>
    %49 = arith.mulf %39, %19 : vector<8x64xf32>
    %50 = arith.addf %48, %49 : vector<8x64xf32>
    %51 = vector.extract_strided_slice %50 {offsets = [0, 0], sizes = [8, 32], strides = [1, 1]} : vector<8x64xf32> to vector<8x32xf32>
    %c0_29 = arith.constant 0 : index
    %c0_30 = arith.constant 0 : index
    %52 = vector.load %arg24[%c0_29, %c0_30] : memref<64x64xf32, #tpu.memory_space<vmem>>, vector<8x32xf32>
    tpu.vector_store %arg24[%c0_29, %c0_30], %51 {strides = array<i32>} : memref<64x64xf32, #tpu.memory_space<vmem>>, vector<8x32xf32>,
    %53 = vector.extract_strided_slice %50 {offsets = [0, 32], sizes = [8, 32], strides = [1, 1]} : vector<8x64xf32> to vector<8x32xf32>
    %c56_31 = arith.constant 56 : index
    %c32 = arith.constant 32 : index
    %54 = vector.load %arg24[%c56_31, %c32] : memref<64x64xf32, #tpu.memory_space<vmem>>, vector<8x32xf32>
    tpu.vector_store %arg24[%c56_31, %c32], %53 {strides = array<i32>} : memref<64x64xf32, #tpu.memory_space<vmem>>, vector<8x32xf32>,
    %c8 = arith.constant 8 : index
    %c0_32 = arith.constant 0 : index
    %55 = vector.load %arg22[%c8, %c0_32] : memref<64x96xf32, #tpu.memory_space<vmem>>, vector<8x96xf32>
    %c48 = arith.constant 48 : index
    %c0_33 = arith.constant 0 : index
    %56 = vector.load %arg23[%c48, %c0_33] : memref<64x96xf32, #tpu.memory_space<vmem>>, vector<8x96xf32>
    %57 = vector.extract_strided_slice %55 {offsets = [0, 0], sizes = [8, 32], strides = [1, 1]} : vector<8x96xf32> to vector<8x32xf32>
    %58 = vector.extract_strided_slice %56 {offsets = [0, 0], sizes = [8, 32], strides = [1, 1]} : vector<8x96xf32> to vector<8x32xf32>
    %59 = vector.extract_strided_slice %55 {offsets = [0, 32], sizes = [8, 32], strides = [1, 1]} : vector<8x96xf32> to vector<8x32xf32>
    %60 = vector.extract_strided_slice %56 {offsets = [0, 32], sizes = [8, 32], strides = [1, 1]} : vector<8x96xf32> to vector<8x32xf32>
    %61 = tpu.concatenate %57, %58, %59, %60 in 1 : vector<8x32xf32>, vector<8x32xf32>, vector<8x32xf32>, vector<8x32xf32> -> vector<8x128xf32>
    %62 = vector.extract_strided_slice %55 {offsets = [0, 64], sizes = [8, 32], strides = [1, 1]} : vector<8x96xf32> to vector<8x32xf32>
    %63 = vector.extract_strided_slice %56 {offsets = [0, 64], sizes = [8, 32], strides = [1, 1]} : vector<8x96xf32> to vector<8x32xf32>
    %64 = tpu.concatenate %62, %63 in 1 : vector<8x32xf32>, vector<8x32xf32> -> vector<8x64xf32>
    %cst_34 = arith.constant dense<0.000000e+00> : vector<8x192xf32>
    %65 = tpu.matmul %50, %13, %cst_34 {dimension_numbers = #tpu.dot_dimension_numbers<[1], [0], [0], [1], [0, 0, 1, 1], [], []>} : vector<8x64xf32>, vector<64x192xf32>, vector<8x192xf32> -> vector<8x192xf32>
    %66 = vector.extract_strided_slice %65 {offsets = [0, 0], sizes = [8, 128], strides = [1, 1]} : vector<8x192xf32> to vector<8x128xf32>
    %67 = arith.addf %61, %66 : vector<8x128xf32>
    %68 = arith.negf %67 : vector<8x128xf32>
    %69 = math.exp %68 : vector<8x128xf32>
    %cst_35 = arith.constant 1.000000e+00 : f32
    %70 = vector.broadcast %cst_35 : f32 to vector<8x128xf32>
    %71 = arith.addf %70, %69 : vector<8x128xf32>
    %72 = arith.divf %70, %71 : vector<8x128xf32>
    %73 = vector.extract_strided_slice %72 {offsets = [0, 0], sizes = [8, 64], strides = [1, 1]} : vector<8x128xf32> to vector<8x64xf32>
    %74 = vector.extract_strided_slice %72 {offsets = [0, 64], sizes = [8, 64], strides = [1, 1]} : vector<8x128xf32> to vector<8x64xf32>
    %75 = vector.extract_strided_slice %65 {offsets = [0, 128], sizes = [8, 64], strides = [1, 1]} : vector<8x192xf32> to vector<8x64xf32>
    %76 = vector.broadcast %14 : vector<1x64xf32> to vector<8x64xf32>
    %77 = arith.addf %75, %76 : vector<8x64xf32>
    %78 = arith.mulf %73, %77 : vector<8x64xf32>
    %79 = arith.addf %64, %78 : vector<8x64xf32>
    %80 = math.tanh %79 : vector<8x64xf32>
    %cst_36 = arith.constant 1.000000e+00 : f32
    %81 = vector.broadcast %cst_36 : f32 to vector<8x64xf32>
    %82 = arith.subf %81, %74 : vector<8x64xf32>
    %83 = arith.mulf %82, %80 : vector<8x64xf32>
    %84 = arith.mulf %74, %50 : vector<8x64xf32>
    %85 = arith.addf %83, %84 : vector<8x64xf32>
    %86 = vector.extract_strided_slice %85 {offsets = [0, 0], sizes = [8, 32], strides = [1, 1]} : vector<8x64xf32> to vector<8x32xf32>
    %c8_37 = arith.constant 8 : index
    %c0_38 = arith.constant 0 : index
    %87 = vector.load %arg24[%c8_37, %c0_38] : memref<64x64xf32, #tpu.memory_space<vmem>>, vector<8x32xf32>
    tpu.vector_store %arg24[%c8_37, %c0_38], %86 {strides = array<i32>} : memref<64x64xf32, #tpu.memory_space<vmem>>, vector<8x32xf32>,
    %88 = vector.extract_strided_slice %85 {offsets = [0, 32], sizes = [8, 32], strides = [1, 1]} : vector<8x64xf32> to vector<8x32xf32>
    %c48_39 = arith.constant 48 : index
    %c32_40 = arith.constant 32 : index
    %89 = vector.load %arg24[%c48_39, %c32_40] : memref<64x64xf32, #tpu.memory_space<vmem>>, vector<8x32xf32>
    tpu.vector_store %arg24[%c48_39, %c32_40], %88 {strides = array<i32>} : memref<64x64xf32, #tpu.memory_space<vmem>>, vector<8x32xf32>,
    %c16 = arith.constant 16 : index
    %c0_41 = arith.constant 0 : index
    %90 = vector.load %arg22[%c16, %c0_41] : memref<64x96xf32, #tpu.memory_space<vmem>>, vector<8x96xf32>
    %c40 = arith.constant 40 : index
    %c0_42 = arith.constant 0 : index
    %91 = vector.load %arg23[%c40, %c0_42] : memref<64x96xf32, #tpu.memory_space<vmem>>, vector<8x96xf32>
    %92 = vector.extract_strided_slice %90 {offsets = [0, 0], sizes = [8, 32], strides = [1, 1]} : vector<8x96xf32> to vector<8x32xf32>
    %93 = vector.extract_strided_slice %91 {offsets = [0, 0], sizes = [8, 32], strides = [1, 1]} : vector<8x96xf32> to vector<8x32xf32>
    %94 = vector.extract_strided_slice %90 {offsets = [0, 32], sizes = [8, 32], strides = [1, 1]} : vector<8x96xf32> to vector<8x32xf32>
    %95 = vector.extract_strided_slice %91 {offsets = [0, 32], sizes = [8, 32], strides = [1, 1]} : vector<8x96xf32> to vector<8x32xf32>
    %96 = tpu.concatenate %92, %93, %94, %95 in 1 : vector<8x32xf32>, vector<8x32xf32>, vector<8x32xf32>, vector<8x32xf32> -> vector<8x128xf32>
    %97 = vector.extract_strided_slice %90 {offsets = [0, 64], sizes = [8, 32], strides = [1, 1]} : vector<8x96xf32> to vector<8x32xf32>
    %98 = vector.extract_strided_slice %91 {offsets = [0, 64], sizes = [8, 32], strides = [1, 1]} : vector<8x96xf32> to vector<8x32xf32>
    %99 = tpu.concatenate %97, %98 in 1 : vector<8x32xf32>, vector<8x32xf32> -> vector<8x64xf32>
    %cst_43 = arith.constant dense<0.000000e+00> : vector<8x192xf32>
    %100 = tpu.matmul %85, %13, %cst_43 {dimension_numbers = #tpu.dot_dimension_numbers<[1], [0], [0], [1], [0, 0, 1, 1], [], []>} : vector<8x64xf32>, vector<64x192xf32>, vector<8x192xf32> -> vector<8x192xf32>
    %101 = vector.extract_strided_slice %100 {offsets = [0, 0], sizes = [8, 128], strides = [1, 1]} : vector<8x192xf32> to vector<8x128xf32>
    %102 = arith.addf %96, %101 : vector<8x128xf32>
    %103 = arith.negf %102 : vector<8x128xf32>
    %104 = math.exp %103 : vector<8x128xf32>
    %cst_44 = arith.constant 1.000000e+00 : f32
    %105 = vector.broadcast %cst_44 : f32 to vector<8x128xf32>
    %106 = arith.addf %105, %104 : vector<8x128xf32>
    %107 = arith.divf %105, %106 : vector<8x128xf32>
    %108 = vector.extract_strided_slice %107 {offsets = [0, 0], sizes = [8, 64], strides = [1, 1]} : vector<8x128xf32> to vector<8x64xf32>
    %109 = vector.extract_strided_slice %107 {offsets = [0, 64], sizes = [8, 64], strides = [1, 1]} : vector<8x128xf32> to vector<8x64xf32>
    %110 = vector.extract_strided_slice %100 {offsets = [0, 128], sizes = [8, 64], strides = [1, 1]} : vector<8x192xf32> to vector<8x64xf32>
    %111 = vector.broadcast %14 : vector<1x64xf32> to vector<8x64xf32>
    %112 = arith.addf %110, %111 : vector<8x64xf32>
    %113 = arith.mulf %108, %112 : vector<8x64xf32>
    %114 = arith.addf %99, %113 : vector<8x64xf32>
    %115 = math.tanh %114 : vector<8x64xf32>
    %cst_45 = arith.constant 1.000000e+00 : f32
    %116 = vector.broadcast %cst_45 : f32 to vector<8x64xf32>
    %117 = arith.subf %116, %109 : vector<8x64xf32>
    %118 = arith.mulf %117, %115 : vector<8x64xf32>
    %119 = arith.mulf %109, %85 : vector<8x64xf32>
    %120 = arith.addf %118, %119 : vector<8x64xf32>
    %121 = vector.extract_strided_slice %120 {offsets = [0, 0], sizes = [8, 32], strides = [1, 1]} : vector<8x64xf32> to vector<8x32xf32>
    %c16_46 = arith.constant 16 : index
    %c0_47 = arith.constant 0 : index
    %122 = vector.load %arg24[%c16_46, %c0_47] : memref<64x64xf32, #tpu.memory_space<vmem>>, vector<8x32xf32>
    tpu.vector_store %arg24[%c16_46, %c0_47], %121 {strides = array<i32>} : memref<64x64xf32, #tpu.memory_space<vmem>>, vector<8x32xf32>,
    %123 = vector.extract_strided_slice %120 {offsets = [0, 32], sizes = [8, 32], strides = [1, 1]} : vector<8x64xf32> to vector<8x32xf32>
    %c40_48 = arith.constant 40 : index
    %c32_49 = arith.constant 32 : index
    %124 = vector.load %arg24[%c40_48, %c32_49] : memref<64x64xf32, #tpu.memory_space<vmem>>, vector<8x32xf32>
    tpu.vector_store %arg24[%c40_48, %c32_49], %123 {strides = array<i32>} : memref<64x64xf32, #tpu.memory_space<vmem>>, vector<8x32xf32>,
    %c24 = arith.constant 24 : index
    %c0_50 = arith.constant 0 : index
    %125 = vector.load %arg22[%c24, %c0_50] : memref<64x96xf32, #tpu.memory_space<vmem>>, vector<8x96xf32>
    %c32_51 = arith.constant 32 : index
    %c0_52 = arith.constant 0 : index
    %126 = vector.load %arg23[%c32_51, %c0_52] : memref<64x96xf32, #tpu.memory_space<vmem>>, vector<8x96xf32>
    %127 = vector.extract_strided_slice %125 {offsets = [0, 0], sizes = [8, 32], strides = [1, 1]} : vector<8x96xf32> to vector<8x32xf32>
    %128 = vector.extract_strided_slice %126 {offsets = [0, 0], sizes = [8, 32], strides = [1, 1]} : vector<8x96xf32> to vector<8x32xf32>
    %129 = vector.extract_strided_slice %125 {offsets = [0, 32], sizes = [8, 32], strides = [1, 1]} : vector<8x96xf32> to vector<8x32xf32>
    %130 = vector.extract_strided_slice %126 {offsets = [0, 32], sizes = [8, 32], strides = [1, 1]} : vector<8x96xf32> to vector<8x32xf32>
    %131 = tpu.concatenate %127, %128, %129, %130 in 1 : vector<8x32xf32>, vector<8x32xf32>, vector<8x32xf32>, vector<8x32xf32> -> vector<8x128xf32>
    %132 = vector.extract_strided_slice %125 {offsets = [0, 64], sizes = [8, 32], strides = [1, 1]} : vector<8x96xf32> to vector<8x32xf32>
    %133 = vector.extract_strided_slice %126 {offsets = [0, 64], sizes = [8, 32], strides = [1, 1]} : vector<8x96xf32> to vector<8x32xf32>
    %134 = tpu.concatenate %132, %133 in 1 : vector<8x32xf32>, vector<8x32xf32> -> vector<8x64xf32>
    %cst_53 = arith.constant dense<0.000000e+00> : vector<8x192xf32>
    %135 = tpu.matmul %120, %13, %cst_53 {dimension_numbers = #tpu.dot_dimension_numbers<[1], [0], [0], [1], [0, 0, 1, 1], [], []>} : vector<8x64xf32>, vector<64x192xf32>, vector<8x192xf32> -> vector<8x192xf32>
    %136 = vector.extract_strided_slice %135 {offsets = [0, 0], sizes = [8, 128], strides = [1, 1]} : vector<8x192xf32> to vector<8x128xf32>
    %137 = arith.addf %131, %136 : vector<8x128xf32>
    %138 = arith.negf %137 : vector<8x128xf32>
    %139 = math.exp %138 : vector<8x128xf32>
    %cst_54 = arith.constant 1.000000e+00 : f32
    %140 = vector.broadcast %cst_54 : f32 to vector<8x128xf32>
    %141 = arith.addf %140, %139 : vector<8x128xf32>
    %142 = arith.divf %140, %141 : vector<8x128xf32>
    %143 = vector.extract_strided_slice %142 {offsets = [0, 0], sizes = [8, 64], strides = [1, 1]} : vector<8x128xf32> to vector<8x64xf32>
    %144 = vector.extract_strided_slice %142 {offsets = [0, 64], sizes = [8, 64], strides = [1, 1]} : vector<8x128xf32> to vector<8x64xf32>
    %145 = vector.extract_strided_slice %135 {offsets = [0, 128], sizes = [8, 64], strides = [1, 1]} : vector<8x192xf32> to vector<8x64xf32>
    %146 = vector.broadcast %14 : vector<1x64xf32> to vector<8x64xf32>
    %147 = arith.addf %145, %146 : vector<8x64xf32>
    %148 = arith.mulf %143, %147 : vector<8x64xf32>
    %149 = arith.addf %134, %148 : vector<8x64xf32>
    %150 = math.tanh %149 : vector<8x64xf32>
    %cst_55 = arith.constant 1.000000e+00 : f32
    %151 = vector.broadcast %cst_55 : f32 to vector<8x64xf32>
    %152 = arith.subf %151, %144 : vector<8x64xf32>
    %153 = arith.mulf %152, %150 : vector<8x64xf32>
    %154 = arith.mulf %144, %120 : vector<8x64xf32>
    %155 = arith.addf %153, %154 : vector<8x64xf32>
    %156 = vector.extract_strided_slice %155 {offsets = [0, 0], sizes = [8, 32], strides = [1, 1]} : vector<8x64xf32> to vector<8x32xf32>
    %c24_56 = arith.constant 24 : index
    %c0_57 = arith.constant 0 : index
    %157 = vector.load %arg24[%c24_56, %c0_57] : memref<64x64xf32, #tpu.memory_space<vmem>>, vector<8x32xf32>
    tpu.vector_store %arg24[%c24_56, %c0_57], %156 {strides = array<i32>} : memref<64x64xf32, #tpu.memory_space<vmem>>, vector<8x32xf32>,
    %158 = vector.extract_strided_slice %155 {offsets = [0, 32], sizes = [8, 32], strides = [1, 1]} : vector<8x64xf32> to vector<8x32xf32>
    %c32_58 = arith.constant 32 : index
    %c32_59 = arith.constant 32 : index
    %159 = vector.load %arg24[%c32_58, %c32_59] : memref<64x64xf32, #tpu.memory_space<vmem>>, vector<8x32xf32>
    tpu.vector_store %arg24[%c32_58, %c32_59], %158 {strides = array<i32>} : memref<64x64xf32, #tpu.memory_space<vmem>>, vector<8x32xf32>,
    %c32_60 = arith.constant 32 : index
    %c0_61 = arith.constant 0 : index
    %160 = vector.load %arg22[%c32_60, %c0_61] : memref<64x96xf32, #tpu.memory_space<vmem>>, vector<8x96xf32>
    %c24_62 = arith.constant 24 : index
    %c0_63 = arith.constant 0 : index
    %161 = vector.load %arg23[%c24_62, %c0_63] : memref<64x96xf32, #tpu.memory_space<vmem>>, vector<8x96xf32>
    %162 = vector.extract_strided_slice %160 {offsets = [0, 0], sizes = [8, 32], strides = [1, 1]} : vector<8x96xf32> to vector<8x32xf32>
    %163 = vector.extract_strided_slice %161 {offsets = [0, 0], sizes = [8, 32], strides = [1, 1]} : vector<8x96xf32> to vector<8x32xf32>
    %164 = vector.extract_strided_slice %160 {offsets = [0, 32], sizes = [8, 32], strides = [1, 1]} : vector<8x96xf32> to vector<8x32xf32>
    %165 = vector.extract_strided_slice %161 {offsets = [0, 32], sizes = [8, 32], strides = [1, 1]} : vector<8x96xf32> to vector<8x32xf32>
    %166 = tpu.concatenate %162, %163, %164, %165 in 1 : vector<8x32xf32>, vector<8x32xf32>, vector<8x32xf32>, vector<8x32xf32> -> vector<8x128xf32>
    %167 = vector.extract_strided_slice %160 {offsets = [0, 64], sizes = [8, 32], strides = [1, 1]} : vector<8x96xf32> to vector<8x32xf32>
    %168 = vector.extract_strided_slice %161 {offsets = [0, 64], sizes = [8, 32], strides = [1, 1]} : vector<8x96xf32> to vector<8x32xf32>
    %169 = tpu.concatenate %167, %168 in 1 : vector<8x32xf32>, vector<8x32xf32> -> vector<8x64xf32>
    %cst_64 = arith.constant dense<0.000000e+00> : vector<8x192xf32>
    %170 = tpu.matmul %155, %13, %cst_64 {dimension_numbers = #tpu.dot_dimension_numbers<[1], [0], [0], [1], [0, 0, 1, 1], [], []>} : vector<8x64xf32>, vector<64x192xf32>, vector<8x192xf32> -> vector<8x192xf32>
    %171 = vector.extract_strided_slice %170 {offsets = [0, 0], sizes = [8, 128], strides = [1, 1]} : vector<8x192xf32> to vector<8x128xf32>
    %172 = arith.addf %166, %171 : vector<8x128xf32>
    %173 = arith.negf %172 : vector<8x128xf32>
    %174 = math.exp %173 : vector<8x128xf32>
    %cst_65 = arith.constant 1.000000e+00 : f32
    %175 = vector.broadcast %cst_65 : f32 to vector<8x128xf32>
    %176 = arith.addf %175, %174 : vector<8x128xf32>
    %177 = arith.divf %175, %176 : vector<8x128xf32>
    %178 = vector.extract_strided_slice %177 {offsets = [0, 0], sizes = [8, 64], strides = [1, 1]} : vector<8x128xf32> to vector<8x64xf32>
    %179 = vector.extract_strided_slice %177 {offsets = [0, 64], sizes = [8, 64], strides = [1, 1]} : vector<8x128xf32> to vector<8x64xf32>
    %180 = vector.extract_strided_slice %170 {offsets = [0, 128], sizes = [8, 64], strides = [1, 1]} : vector<8x192xf32> to vector<8x64xf32>
    %181 = vector.broadcast %14 : vector<1x64xf32> to vector<8x64xf32>
    %182 = arith.addf %180, %181 : vector<8x64xf32>
    %183 = arith.mulf %178, %182 : vector<8x64xf32>
    %184 = arith.addf %169, %183 : vector<8x64xf32>
    %185 = math.tanh %184 : vector<8x64xf32>
    %cst_66 = arith.constant 1.000000e+00 : f32
    %186 = vector.broadcast %cst_66 : f32 to vector<8x64xf32>
    %187 = arith.subf %186, %179 : vector<8x64xf32>
    %188 = arith.mulf %187, %185 : vector<8x64xf32>
    %189 = arith.mulf %179, %155 : vector<8x64xf32>
    %190 = arith.addf %188, %189 : vector<8x64xf32>
    %191 = vector.extract_strided_slice %190 {offsets = [0, 0], sizes = [8, 32], strides = [1, 1]} : vector<8x64xf32> to vector<8x32xf32>
    %c32_67 = arith.constant 32 : index
    %c0_68 = arith.constant 0 : index
    %192 = vector.load %arg24[%c32_67, %c0_68] : memref<64x64xf32, #tpu.memory_space<vmem>>, vector<8x32xf32>
    tpu.vector_store %arg24[%c32_67, %c0_68], %191 {strides = array<i32>} : memref<64x64xf32, #tpu.memory_space<vmem>>, vector<8x32xf32>,
    %193 = vector.extract_strided_slice %190 {offsets = [0, 32], sizes = [8, 32], strides = [1, 1]} : vector<8x64xf32> to vector<8x32xf32>
    %c24_69 = arith.constant 24 : index
    %c32_70 = arith.constant 32 : index
    %194 = vector.load %arg24[%c24_69, %c32_70] : memref<64x64xf32, #tpu.memory_space<vmem>>, vector<8x32xf32>
    tpu.vector_store %arg24[%c24_69, %c32_70], %193 {strides = array<i32>} : memref<64x64xf32, #tpu.memory_space<vmem>>, vector<8x32xf32>,
    %c40_71 = arith.constant 40 : index
    %c0_72 = arith.constant 0 : index
    %195 = vector.load %arg22[%c40_71, %c0_72] : memref<64x96xf32, #tpu.memory_space<vmem>>, vector<8x96xf32>
    %c16_73 = arith.constant 16 : index
    %c0_74 = arith.constant 0 : index
    %196 = vector.load %arg23[%c16_73, %c0_74] : memref<64x96xf32, #tpu.memory_space<vmem>>, vector<8x96xf32>
    %197 = vector.extract_strided_slice %195 {offsets = [0, 0], sizes = [8, 32], strides = [1, 1]} : vector<8x96xf32> to vector<8x32xf32>
    %198 = vector.extract_strided_slice %196 {offsets = [0, 0], sizes = [8, 32], strides = [1, 1]} : vector<8x96xf32> to vector<8x32xf32>
    %199 = vector.extract_strided_slice %195 {offsets = [0, 32], sizes = [8, 32], strides = [1, 1]} : vector<8x96xf32> to vector<8x32xf32>
    %200 = vector.extract_strided_slice %196 {offsets = [0, 32], sizes = [8, 32], strides = [1, 1]} : vector<8x96xf32> to vector<8x32xf32>
    %201 = tpu.concatenate %197, %198, %199, %200 in 1 : vector<8x32xf32>, vector<8x32xf32>, vector<8x32xf32>, vector<8x32xf32> -> vector<8x128xf32>
    %202 = vector.extract_strided_slice %195 {offsets = [0, 64], sizes = [8, 32], strides = [1, 1]} : vector<8x96xf32> to vector<8x32xf32>
    %203 = vector.extract_strided_slice %196 {offsets = [0, 64], sizes = [8, 32], strides = [1, 1]} : vector<8x96xf32> to vector<8x32xf32>
    %204 = tpu.concatenate %202, %203 in 1 : vector<8x32xf32>, vector<8x32xf32> -> vector<8x64xf32>
    %cst_75 = arith.constant dense<0.000000e+00> : vector<8x192xf32>
    %205 = tpu.matmul %190, %13, %cst_75 {dimension_numbers = #tpu.dot_dimension_numbers<[1], [0], [0], [1], [0, 0, 1, 1], [], []>} : vector<8x64xf32>, vector<64x192xf32>, vector<8x192xf32> -> vector<8x192xf32>
    %206 = vector.extract_strided_slice %205 {offsets = [0, 0], sizes = [8, 128], strides = [1, 1]} : vector<8x192xf32> to vector<8x128xf32>
    %207 = arith.addf %201, %206 : vector<8x128xf32>
    %208 = arith.negf %207 : vector<8x128xf32>
    %209 = math.exp %208 : vector<8x128xf32>
    %cst_76 = arith.constant 1.000000e+00 : f32
    %210 = vector.broadcast %cst_76 : f32 to vector<8x128xf32>
    %211 = arith.addf %210, %209 : vector<8x128xf32>
    %212 = arith.divf %210, %211 : vector<8x128xf32>
    %213 = vector.extract_strided_slice %212 {offsets = [0, 0], sizes = [8, 64], strides = [1, 1]} : vector<8x128xf32> to vector<8x64xf32>
    %214 = vector.extract_strided_slice %212 {offsets = [0, 64], sizes = [8, 64], strides = [1, 1]} : vector<8x128xf32> to vector<8x64xf32>
    %215 = vector.extract_strided_slice %205 {offsets = [0, 128], sizes = [8, 64], strides = [1, 1]} : vector<8x192xf32> to vector<8x64xf32>
    %216 = vector.broadcast %14 : vector<1x64xf32> to vector<8x64xf32>
    %217 = arith.addf %215, %216 : vector<8x64xf32>
    %218 = arith.mulf %213, %217 : vector<8x64xf32>
    %219 = arith.addf %204, %218 : vector<8x64xf32>
    %220 = math.tanh %219 : vector<8x64xf32>
    %cst_77 = arith.constant 1.000000e+00 : f32
    %221 = vector.broadcast %cst_77 : f32 to vector<8x64xf32>
    %222 = arith.subf %221, %214 : vector<8x64xf32>
    %223 = arith.mulf %222, %220 : vector<8x64xf32>
    %224 = arith.mulf %214, %190 : vector<8x64xf32>
    %225 = arith.addf %223, %224 : vector<8x64xf32>
    %226 = vector.extract_strided_slice %225 {offsets = [0, 0], sizes = [8, 32], strides = [1, 1]} : vector<8x64xf32> to vector<8x32xf32>
    %c40_78 = arith.constant 40 : index
    %c0_79 = arith.constant 0 : index
    %227 = vector.load %arg24[%c40_78, %c0_79] : memref<64x64xf32, #tpu.memory_space<vmem>>, vector<8x32xf32>
    tpu.vector_store %arg24[%c40_78, %c0_79], %226 {strides = array<i32>} : memref<64x64xf32, #tpu.memory_space<vmem>>, vector<8x32xf32>,
    %228 = vector.extract_strided_slice %225 {offsets = [0, 32], sizes = [8, 32], strides = [1, 1]} : vector<8x64xf32> to vector<8x32xf32>
    %c16_80 = arith.constant 16 : index
    %c32_81 = arith.constant 32 : index
    %229 = vector.load %arg24[%c16_80, %c32_81] : memref<64x64xf32, #tpu.memory_space<vmem>>, vector<8x32xf32>
    tpu.vector_store %arg24[%c16_80, %c32_81], %228 {strides = array<i32>} : memref<64x64xf32, #tpu.memory_space<vmem>>, vector<8x32xf32>,
    %c48_82 = arith.constant 48 : index
    %c0_83 = arith.constant 0 : index
    %230 = vector.load %arg22[%c48_82, %c0_83] : memref<64x96xf32, #tpu.memory_space<vmem>>, vector<8x96xf32>
    %c8_84 = arith.constant 8 : index
    %c0_85 = arith.constant 0 : index
    %231 = vector.load %arg23[%c8_84, %c0_85] : memref<64x96xf32, #tpu.memory_space<vmem>>, vector<8x96xf32>
    %232 = vector.extract_strided_slice %230 {offsets = [0, 0], sizes = [8, 32], strides = [1, 1]} : vector<8x96xf32> to vector<8x32xf32>
    %233 = vector.extract_strided_slice %231 {offsets = [0, 0], sizes = [8, 32], strides = [1, 1]} : vector<8x96xf32> to vector<8x32xf32>
    %234 = vector.extract_strided_slice %230 {offsets = [0, 32], sizes = [8, 32], strides = [1, 1]} : vector<8x96xf32> to vector<8x32xf32>
    %235 = vector.extract_strided_slice %231 {offsets = [0, 32], sizes = [8, 32], strides = [1, 1]} : vector<8x96xf32> to vector<8x32xf32>
    %236 = tpu.concatenate %232, %233, %234, %235 in 1 : vector<8x32xf32>, vector<8x32xf32>, vector<8x32xf32>, vector<8x32xf32> -> vector<8x128xf32>
    %237 = vector.extract_strided_slice %230 {offsets = [0, 64], sizes = [8, 32], strides = [1, 1]} : vector<8x96xf32> to vector<8x32xf32>
    %238 = vector.extract_strided_slice %231 {offsets = [0, 64], sizes = [8, 32], strides = [1, 1]} : vector<8x96xf32> to vector<8x32xf32>
    %239 = tpu.concatenate %237, %238 in 1 : vector<8x32xf32>, vector<8x32xf32> -> vector<8x64xf32>
    %cst_86 = arith.constant dense<0.000000e+00> : vector<8x192xf32>
    %240 = tpu.matmul %225, %13, %cst_86 {dimension_numbers = #tpu.dot_dimension_numbers<[1], [0], [0], [1], [0, 0, 1, 1], [], []>} : vector<8x64xf32>, vector<64x192xf32>, vector<8x192xf32> -> vector<8x192xf32>
    %241 = vector.extract_strided_slice %240 {offsets = [0, 0], sizes = [8, 128], strides = [1, 1]} : vector<8x192xf32> to vector<8x128xf32>
    %242 = arith.addf %236, %241 : vector<8x128xf32>
    %243 = arith.negf %242 : vector<8x128xf32>
    %244 = math.exp %243 : vector<8x128xf32>
    %cst_87 = arith.constant 1.000000e+00 : f32
    %245 = vector.broadcast %cst_87 : f32 to vector<8x128xf32>
    %246 = arith.addf %245, %244 : vector<8x128xf32>
    %247 = arith.divf %245, %246 : vector<8x128xf32>
    %248 = vector.extract_strided_slice %247 {offsets = [0, 0], sizes = [8, 64], strides = [1, 1]} : vector<8x128xf32> to vector<8x64xf32>
    %249 = vector.extract_strided_slice %247 {offsets = [0, 64], sizes = [8, 64], strides = [1, 1]} : vector<8x128xf32> to vector<8x64xf32>
    %250 = vector.extract_strided_slice %240 {offsets = [0, 128], sizes = [8, 64], strides = [1, 1]} : vector<8x192xf32> to vector<8x64xf32>
    %251 = vector.broadcast %14 : vector<1x64xf32> to vector<8x64xf32>
    %252 = arith.addf %250, %251 : vector<8x64xf32>
    %253 = arith.mulf %248, %252 : vector<8x64xf32>
    %254 = arith.addf %239, %253 : vector<8x64xf32>
    %255 = math.tanh %254 : vector<8x64xf32>
    %cst_88 = arith.constant 1.000000e+00 : f32
    %256 = vector.broadcast %cst_88 : f32 to vector<8x64xf32>
    %257 = arith.subf %256, %249 : vector<8x64xf32>
    %258 = arith.mulf %257, %255 : vector<8x64xf32>
    %259 = arith.mulf %249, %225 : vector<8x64xf32>
    %260 = arith.addf %258, %259 : vector<8x64xf32>
    %261 = vector.extract_strided_slice %260 {offsets = [0, 0], sizes = [8, 32], strides = [1, 1]} : vector<8x64xf32> to vector<8x32xf32>
    %c48_89 = arith.constant 48 : index
    %c0_90 = arith.constant 0 : index
    %262 = vector.load %arg24[%c48_89, %c0_90] : memref<64x64xf32, #tpu.memory_space<vmem>>, vector<8x32xf32>
    tpu.vector_store %arg24[%c48_89, %c0_90], %261 {strides = array<i32>} : memref<64x64xf32, #tpu.memory_space<vmem>>, vector<8x32xf32>,
    %263 = vector.extract_strided_slice %260 {offsets = [0, 32], sizes = [8, 32], strides = [1, 1]} : vector<8x64xf32> to vector<8x32xf32>
    %c8_91 = arith.constant 8 : index
    %c32_92 = arith.constant 32 : index
    %264 = vector.load %arg24[%c8_91, %c32_92] : memref<64x64xf32, #tpu.memory_space<vmem>>, vector<8x32xf32>
    tpu.vector_store %arg24[%c8_91, %c32_92], %263 {strides = array<i32>} : memref<64x64xf32, #tpu.memory_space<vmem>>, vector<8x32xf32>,
    %c56_93 = arith.constant 56 : index
    %c0_94 = arith.constant 0 : index
    %265 = vector.load %arg22[%c56_93, %c0_94] : memref<64x96xf32, #tpu.memory_space<vmem>>, vector<8x96xf32>
    %c0_95 = arith.constant 0 : index
    %c0_96 = arith.constant 0 : index
    %266 = vector.load %arg23[%c0_95, %c0_96] : memref<64x96xf32, #tpu.memory_space<vmem>>, vector<8x96xf32>
    %267 = vector.extract_strided_slice %265 {offsets = [0, 0], sizes = [8, 32], strides = [1, 1]} : vector<8x96xf32> to vector<8x32xf32>
    %268 = vector.extract_strided_slice %266 {offsets = [0, 0], sizes = [8, 32], strides = [1, 1]} : vector<8x96xf32> to vector<8x32xf32>
    %269 = vector.extract_strided_slice %265 {offsets = [0, 32], sizes = [8, 32], strides = [1, 1]} : vector<8x96xf32> to vector<8x32xf32>
    %270 = vector.extract_strided_slice %266 {offsets = [0, 32], sizes = [8, 32], strides = [1, 1]} : vector<8x96xf32> to vector<8x32xf32>
    %271 = tpu.concatenate %267, %268, %269, %270 in 1 : vector<8x32xf32>, vector<8x32xf32>, vector<8x32xf32>, vector<8x32xf32> -> vector<8x128xf32>
    %272 = vector.extract_strided_slice %265 {offsets = [0, 64], sizes = [8, 32], strides = [1, 1]} : vector<8x96xf32> to vector<8x32xf32>
    %273 = vector.extract_strided_slice %266 {offsets = [0, 64], sizes = [8, 32], strides = [1, 1]} : vector<8x96xf32> to vector<8x32xf32>
    %274 = tpu.concatenate %272, %273 in 1 : vector<8x32xf32>, vector<8x32xf32> -> vector<8x64xf32>
    %cst_97 = arith.constant dense<0.000000e+00> : vector<8x192xf32>
    %275 = tpu.matmul %260, %13, %cst_97 {dimension_numbers = #tpu.dot_dimension_numbers<[1], [0], [0], [1], [0, 0, 1, 1], [], []>} : vector<8x64xf32>, vector<64x192xf32>, vector<8x192xf32> -> vector<8x192xf32>
    %276 = vector.extract_strided_slice %275 {offsets = [0, 0], sizes = [8, 128], strides = [1, 1]} : vector<8x192xf32> to vector<8x128xf32>
    %277 = arith.addf %271, %276 : vector<8x128xf32>
    %278 = arith.negf %277 : vector<8x128xf32>
    %279 = math.exp %278 : vector<8x128xf32>
    %cst_98 = arith.constant 1.000000e+00 : f32
    %280 = vector.broadcast %cst_98 : f32 to vector<8x128xf32>
    %281 = arith.addf %280, %279 : vector<8x128xf32>
    %282 = arith.divf %280, %281 : vector<8x128xf32>
    %283 = vector.extract_strided_slice %282 {offsets = [0, 0], sizes = [8, 64], strides = [1, 1]} : vector<8x128xf32> to vector<8x64xf32>
    %284 = vector.extract_strided_slice %282 {offsets = [0, 64], sizes = [8, 64], strides = [1, 1]} : vector<8x128xf32> to vector<8x64xf32>
    %285 = vector.extract_strided_slice %275 {offsets = [0, 128], sizes = [8, 64], strides = [1, 1]} : vector<8x192xf32> to vector<8x64xf32>
    %286 = vector.broadcast %14 : vector<1x64xf32> to vector<8x64xf32>
    %287 = arith.addf %285, %286 : vector<8x64xf32>
    %288 = arith.mulf %283, %287 : vector<8x64xf32>
    %289 = arith.addf %274, %288 : vector<8x64xf32>
    %290 = math.tanh %289 : vector<8x64xf32>
    %cst_99 = arith.constant 1.000000e+00 : f32
    %291 = vector.broadcast %cst_99 : f32 to vector<8x64xf32>
    %292 = arith.subf %291, %284 : vector<8x64xf32>
    %293 = arith.mulf %292, %290 : vector<8x64xf32>
    %294 = arith.mulf %284, %260 : vector<8x64xf32>
    %295 = arith.addf %293, %294 : vector<8x64xf32>
    %296 = vector.extract_strided_slice %295 {offsets = [0, 0], sizes = [8, 32], strides = [1, 1]} : vector<8x64xf32> to vector<8x32xf32>
    %c56_100 = arith.constant 56 : index
    %c0_101 = arith.constant 0 : index
    %297 = vector.load %arg24[%c56_100, %c0_101] : memref<64x64xf32, #tpu.memory_space<vmem>>, vector<8x32xf32>
    tpu.vector_store %arg24[%c56_100, %c0_101], %296 {strides = array<i32>} : memref<64x64xf32, #tpu.memory_space<vmem>>, vector<8x32xf32>,
    %298 = vector.extract_strided_slice %295 {offsets = [0, 32], sizes = [8, 32], strides = [1, 1]} : vector<8x64xf32> to vector<8x32xf32>
    %c0_102 = arith.constant 0 : index
    %c32_103 = arith.constant 32 : index
    %299 = vector.load %arg24[%c0_102, %c32_103] : memref<64x64xf32, #tpu.memory_space<vmem>>, vector<8x32xf32>
    tpu.vector_store %arg24[%c0_102, %c32_103], %298 {strides = array<i32>} : memref<64x64xf32, #tpu.memory_space<vmem>>, vector<8x32xf32>,
    %300 = vector.extract_strided_slice %295 {offsets = [0, 0], sizes = [8, 32], strides = [1, 1]} : vector<8x64xf32> to vector<8x32xf32>
    %c0_104 = arith.constant 0 : index
    %c0_105 = arith.constant 0 : index
    %c0_106 = arith.constant 0 : index
    %301 = vector.load %arg21[%c0_104, %c0_105, %c0_106] : memref<4x8x32xf32, #tpu.memory_space<vmem>>, vector<1x8x32xf32>
    %302 = vector.shape_cast %301 : vector<1x8x32xf32> to vector<8x32xf32>
    %303 = vector.shape_cast %300 : vector<8x32xf32> to vector<1x8x32xf32>
    tpu.vector_store %arg21[%c0_104, %c0_105, %c0_106], %303 {strides = array<i32>} : memref<4x8x32xf32, #tpu.memory_space<vmem>>, vector<1x8x32xf32>,
    %304 = vector.extract_strided_slice %295 {offsets = [0, 32], sizes = [8, 32], strides = [1, 1]} : vector<8x64xf32> to vector<8x32xf32>
    %c1_107 = arith.constant 1 : index
    %c0_108 = arith.constant 0 : index
    %c0_109 = arith.constant 0 : index
    %305 = vector.load %arg21[%c1_107, %c0_108, %c0_109] : memref<4x8x32xf32, #tpu.memory_space<vmem>>, vector<1x8x32xf32>
    %306 = vector.shape_cast %305 : vector<1x8x32xf32> to vector<8x32xf32>
    %307 = vector.shape_cast %304 : vector<8x32xf32> to vector<1x8x32xf32>
    tpu.vector_store %arg21[%c1_107, %c0_108, %c0_109], %307 {strides = array<i32>} : memref<4x8x32xf32, #tpu.memory_space<vmem>>, vector<1x8x32xf32>,
    %c0_110 = arith.constant 0 : index
    %c0_111 = arith.constant 0 : index
    %308 = vector.load %arg24[%c0_110, %c0_111] : memref<64x64xf32, #tpu.memory_space<vmem>>, vector<64x64xf32>
    %c0_112 = arith.constant 0 : index
    %c0_113 = arith.constant 0 : index
    %309 = vector.load %arg8[%c0_112, %c0_113] : memref<64x96xf32, #tpu.memory_space<vmem>>, vector<64x96xf32>
    %cst_114 = arith.constant dense<0.000000e+00> : vector<64x96xf32>
    %310 = tpu.matmul %308, %309, %cst_114 {dimension_numbers = #tpu.dot_dimension_numbers<[1], [0], [0], [1], [0, 0, 1, 1], [], []>} : vector<64x64xf32>, vector<64x96xf32>, vector<64x96xf32> -> vector<64x96xf32>
    %c0_115 = arith.constant 0 : index
    %c0_116 = arith.constant 0 : index
    %311 = vector.load %arg9[%c0_115, %c0_116] : memref<1x96xf32, #tpu.memory_space<vmem>>, vector<1x96xf32>
    %312 = vector.broadcast %311 : vector<1x96xf32> to vector<64x96xf32>
    %313 = arith.addf %310, %312 : vector<64x96xf32>
    %c0_117 = arith.constant 0 : index
    %c0_118 = arith.constant 0 : index
    %314 = vector.load %arg22[%c0_117, %c0_118] : memref<64x96xf32, #tpu.memory_space<vmem>>, vector<64x96xf32>
    tpu.vector_store %arg22[%c0_117, %c0_118], %313 {strides = array<i32>} : memref<64x96xf32, #tpu.memory_space<vmem>>, vector<64x96xf32>,
    %c0_119 = arith.constant 0 : index
    %c0_120 = arith.constant 0 : index
    %315 = vector.load %arg10[%c0_119, %c0_120] : memref<64x96xf32, #tpu.memory_space<vmem>>, vector<64x96xf32>
    %cst_121 = arith.constant dense<0.000000e+00> : vector<64x96xf32>
    %316 = tpu.matmul %308, %315, %cst_121 {dimension_numbers = #tpu.dot_dimension_numbers<[1], [0], [0], [1], [0, 0, 1, 1], [], []>} : vector<64x64xf32>, vector<64x96xf32>, vector<64x96xf32> -> vector<64x96xf32>
    %c0_122 = arith.constant 0 : index
    %c0_123 = arith.constant 0 : index
    %317 = vector.load %arg11[%c0_122, %c0_123] : memref<1x96xf32, #tpu.memory_space<vmem>>, vector<1x96xf32>
    %318 = vector.broadcast %317 : vector<1x96xf32> to vector<64x96xf32>
    %319 = arith.addf %316, %318 : vector<64x96xf32>
    %c0_124 = arith.constant 0 : index
    %c0_125 = arith.constant 0 : index
    %320 = vector.load %arg23[%c0_124, %c0_125] : memref<64x96xf32, #tpu.memory_space<vmem>>, vector<64x96xf32>
    tpu.vector_store %arg23[%c0_124, %c0_125], %319 {strides = array<i32>} : memref<64x96xf32, #tpu.memory_space<vmem>>, vector<64x96xf32>,
    %c0_126 = arith.constant 0 : index
    %c0_127 = arith.constant 0 : index
    %321 = vector.load %arg12[%c0_126, %c0_127] : memref<64x192xf32, #tpu.memory_space<vmem>>, vector<64x192xf32>
    %c0_128 = arith.constant 0 : index
    %c0_129 = arith.constant 0 : index
    %322 = vector.load %arg13[%c0_128, %c0_129] : memref<1x64xf32, #tpu.memory_space<vmem>>, vector<1x64xf32>
    %c2 = arith.constant 2 : index
    %c0_130 = arith.constant 0 : index
    %c0_131 = arith.constant 0 : index
    %323 = vector.load %arg1[%c2, %c0_130, %c0_131] : memref<4x8x32xf32, #tpu.memory_space<vmem>>, vector<1x8x32xf32>
    %324 = vector.shape_cast %323 : vector<1x8x32xf32> to vector<8x32xf32>
    %c3 = arith.constant 3 : index
    %c0_132 = arith.constant 0 : index
    %c0_133 = arith.constant 0 : index
    %325 = vector.load %arg1[%c3, %c0_132, %c0_133] : memref<4x8x32xf32, #tpu.memory_space<vmem>>, vector<1x8x32xf32>
    %326 = vector.shape_cast %325 : vector<1x8x32xf32> to vector<8x32xf32>
    %327 = tpu.concatenate %324, %326 in 1 : vector<8x32xf32>, vector<8x32xf32> -> vector<8x64xf32>
    %c0_134 = arith.constant 0 : index
    %c0_135 = arith.constant 0 : index
    %328 = vector.load %arg22[%c0_134, %c0_135] : memref<64x96xf32, #tpu.memory_space<vmem>>, vector<8x96xf32>
    %c56_136 = arith.constant 56 : index
    %c0_137 = arith.constant 0 : index
    %329 = vector.load %arg23[%c56_136, %c0_137] : memref<64x96xf32, #tpu.memory_space<vmem>>, vector<8x96xf32>
    %330 = vector.extract_strided_slice %328 {offsets = [0, 0], sizes = [8, 32], strides = [1, 1]} : vector<8x96xf32> to vector<8x32xf32>
    %331 = vector.extract_strided_slice %329 {offsets = [0, 0], sizes = [8, 32], strides = [1, 1]} : vector<8x96xf32> to vector<8x32xf32>
    %332 = vector.extract_strided_slice %328 {offsets = [0, 32], sizes = [8, 32], strides = [1, 1]} : vector<8x96xf32> to vector<8x32xf32>
    %333 = vector.extract_strided_slice %329 {offsets = [0, 32], sizes = [8, 32], strides = [1, 1]} : vector<8x96xf32> to vector<8x32xf32>
    %334 = tpu.concatenate %330, %331, %332, %333 in 1 : vector<8x32xf32>, vector<8x32xf32>, vector<8x32xf32>, vector<8x32xf32> -> vector<8x128xf32>
    %335 = vector.extract_strided_slice %328 {offsets = [0, 64], sizes = [8, 32], strides = [1, 1]} : vector<8x96xf32> to vector<8x32xf32>
    %336 = vector.extract_strided_slice %329 {offsets = [0, 64], sizes = [8, 32], strides = [1, 1]} : vector<8x96xf32> to vector<8x32xf32>
    %337 = tpu.concatenate %335, %336 in 1 : vector<8x32xf32>, vector<8x32xf32> -> vector<8x64xf32>
    %cst_138 = arith.constant dense<0.000000e+00> : vector<8x192xf32>
    %338 = tpu.matmul %327, %321, %cst_138 {dimension_numbers = #tpu.dot_dimension_numbers<[1], [0], [0], [1], [0, 0, 1, 1], [], []>} : vector<8x64xf32>, vector<64x192xf32>, vector<8x192xf32> -> vector<8x192xf32>
    %339 = vector.extract_strided_slice %338 {offsets = [0, 0], sizes = [8, 128], strides = [1, 1]} : vector<8x192xf32> to vector<8x128xf32>
    %340 = arith.addf %334, %339 : vector<8x128xf32>
    %341 = arith.negf %340 : vector<8x128xf32>
    %342 = math.exp %341 : vector<8x128xf32>
    %cst_139 = arith.constant 1.000000e+00 : f32
    %343 = vector.broadcast %cst_139 : f32 to vector<8x128xf32>
    %344 = arith.addf %343, %342 : vector<8x128xf32>
    %345 = arith.divf %343, %344 : vector<8x128xf32>
    %346 = vector.extract_strided_slice %345 {offsets = [0, 0], sizes = [8, 64], strides = [1, 1]} : vector<8x128xf32> to vector<8x64xf32>
    %347 = vector.extract_strided_slice %345 {offsets = [0, 64], sizes = [8, 64], strides = [1, 1]} : vector<8x128xf32> to vector<8x64xf32>
    %348 = vector.extract_strided_slice %338 {offsets = [0, 128], sizes = [8, 64], strides = [1, 1]} : vector<8x192xf32> to vector<8x64xf32>
    %349 = vector.broadcast %322 : vector<1x64xf32> to vector<8x64xf32>
    %350 = arith.addf %348, %349 : vector<8x64xf32>
    %351 = arith.mulf %346, %350 : vector<8x64xf32>
    %352 = arith.addf %337, %351 : vector<8x64xf32>
    %353 = math.tanh %352 : vector<8x64xf32>
    %cst_140 = arith.constant 1.000000e+00 : f32
    %354 = vector.broadcast %cst_140 : f32 to vector<8x64xf32>
    %355 = arith.subf %354, %347 : vector<8x64xf32>
    %356 = arith.mulf %355, %353 : vector<8x64xf32>
    %357 = arith.mulf %347, %327 : vector<8x64xf32>
    %358 = arith.addf %356, %357 : vector<8x64xf32>
    %359 = vector.extract_strided_slice %358 {offsets = [0, 0], sizes = [8, 32], strides = [1, 1]} : vector<8x64xf32> to vector<8x32xf32>
    %c0_141 = arith.constant 0 : index
    %c0_142 = arith.constant 0 : index
    %360 = vector.load %arg24[%c0_141, %c0_142] : memref<64x64xf32, #tpu.memory_space<vmem>>, vector<8x32xf32>
    tpu.vector_store %arg24[%c0_141, %c0_142], %359 {strides = array<i32>} : memref<64x64xf32, #tpu.memory_space<vmem>>, vector<8x32xf32>,
    %361 = vector.extract_strided_slice %358 {offsets = [0, 32], sizes = [8, 32], strides = [1, 1]} : vector<8x64xf32> to vector<8x32xf32>
    %c56_143 = arith.constant 56 : index
    %c32_144 = arith.constant 32 : index
    %362 = vector.load %arg24[%c56_143, %c32_144] : memref<64x64xf32, #tpu.memory_space<vmem>>, vector<8x32xf32>
    tpu.vector_store %arg24[%c56_143, %c32_144], %361 {strides = array<i32>} : memref<64x64xf32, #tpu.memory_space<vmem>>, vector<8x32xf32>,
    %c8_145 = arith.constant 8 : index
    %c0_146 = arith.constant 0 : index
    %363 = vector.load %arg22[%c8_145, %c0_146] : memref<64x96xf32, #tpu.memory_space<vmem>>, vector<8x96xf32>
    %c48_147 = arith.constant 48 : index
    %c0_148 = arith.constant 0 : index
    %364 = vector.load %arg23[%c48_147, %c0_148] : memref<64x96xf32, #tpu.memory_space<vmem>>, vector<8x96xf32>
    %365 = vector.extract_strided_slice %363 {offsets = [0, 0], sizes = [8, 32], strides = [1, 1]} : vector<8x96xf32> to vector<8x32xf32>
    %366 = vector.extract_strided_slice %364 {offsets = [0, 0], sizes = [8, 32], strides = [1, 1]} : vector<8x96xf32> to vector<8x32xf32>
    %367 = vector.extract_strided_slice %363 {offsets = [0, 32], sizes = [8, 32], strides = [1, 1]} : vector<8x96xf32> to vector<8x32xf32>
    %368 = vector.extract_strided_slice %364 {offsets = [0, 32], sizes = [8, 32], strides = [1, 1]} : vector<8x96xf32> to vector<8x32xf32>
    %369 = tpu.concatenate %365, %366, %367, %368 in 1 : vector<8x32xf32>, vector<8x32xf32>, vector<8x32xf32>, vector<8x32xf32> -> vector<8x128xf32>
    %370 = vector.extract_strided_slice %363 {offsets = [0, 64], sizes = [8, 32], strides = [1, 1]} : vector<8x96xf32> to vector<8x32xf32>
    %371 = vector.extract_strided_slice %364 {offsets = [0, 64], sizes = [8, 32], strides = [1, 1]} : vector<8x96xf32> to vector<8x32xf32>
    %372 = tpu.concatenate %370, %371 in 1 : vector<8x32xf32>, vector<8x32xf32> -> vector<8x64xf32>
    %cst_149 = arith.constant dense<0.000000e+00> : vector<8x192xf32>
    %373 = tpu.matmul %358, %321, %cst_149 {dimension_numbers = #tpu.dot_dimension_numbers<[1], [0], [0], [1], [0, 0, 1, 1], [], []>} : vector<8x64xf32>, vector<64x192xf32>, vector<8x192xf32> -> vector<8x192xf32>
    %374 = vector.extract_strided_slice %373 {offsets = [0, 0], sizes = [8, 128], strides = [1, 1]} : vector<8x192xf32> to vector<8x128xf32>
    %375 = arith.addf %369, %374 : vector<8x128xf32>
    %376 = arith.negf %375 : vector<8x128xf32>
    %377 = math.exp %376 : vector<8x128xf32>
    %cst_150 = arith.constant 1.000000e+00 : f32
    %378 = vector.broadcast %cst_150 : f32 to vector<8x128xf32>
    %379 = arith.addf %378, %377 : vector<8x128xf32>
    %380 = arith.divf %378, %379 : vector<8x128xf32>
    %381 = vector.extract_strided_slice %380 {offsets = [0, 0], sizes = [8, 64], strides = [1, 1]} : vector<8x128xf32> to vector<8x64xf32>
    %382 = vector.extract_strided_slice %380 {offsets = [0, 64], sizes = [8, 64], strides = [1, 1]} : vector<8x128xf32> to vector<8x64xf32>
    %383 = vector.extract_strided_slice %373 {offsets = [0, 128], sizes = [8, 64], strides = [1, 1]} : vector<8x192xf32> to vector<8x64xf32>
    %384 = vector.broadcast %322 : vector<1x64xf32> to vector<8x64xf32>
    %385 = arith.addf %383, %384 : vector<8x64xf32>
    %386 = arith.mulf %381, %385 : vector<8x64xf32>
    %387 = arith.addf %372, %386 : vector<8x64xf32>
    %388 = math.tanh %387 : vector<8x64xf32>
    %cst_151 = arith.constant 1.000000e+00 : f32
    %389 = vector.broadcast %cst_151 : f32 to vector<8x64xf32>
    %390 = arith.subf %389, %382 : vector<8x64xf32>
    %391 = arith.mulf %390, %388 : vector<8x64xf32>
    %392 = arith.mulf %382, %358 : vector<8x64xf32>
    %393 = arith.addf %391, %392 : vector<8x64xf32>
    %394 = vector.extract_strided_slice %393 {offsets = [0, 0], sizes = [8, 32], strides = [1, 1]} : vector<8x64xf32> to vector<8x32xf32>
    %c8_152 = arith.constant 8 : index
    %c0_153 = arith.constant 0 : index
    %395 = vector.load %arg24[%c8_152, %c0_153] : memref<64x64xf32, #tpu.memory_space<vmem>>, vector<8x32xf32>
    tpu.vector_store %arg24[%c8_152, %c0_153], %394 {strides = array<i32>} : memref<64x64xf32, #tpu.memory_space<vmem>>, vector<8x32xf32>,
    %396 = vector.extract_strided_slice %393 {offsets = [0, 32], sizes = [8, 32], strides = [1, 1]} : vector<8x64xf32> to vector<8x32xf32>
    %c48_154 = arith.constant 48 : index
    %c32_155 = arith.constant 32 : index
    %397 = vector.load %arg24[%c48_154, %c32_155] : memref<64x64xf32, #tpu.memory_space<vmem>>, vector<8x32xf32>
    tpu.vector_store %arg24[%c48_154, %c32_155], %396 {strides = array<i32>} : memref<64x64xf32, #tpu.memory_space<vmem>>, vector<8x32xf32>,
    %c16_156 = arith.constant 16 : index
    %c0_157 = arith.constant 0 : index
    %398 = vector.load %arg22[%c16_156, %c0_157] : memref<64x96xf32, #tpu.memory_space<vmem>>, vector<8x96xf32>
    %c40_158 = arith.constant 40 : index
    %c0_159 = arith.constant 0 : index
    %399 = vector.load %arg23[%c40_158, %c0_159] : memref<64x96xf32, #tpu.memory_space<vmem>>, vector<8x96xf32>
    %400 = vector.extract_strided_slice %398 {offsets = [0, 0], sizes = [8, 32], strides = [1, 1]} : vector<8x96xf32> to vector<8x32xf32>
    %401 = vector.extract_strided_slice %399 {offsets = [0, 0], sizes = [8, 32], strides = [1, 1]} : vector<8x96xf32> to vector<8x32xf32>
    %402 = vector.extract_strided_slice %398 {offsets = [0, 32], sizes = [8, 32], strides = [1, 1]} : vector<8x96xf32> to vector<8x32xf32>
    %403 = vector.extract_strided_slice %399 {offsets = [0, 32], sizes = [8, 32], strides = [1, 1]} : vector<8x96xf32> to vector<8x32xf32>
    %404 = tpu.concatenate %400, %401, %402, %403 in 1 : vector<8x32xf32>, vector<8x32xf32>, vector<8x32xf32>, vector<8x32xf32> -> vector<8x128xf32>
    %405 = vector.extract_strided_slice %398 {offsets = [0, 64], sizes = [8, 32], strides = [1, 1]} : vector<8x96xf32> to vector<8x32xf32>
    %406 = vector.extract_strided_slice %399 {offsets = [0, 64], sizes = [8, 32], strides = [1, 1]} : vector<8x96xf32> to vector<8x32xf32>
    %407 = tpu.concatenate %405, %406 in 1 : vector<8x32xf32>, vector<8x32xf32> -> vector<8x64xf32>
    %cst_160 = arith.constant dense<0.000000e+00> : vector<8x192xf32>
    %408 = tpu.matmul %393, %321, %cst_160 {dimension_numbers = #tpu.dot_dimension_numbers<[1], [0], [0], [1], [0, 0, 1, 1], [], []>} : vector<8x64xf32>, vector<64x192xf32>, vector<8x192xf32> -> vector<8x192xf32>
    %409 = vector.extract_strided_slice %408 {offsets = [0, 0], sizes = [8, 128], strides = [1, 1]} : vector<8x192xf32> to vector<8x128xf32>
    %410 = arith.addf %404, %409 : vector<8x128xf32>
    %411 = arith.negf %410 : vector<8x128xf32>
    %412 = math.exp %411 : vector<8x128xf32>
    %cst_161 = arith.constant 1.000000e+00 : f32
    %413 = vector.broadcast %cst_161 : f32 to vector<8x128xf32>
    %414 = arith.addf %413, %412 : vector<8x128xf32>
    %415 = arith.divf %413, %414 : vector<8x128xf32>
    %416 = vector.extract_strided_slice %415 {offsets = [0, 0], sizes = [8, 64], strides = [1, 1]} : vector<8x128xf32> to vector<8x64xf32>
    %417 = vector.extract_strided_slice %415 {offsets = [0, 64], sizes = [8, 64], strides = [1, 1]} : vector<8x128xf32> to vector<8x64xf32>
    %418 = vector.extract_strided_slice %408 {offsets = [0, 128], sizes = [8, 64], strides = [1, 1]} : vector<8x192xf32> to vector<8x64xf32>
    %419 = vector.broadcast %322 : vector<1x64xf32> to vector<8x64xf32>
    %420 = arith.addf %418, %419 : vector<8x64xf32>
    %421 = arith.mulf %416, %420 : vector<8x64xf32>
    %422 = arith.addf %407, %421 : vector<8x64xf32>
    %423 = math.tanh %422 : vector<8x64xf32>
    %cst_162 = arith.constant 1.000000e+00 : f32
    %424 = vector.broadcast %cst_162 : f32 to vector<8x64xf32>
    %425 = arith.subf %424, %417 : vector<8x64xf32>
    %426 = arith.mulf %425, %423 : vector<8x64xf32>
    %427 = arith.mulf %417, %393 : vector<8x64xf32>
    %428 = arith.addf %426, %427 : vector<8x64xf32>
    %429 = vector.extract_strided_slice %428 {offsets = [0, 0], sizes = [8, 32], strides = [1, 1]} : vector<8x64xf32> to vector<8x32xf32>
    %c16_163 = arith.constant 16 : index
    %c0_164 = arith.constant 0 : index
    %430 = vector.load %arg24[%c16_163, %c0_164] : memref<64x64xf32, #tpu.memory_space<vmem>>, vector<8x32xf32>
    tpu.vector_store %arg24[%c16_163, %c0_164], %429 {strides = array<i32>} : memref<64x64xf32, #tpu.memory_space<vmem>>, vector<8x32xf32>,
    %431 = vector.extract_strided_slice %428 {offsets = [0, 32], sizes = [8, 32], strides = [1, 1]} : vector<8x64xf32> to vector<8x32xf32>
    %c40_165 = arith.constant 40 : index
    %c32_166 = arith.constant 32 : index
    %432 = vector.load %arg24[%c40_165, %c32_166] : memref<64x64xf32, #tpu.memory_space<vmem>>, vector<8x32xf32>
    tpu.vector_store %arg24[%c40_165, %c32_166], %431 {strides = array<i32>} : memref<64x64xf32, #tpu.memory_space<vmem>>, vector<8x32xf32>,
    %c24_167 = arith.constant 24 : index
    %c0_168 = arith.constant 0 : index
    %433 = vector.load %arg22[%c24_167, %c0_168] : memref<64x96xf32, #tpu.memory_space<vmem>>, vector<8x96xf32>
    %c32_169 = arith.constant 32 : index
    %c0_170 = arith.constant 0 : index
    %434 = vector.load %arg23[%c32_169, %c0_170] : memref<64x96xf32, #tpu.memory_space<vmem>>, vector<8x96xf32>
    %435 = vector.extract_strided_slice %433 {offsets = [0, 0], sizes = [8, 32], strides = [1, 1]} : vector<8x96xf32> to vector<8x32xf32>
    %436 = vector.extract_strided_slice %434 {offsets = [0, 0], sizes = [8, 32], strides = [1, 1]} : vector<8x96xf32> to vector<8x32xf32>
    %437 = vector.extract_strided_slice %433 {offsets = [0, 32], sizes = [8, 32], strides = [1, 1]} : vector<8x96xf32> to vector<8x32xf32>
    %438 = vector.extract_strided_slice %434 {offsets = [0, 32], sizes = [8, 32], strides = [1, 1]} : vector<8x96xf32> to vector<8x32xf32>
    %439 = tpu.concatenate %435, %436, %437, %438 in 1 : vector<8x32xf32>, vector<8x32xf32>, vector<8x32xf32>, vector<8x32xf32> -> vector<8x128xf32>
    %440 = vector.extract_strided_slice %433 {offsets = [0, 64], sizes = [8, 32], strides = [1, 1]} : vector<8x96xf32> to vector<8x32xf32>
    %441 = vector.extract_strided_slice %434 {offsets = [0, 64], sizes = [8, 32], strides = [1, 1]} : vector<8x96xf32> to vector<8x32xf32>
    %442 = tpu.concatenate %440, %441 in 1 : vector<8x32xf32>, vector<8x32xf32> -> vector<8x64xf32>
    %cst_171 = arith.constant dense<0.000000e+00> : vector<8x192xf32>
    %443 = tpu.matmul %428, %321, %cst_171 {dimension_numbers = #tpu.dot_dimension_numbers<[1], [0], [0], [1], [0, 0, 1, 1], [], []>} : vector<8x64xf32>, vector<64x192xf32>, vector<8x192xf32> -> vector<8x192xf32>
    %444 = vector.extract_strided_slice %443 {offsets = [0, 0], sizes = [8, 128], strides = [1, 1]} : vector<8x192xf32> to vector<8x128xf32>
    %445 = arith.addf %439, %444 : vector<8x128xf32>
    %446 = arith.negf %445 : vector<8x128xf32>
    %447 = math.exp %446 : vector<8x128xf32>
    %cst_172 = arith.constant 1.000000e+00 : f32
    %448 = vector.broadcast %cst_172 : f32 to vector<8x128xf32>
    %449 = arith.addf %448, %447 : vector<8x128xf32>
    %450 = arith.divf %448, %449 : vector<8x128xf32>
    %451 = vector.extract_strided_slice %450 {offsets = [0, 0], sizes = [8, 64], strides = [1, 1]} : vector<8x128xf32> to vector<8x64xf32>
    %452 = vector.extract_strided_slice %450 {offsets = [0, 64], sizes = [8, 64], strides = [1, 1]} : vector<8x128xf32> to vector<8x64xf32>
    %453 = vector.extract_strided_slice %443 {offsets = [0, 128], sizes = [8, 64], strides = [1, 1]} : vector<8x192xf32> to vector<8x64xf32>
    %454 = vector.broadcast %322 : vector<1x64xf32> to vector<8x64xf32>
    %455 = arith.addf %453, %454 : vector<8x64xf32>
    %456 = arith.mulf %451, %455 : vector<8x64xf32>
    %457 = arith.addf %442, %456 : vector<8x64xf32>
    %458 = math.tanh %457 : vector<8x64xf32>
    %cst_173 = arith.constant 1.000000e+00 : f32
    %459 = vector.broadcast %cst_173 : f32 to vector<8x64xf32>
    %460 = arith.subf %459, %452 : vector<8x64xf32>
    %461 = arith.mulf %460, %458 : vector<8x64xf32>
    %462 = arith.mulf %452, %428 : vector<8x64xf32>
    %463 = arith.addf %461, %462 : vector<8x64xf32>
    %464 = vector.extract_strided_slice %463 {offsets = [0, 0], sizes = [8, 32], strides = [1, 1]} : vector<8x64xf32> to vector<8x32xf32>
    %c24_174 = arith.constant 24 : index
    %c0_175 = arith.constant 0 : index
    %465 = vector.load %arg24[%c24_174, %c0_175] : memref<64x64xf32, #tpu.memory_space<vmem>>, vector<8x32xf32>
    tpu.vector_store %arg24[%c24_174, %c0_175], %464 {strides = array<i32>} : memref<64x64xf32, #tpu.memory_space<vmem>>, vector<8x32xf32>,
    %466 = vector.extract_strided_slice %463 {offsets = [0, 32], sizes = [8, 32], strides = [1, 1]} : vector<8x64xf32> to vector<8x32xf32>
    %c32_176 = arith.constant 32 : index
    %c32_177 = arith.constant 32 : index
    %467 = vector.load %arg24[%c32_176, %c32_177] : memref<64x64xf32, #tpu.memory_space<vmem>>, vector<8x32xf32>
    tpu.vector_store %arg24[%c32_176, %c32_177], %466 {strides = array<i32>} : memref<64x64xf32, #tpu.memory_space<vmem>>, vector<8x32xf32>,
    %c32_178 = arith.constant 32 : index
    %c0_179 = arith.constant 0 : index
    %468 = vector.load %arg22[%c32_178, %c0_179] : memref<64x96xf32, #tpu.memory_space<vmem>>, vector<8x96xf32>
    %c24_180 = arith.constant 24 : index
    %c0_181 = arith.constant 0 : index
    %469 = vector.load %arg23[%c24_180, %c0_181] : memref<64x96xf32, #tpu.memory_space<vmem>>, vector<8x96xf32>
    %470 = vector.extract_strided_slice %468 {offsets = [0, 0], sizes = [8, 32], strides = [1, 1]} : vector<8x96xf32> to vector<8x32xf32>
    %471 = vector.extract_strided_slice %469 {offsets = [0, 0], sizes = [8, 32], strides = [1, 1]} : vector<8x96xf32> to vector<8x32xf32>
    %472 = vector.extract_strided_slice %468 {offsets = [0, 32], sizes = [8, 32], strides = [1, 1]} : vector<8x96xf32> to vector<8x32xf32>
    %473 = vector.extract_strided_slice %469 {offsets = [0, 32], sizes = [8, 32], strides = [1, 1]} : vector<8x96xf32> to vector<8x32xf32>
    %474 = tpu.concatenate %470, %471, %472, %473 in 1 : vector<8x32xf32>, vector<8x32xf32>, vector<8x32xf32>, vector<8x32xf32> -> vector<8x128xf32>
    %475 = vector.extract_strided_slice %468 {offsets = [0, 64], sizes = [8, 32], strides = [1, 1]} : vector<8x96xf32> to vector<8x32xf32>
    %476 = vector.extract_strided_slice %469 {offsets = [0, 64], sizes = [8, 32], strides = [1, 1]} : vector<8x96xf32> to vector<8x32xf32>
    %477 = tpu.concatenate %475, %476 in 1 : vector<8x32xf32>, vector<8x32xf32> -> vector<8x64xf32>
    %cst_182 = arith.constant dense<0.000000e+00> : vector<8x192xf32>
    %478 = tpu.matmul %463, %321, %cst_182 {dimension_numbers = #tpu.dot_dimension_numbers<[1], [0], [0], [1], [0, 0, 1, 1], [], []>} : vector<8x64xf32>, vector<64x192xf32>, vector<8x192xf32> -> vector<8x192xf32>
    %479 = vector.extract_strided_slice %478 {offsets = [0, 0], sizes = [8, 128], strides = [1, 1]} : vector<8x192xf32> to vector<8x128xf32>
    %480 = arith.addf %474, %479 : vector<8x128xf32>
    %481 = arith.negf %480 : vector<8x128xf32>
    %482 = math.exp %481 : vector<8x128xf32>
    %cst_183 = arith.constant 1.000000e+00 : f32
    %483 = vector.broadcast %cst_183 : f32 to vector<8x128xf32>
    %484 = arith.addf %483, %482 : vector<8x128xf32>
    %485 = arith.divf %483, %484 : vector<8x128xf32>
    %486 = vector.extract_strided_slice %485 {offsets = [0, 0], sizes = [8, 64], strides = [1, 1]} : vector<8x128xf32> to vector<8x64xf32>
    %487 = vector.extract_strided_slice %485 {offsets = [0, 64], sizes = [8, 64], strides = [1, 1]} : vector<8x128xf32> to vector<8x64xf32>
    %488 = vector.extract_strided_slice %478 {offsets = [0, 128], sizes = [8, 64], strides = [1, 1]} : vector<8x192xf32> to vector<8x64xf32>
    %489 = vector.broadcast %322 : vector<1x64xf32> to vector<8x64xf32>
    %490 = arith.addf %488, %489 : vector<8x64xf32>
    %491 = arith.mulf %486, %490 : vector<8x64xf32>
    %492 = arith.addf %477, %491 : vector<8x64xf32>
    %493 = math.tanh %492 : vector<8x64xf32>
    %cst_184 = arith.constant 1.000000e+00 : f32
    %494 = vector.broadcast %cst_184 : f32 to vector<8x64xf32>
    %495 = arith.subf %494, %487 : vector<8x64xf32>
    %496 = arith.mulf %495, %493 : vector<8x64xf32>
    %497 = arith.mulf %487, %463 : vector<8x64xf32>
    %498 = arith.addf %496, %497 : vector<8x64xf32>
    %499 = vector.extract_strided_slice %498 {offsets = [0, 0], sizes = [8, 32], strides = [1, 1]} : vector<8x64xf32> to vector<8x32xf32>
    %c32_185 = arith.constant 32 : index
    %c0_186 = arith.constant 0 : index
    %500 = vector.load %arg24[%c32_185, %c0_186] : memref<64x64xf32, #tpu.memory_space<vmem>>, vector<8x32xf32>
    tpu.vector_store %arg24[%c32_185, %c0_186], %499 {strides = array<i32>} : memref<64x64xf32, #tpu.memory_space<vmem>>, vector<8x32xf32>,
    %501 = vector.extract_strided_slice %498 {offsets = [0, 32], sizes = [8, 32], strides = [1, 1]} : vector<8x64xf32> to vector<8x32xf32>
    %c24_187 = arith.constant 24 : index
    %c32_188 = arith.constant 32 : index
    %502 = vector.load %arg24[%c24_187, %c32_188] : memref<64x64xf32, #tpu.memory_space<vmem>>, vector<8x32xf32>
    tpu.vector_store %arg24[%c24_187, %c32_188], %501 {strides = array<i32>} : memref<64x64xf32, #tpu.memory_space<vmem>>, vector<8x32xf32>,
    %c40_189 = arith.constant 40 : index
    %c0_190 = arith.constant 0 : index
    %503 = vector.load %arg22[%c40_189, %c0_190] : memref<64x96xf32, #tpu.memory_space<vmem>>, vector<8x96xf32>
    %c16_191 = arith.constant 16 : index
    %c0_192 = arith.constant 0 : index
    %504 = vector.load %arg23[%c16_191, %c0_192] : memref<64x96xf32, #tpu.memory_space<vmem>>, vector<8x96xf32>
    %505 = vector.extract_strided_slice %503 {offsets = [0, 0], sizes = [8, 32], strides = [1, 1]} : vector<8x96xf32> to vector<8x32xf32>
    %506 = vector.extract_strided_slice %504 {offsets = [0, 0], sizes = [8, 32], strides = [1, 1]} : vector<8x96xf32> to vector<8x32xf32>
    %507 = vector.extract_strided_slice %503 {offsets = [0, 32], sizes = [8, 32], strides = [1, 1]} : vector<8x96xf32> to vector<8x32xf32>
    %508 = vector.extract_strided_slice %504 {offsets = [0, 32], sizes = [8, 32], strides = [1, 1]} : vector<8x96xf32> to vector<8x32xf32>
    %509 = tpu.concatenate %505, %506, %507, %508 in 1 : vector<8x32xf32>, vector<8x32xf32>, vector<8x32xf32>, vector<8x32xf32> -> vector<8x128xf32>
    %510 = vector.extract_strided_slice %503 {offsets = [0, 64], sizes = [8, 32], strides = [1, 1]} : vector<8x96xf32> to vector<8x32xf32>
    %511 = vector.extract_strided_slice %504 {offsets = [0, 64], sizes = [8, 32], strides = [1, 1]} : vector<8x96xf32> to vector<8x32xf32>
    %512 = tpu.concatenate %510, %511 in 1 : vector<8x32xf32>, vector<8x32xf32> -> vector<8x64xf32>
    %cst_193 = arith.constant dense<0.000000e+00> : vector<8x192xf32>
    %513 = tpu.matmul %498, %321, %cst_193 {dimension_numbers = #tpu.dot_dimension_numbers<[1], [0], [0], [1], [0, 0, 1, 1], [], []>} : vector<8x64xf32>, vector<64x192xf32>, vector<8x192xf32> -> vector<8x192xf32>
    %514 = vector.extract_strided_slice %513 {offsets = [0, 0], sizes = [8, 128], strides = [1, 1]} : vector<8x192xf32> to vector<8x128xf32>
    %515 = arith.addf %509, %514 : vector<8x128xf32>
    %516 = arith.negf %515 : vector<8x128xf32>
    %517 = math.exp %516 : vector<8x128xf32>
    %cst_194 = arith.constant 1.000000e+00 : f32
    %518 = vector.broadcast %cst_194 : f32 to vector<8x128xf32>
    %519 = arith.addf %518, %517 : vector<8x128xf32>
    %520 = arith.divf %518, %519 : vector<8x128xf32>
    %521 = vector.extract_strided_slice %520 {offsets = [0, 0], sizes = [8, 64], strides = [1, 1]} : vector<8x128xf32> to vector<8x64xf32>
    %522 = vector.extract_strided_slice %520 {offsets = [0, 64], sizes = [8, 64], strides = [1, 1]} : vector<8x128xf32> to vector<8x64xf32>
    %523 = vector.extract_strided_slice %513 {offsets = [0, 128], sizes = [8, 64], strides = [1, 1]} : vector<8x192xf32> to vector<8x64xf32>
    %524 = vector.broadcast %322 : vector<1x64xf32> to vector<8x64xf32>
    %525 = arith.addf %523, %524 : vector<8x64xf32>
    %526 = arith.mulf %521, %525 : vector<8x64xf32>
    %527 = arith.addf %512, %526 : vector<8x64xf32>
    %528 = math.tanh %527 : vector<8x64xf32>
    %cst_195 = arith.constant 1.000000e+00 : f32
    %529 = vector.broadcast %cst_195 : f32 to vector<8x64xf32>
    %530 = arith.subf %529, %522 : vector<8x64xf32>
    %531 = arith.mulf %530, %528 : vector<8x64xf32>
    %532 = arith.mulf %522, %498 : vector<8x64xf32>
    %533 = arith.addf %531, %532 : vector<8x64xf32>
    %534 = vector.extract_strided_slice %533 {offsets = [0, 0], sizes = [8, 32], strides = [1, 1]} : vector<8x64xf32> to vector<8x32xf32>
    %c40_196 = arith.constant 40 : index
    %c0_197 = arith.constant 0 : index
    %535 = vector.load %arg24[%c40_196, %c0_197] : memref<64x64xf32, #tpu.memory_space<vmem>>, vector<8x32xf32>
    tpu.vector_store %arg24[%c40_196, %c0_197], %534 {strides = array<i32>} : memref<64x64xf32, #tpu.memory_space<vmem>>, vector<8x32xf32>,
    %536 = vector.extract_strided_slice %533 {offsets = [0, 32], sizes = [8, 32], strides = [1, 1]} : vector<8x64xf32> to vector<8x32xf32>
    %c16_198 = arith.constant 16 : index
    %c32_199 = arith.constant 32 : index
    %537 = vector.load %arg24[%c16_198, %c32_199] : memref<64x64xf32, #tpu.memory_space<vmem>>, vector<8x32xf32>
    tpu.vector_store %arg24[%c16_198, %c32_199], %536 {strides = array<i32>} : memref<64x64xf32, #tpu.memory_space<vmem>>, vector<8x32xf32>,
    %c48_200 = arith.constant 48 : index
    %c0_201 = arith.constant 0 : index
    %538 = vector.load %arg22[%c48_200, %c0_201] : memref<64x96xf32, #tpu.memory_space<vmem>>, vector<8x96xf32>
    %c8_202 = arith.constant 8 : index
    %c0_203 = arith.constant 0 : index
    %539 = vector.load %arg23[%c8_202, %c0_203] : memref<64x96xf32, #tpu.memory_space<vmem>>, vector<8x96xf32>
    %540 = vector.extract_strided_slice %538 {offsets = [0, 0], sizes = [8, 32], strides = [1, 1]} : vector<8x96xf32> to vector<8x32xf32>
    %541 = vector.extract_strided_slice %539 {offsets = [0, 0], sizes = [8, 32], strides = [1, 1]} : vector<8x96xf32> to vector<8x32xf32>
    %542 = vector.extract_strided_slice %538 {offsets = [0, 32], sizes = [8, 32], strides = [1, 1]} : vector<8x96xf32> to vector<8x32xf32>
    %543 = vector.extract_strided_slice %539 {offsets = [0, 32], sizes = [8, 32], strides = [1, 1]} : vector<8x96xf32> to vector<8x32xf32>
    %544 = tpu.concatenate %540, %541, %542, %543 in 1 : vector<8x32xf32>, vector<8x32xf32>, vector<8x32xf32>, vector<8x32xf32> -> vector<8x128xf32>
    %545 = vector.extract_strided_slice %538 {offsets = [0, 64], sizes = [8, 32], strides = [1, 1]} : vector<8x96xf32> to vector<8x32xf32>
    %546 = vector.extract_strided_slice %539 {offsets = [0, 64], sizes = [8, 32], strides = [1, 1]} : vector<8x96xf32> to vector<8x32xf32>
    %547 = tpu.concatenate %545, %546 in 1 : vector<8x32xf32>, vector<8x32xf32> -> vector<8x64xf32>
    %cst_204 = arith.constant dense<0.000000e+00> : vector<8x192xf32>
    %548 = tpu.matmul %533, %321, %cst_204 {dimension_numbers = #tpu.dot_dimension_numbers<[1], [0], [0], [1], [0, 0, 1, 1], [], []>} : vector<8x64xf32>, vector<64x192xf32>, vector<8x192xf32> -> vector<8x192xf32>
    %549 = vector.extract_strided_slice %548 {offsets = [0, 0], sizes = [8, 128], strides = [1, 1]} : vector<8x192xf32> to vector<8x128xf32>
    %550 = arith.addf %544, %549 : vector<8x128xf32>
    %551 = arith.negf %550 : vector<8x128xf32>
    %552 = math.exp %551 : vector<8x128xf32>
    %cst_205 = arith.constant 1.000000e+00 : f32
    %553 = vector.broadcast %cst_205 : f32 to vector<8x128xf32>
    %554 = arith.addf %553, %552 : vector<8x128xf32>
    %555 = arith.divf %553, %554 : vector<8x128xf32>
    %556 = vector.extract_strided_slice %555 {offsets = [0, 0], sizes = [8, 64], strides = [1, 1]} : vector<8x128xf32> to vector<8x64xf32>
    %557 = vector.extract_strided_slice %555 {offsets = [0, 64], sizes = [8, 64], strides = [1, 1]} : vector<8x128xf32> to vector<8x64xf32>
    %558 = vector.extract_strided_slice %548 {offsets = [0, 128], sizes = [8, 64], strides = [1, 1]} : vector<8x192xf32> to vector<8x64xf32>
    %559 = vector.broadcast %322 : vector<1x64xf32> to vector<8x64xf32>
    %560 = arith.addf %558, %559 : vector<8x64xf32>
    %561 = arith.mulf %556, %560 : vector<8x64xf32>
    %562 = arith.addf %547, %561 : vector<8x64xf32>
    %563 = math.tanh %562 : vector<8x64xf32>
    %cst_206 = arith.constant 1.000000e+00 : f32
    %564 = vector.broadcast %cst_206 : f32 to vector<8x64xf32>
    %565 = arith.subf %564, %557 : vector<8x64xf32>
    %566 = arith.mulf %565, %563 : vector<8x64xf32>
    %567 = arith.mulf %557, %533 : vector<8x64xf32>
    %568 = arith.addf %566, %567 : vector<8x64xf32>
    %569 = vector.extract_strided_slice %568 {offsets = [0, 0], sizes = [8, 32], strides = [1, 1]} : vector<8x64xf32> to vector<8x32xf32>
    %c48_207 = arith.constant 48 : index
    %c0_208 = arith.constant 0 : index
    %570 = vector.load %arg24[%c48_207, %c0_208] : memref<64x64xf32, #tpu.memory_space<vmem>>, vector<8x32xf32>
    tpu.vector_store %arg24[%c48_207, %c0_208], %569 {strides = array<i32>} : memref<64x64xf32, #tpu.memory_space<vmem>>, vector<8x32xf32>,
    %571 = vector.extract_strided_slice %568 {offsets = [0, 32], sizes = [8, 32], strides = [1, 1]} : vector<8x64xf32> to vector<8x32xf32>
    %c8_209 = arith.constant 8 : index
    %c32_210 = arith.constant 32 : index
    %572 = vector.load %arg24[%c8_209, %c32_210] : memref<64x64xf32, #tpu.memory_space<vmem>>, vector<8x32xf32>
    tpu.vector_store %arg24[%c8_209, %c32_210], %571 {strides = array<i32>} : memref<64x64xf32, #tpu.memory_space<vmem>>, vector<8x32xf32>,
    %c56_211 = arith.constant 56 : index
    %c0_212 = arith.constant 0 : index
    %573 = vector.load %arg22[%c56_211, %c0_212] : memref<64x96xf32, #tpu.memory_space<vmem>>, vector<8x96xf32>
    %c0_213 = arith.constant 0 : index
    %c0_214 = arith.constant 0 : index
    %574 = vector.load %arg23[%c0_213, %c0_214] : memref<64x96xf32, #tpu.memory_space<vmem>>, vector<8x96xf32>
    %575 = vector.extract_strided_slice %573 {offsets = [0, 0], sizes = [8, 32], strides = [1, 1]} : vector<8x96xf32> to vector<8x32xf32>
    %576 = vector.extract_strided_slice %574 {offsets = [0, 0], sizes = [8, 32], strides = [1, 1]} : vector<8x96xf32> to vector<8x32xf32>
    %577 = vector.extract_strided_slice %573 {offsets = [0, 32], sizes = [8, 32], strides = [1, 1]} : vector<8x96xf32> to vector<8x32xf32>
    %578 = vector.extract_strided_slice %574 {offsets = [0, 32], sizes = [8, 32], strides = [1, 1]} : vector<8x96xf32> to vector<8x32xf32>
    %579 = tpu.concatenate %575, %576, %577, %578 in 1 : vector<8x32xf32>, vector<8x32xf32>, vector<8x32xf32>, vector<8x32xf32> -> vector<8x128xf32>
    %580 = vector.extract_strided_slice %573 {offsets = [0, 64], sizes = [8, 32], strides = [1, 1]} : vector<8x96xf32> to vector<8x32xf32>
    %581 = vector.extract_strided_slice %574 {offsets = [0, 64], sizes = [8, 32], strides = [1, 1]} : vector<8x96xf32> to vector<8x32xf32>
    %582 = tpu.concatenate %580, %581 in 1 : vector<8x32xf32>, vector<8x32xf32> -> vector<8x64xf32>
    %cst_215 = arith.constant dense<0.000000e+00> : vector<8x192xf32>
    %583 = tpu.matmul %568, %321, %cst_215 {dimension_numbers = #tpu.dot_dimension_numbers<[1], [0], [0], [1], [0, 0, 1, 1], [], []>} : vector<8x64xf32>, vector<64x192xf32>, vector<8x192xf32> -> vector<8x192xf32>
    %584 = vector.extract_strided_slice %583 {offsets = [0, 0], sizes = [8, 128], strides = [1, 1]} : vector<8x192xf32> to vector<8x128xf32>
    %585 = arith.addf %579, %584 : vector<8x128xf32>
    %586 = arith.negf %585 : vector<8x128xf32>
    %587 = math.exp %586 : vector<8x128xf32>
    %cst_216 = arith.constant 1.000000e+00 : f32
    %588 = vector.broadcast %cst_216 : f32 to vector<8x128xf32>
    %589 = arith.addf %588, %587 : vector<8x128xf32>
    %590 = arith.divf %588, %589 : vector<8x128xf32>
    %591 = vector.extract_strided_slice %590 {offsets = [0, 0], sizes = [8, 64], strides = [1, 1]} : vector<8x128xf32> to vector<8x64xf32>
    %592 = vector.extract_strided_slice %590 {offsets = [0, 64], sizes = [8, 64], strides = [1, 1]} : vector<8x128xf32> to vector<8x64xf32>
    %593 = vector.extract_strided_slice %583 {offsets = [0, 128], sizes = [8, 64], strides = [1, 1]} : vector<8x192xf32> to vector<8x64xf32>
    %594 = vector.broadcast %322 : vector<1x64xf32> to vector<8x64xf32>
    %595 = arith.addf %593, %594 : vector<8x64xf32>
    %596 = arith.mulf %591, %595 : vector<8x64xf32>
    %597 = arith.addf %582, %596 : vector<8x64xf32>
    %598 = math.tanh %597 : vector<8x64xf32>
    %cst_217 = arith.constant 1.000000e+00 : f32
    %599 = vector.broadcast %cst_217 : f32 to vector<8x64xf32>
    %600 = arith.subf %599, %592 : vector<8x64xf32>
    %601 = arith.mulf %600, %598 : vector<8x64xf32>
    %602 = arith.mulf %592, %568 : vector<8x64xf32>
    %603 = arith.addf %601, %602 : vector<8x64xf32>
    %604 = vector.extract_strided_slice %603 {offsets = [0, 0], sizes = [8, 32], strides = [1, 1]} : vector<8x64xf32> to vector<8x32xf32>
    %c56_218 = arith.constant 56 : index
    %c0_219 = arith.constant 0 : index
    %605 = vector.load %arg24[%c56_218, %c0_219] : memref<64x64xf32, #tpu.memory_space<vmem>>, vector<8x32xf32>
    tpu.vector_store %arg24[%c56_218, %c0_219], %604 {strides = array<i32>} : memref<64x64xf32, #tpu.memory_space<vmem>>, vector<8x32xf32>,
    %606 = vector.extract_strided_slice %603 {offsets = [0, 32], sizes = [8, 32], strides = [1, 1]} : vector<8x64xf32> to vector<8x32xf32>
    %c0_220 = arith.constant 0 : index
    %c32_221 = arith.constant 32 : index
    %607 = vector.load %arg24[%c0_220, %c32_221] : memref<64x64xf32, #tpu.memory_space<vmem>>, vector<8x32xf32>
    tpu.vector_store %arg24[%c0_220, %c32_221], %606 {strides = array<i32>} : memref<64x64xf32, #tpu.memory_space<vmem>>, vector<8x32xf32>,
    %608 = vector.extract_strided_slice %603 {offsets = [0, 0], sizes = [8, 32], strides = [1, 1]} : vector<8x64xf32> to vector<8x32xf32>
    %c2_222 = arith.constant 2 : index
    %c0_223 = arith.constant 0 : index
    %c0_224 = arith.constant 0 : index
    %609 = vector.load %arg21[%c2_222, %c0_223, %c0_224] : memref<4x8x32xf32, #tpu.memory_space<vmem>>, vector<1x8x32xf32>
    %610 = vector.shape_cast %609 : vector<1x8x32xf32> to vector<8x32xf32>
    %611 = vector.shape_cast %608 : vector<8x32xf32> to vector<1x8x32xf32>
    tpu.vector_store %arg21[%c2_222, %c0_223, %c0_224], %611 {strides = array<i32>} : memref<4x8x32xf32, #tpu.memory_space<vmem>>, vector<1x8x32xf32>,
    %612 = vector.extract_strided_slice %603 {offsets = [0, 32], sizes = [8, 32], strides = [1, 1]} : vector<8x64xf32> to vector<8x32xf32>
    %c3_225 = arith.constant 3 : index
    %c0_226 = arith.constant 0 : index
    %c0_227 = arith.constant 0 : index
    %613 = vector.load %arg21[%c3_225, %c0_226, %c0_227] : memref<4x8x32xf32, #tpu.memory_space<vmem>>, vector<1x8x32xf32>
    %614 = vector.shape_cast %613 : vector<1x8x32xf32> to vector<8x32xf32>
    %615 = vector.shape_cast %612 : vector<8x32xf32> to vector<1x8x32xf32>
    tpu.vector_store %arg21[%c3_225, %c0_226, %c0_227], %615 {strides = array<i32>} : memref<4x8x32xf32, #tpu.memory_space<vmem>>, vector<1x8x32xf32>,
    %c0_228 = arith.constant 0 : index
    %c0_229 = arith.constant 0 : index
    %616 = vector.load %arg24[%c0_228, %c0_229] : memref<64x64xf32, #tpu.memory_space<vmem>>, vector<64x64xf32>
    %cst_230 = arith.constant 0.000000e+00 : f32
    %617 = vector.broadcast %cst_230 : f32 to vector<64x64xf32>
    %618 = arith.cmpf ogt, %616, %617 : vector<64x64xf32>
    %cst_231 = arith.constant 1.000000e-01 : f32
    %619 = vector.broadcast %cst_231 : f32 to vector<64x64xf32>
    %620 = arith.mulf %619, %616 : vector<64x64xf32>
    %621 = arith.select %618, %616, %620 : vector<64x64xi1>, vector<64x64xf32>
    %c0_232 = arith.constant 0 : index
    %c0_233 = arith.constant 0 : index
    %622 = vector.load %arg14[%c0_232, %c0_233] : memref<64x32xf32, #tpu.memory_space<vmem>>, vector<64x32xf32>
    %cst_234 = arith.constant dense<0.000000e+00> : vector<64x32xf32>
    %623 = tpu.matmul %621, %622, %cst_234 {dimension_numbers = #tpu.dot_dimension_numbers<[1], [0], [0], [1], [0, 0, 1, 1], [], []>} : vector<64x64xf32>, vector<64x32xf32>, vector<64x32xf32> -> vector<64x32xf32>
    %c0_235 = arith.constant 0 : index
    %c0_236 = arith.constant 0 : index
    %624 = vector.load %arg15[%c0_235, %c0_236] : memref<1x32xf32, #tpu.memory_space<vmem>>, vector<1x32xf32>
    %625 = vector.broadcast %624 : vector<1x32xf32> to vector<64x32xf32>
    %626 = arith.addf %623, %625 : vector<64x32xf32>
    %cst_237 = arith.constant 0.000000e+00 : f32
    %627 = vector.broadcast %cst_237 : f32 to vector<64x32xf32>
    %628 = arith.cmpf ogt, %626, %627 : vector<64x32xf32>
    %cst_238 = arith.constant 1.000000e-01 : f32
    %629 = vector.broadcast %cst_238 : f32 to vector<64x32xf32>
    %630 = arith.mulf %629, %626 : vector<64x32xf32>
    %631 = arith.select %628, %626, %630 : vector<64x32xi1>, vector<64x32xf32>
    %c0_239 = arith.constant 0 : index
    %c0_240 = arith.constant 0 : index
    %632 = vector.load %arg16[%c0_239, %c0_240] : memref<32x16xf32, #tpu.memory_space<vmem>>, vector<32x16xf32>
    %cst_241 = arith.constant dense<0.000000e+00> : vector<64x16xf32>
    %633 = tpu.matmul %631, %632, %cst_241 {dimension_numbers = #tpu.dot_dimension_numbers<[1], [0], [0], [1], [0, 0, 1, 1], [], []>} : vector<64x32xf32>, vector<32x16xf32>, vector<64x16xf32> -> vector<64x16xf32>
    %c0_242 = arith.constant 0 : index
    %c0_243 = arith.constant 0 : index
    %634 = vector.load %arg17[%c0_242, %c0_243] : memref<1x16xf32, #tpu.memory_space<vmem>>, vector<1x16xf32>
    %635 = vector.broadcast %634 : vector<1x16xf32> to vector<64x16xf32>
    %636 = arith.addf %633, %635 : vector<64x16xf32>
    %cst_244 = arith.constant 0.000000e+00 : f32
    %637 = vector.broadcast %cst_244 : f32 to vector<64x16xf32>
    %638 = arith.cmpf ogt, %636, %637 : vector<64x16xf32>
    %cst_245 = arith.constant 1.000000e-01 : f32
    %639 = vector.broadcast %cst_245 : f32 to vector<64x16xf32>
    %640 = arith.mulf %639, %636 : vector<64x16xf32>
    %641 = arith.select %638, %636, %640 : vector<64x16xi1>, vector<64x16xf32>
    %c0_246 = arith.constant 0 : index
    %c0_247 = arith.constant 0 : index
    %642 = vector.load %arg18[%c0_246, %c0_247] : memref<16x128xf32, #tpu.memory_space<vmem>>, vector<16x128xf32>
    %cst_248 = arith.constant dense<0.000000e+00> : vector<64x128xf32>
    %643 = tpu.matmul %641, %642, %cst_248 {dimension_numbers = #tpu.dot_dimension_numbers<[1], [0], [0], [1], [0, 0, 1, 1], [], []>} : vector<64x16xf32>, vector<16x128xf32>, vector<64x128xf32> -> vector<64x128xf32>
    %c0_249 = arith.constant 0 : index
    %c0_250 = arith.constant 0 : index
    %644 = vector.load %arg19[%c0_249, %c0_250] : memref<1x128xf32, #tpu.memory_space<vmem>>, vector<1x128xf32>
    %645 = vector.broadcast %644 : vector<1x128xf32> to vector<64x128xf32>
    %646 = arith.addf %643, %645 : vector<64x128xf32>
    %c0_251 = arith.constant 0 : index
    %c0_252 = arith.constant 0 : index
    %647 = vector.load %arg20[%c0_251, %c0_252] : memref<64x128xf32, #tpu.memory_space<vmem>>, vector<64x128xf32>
    tpu.vector_store %arg20[%c0_251, %c0_252], %646 {strides = array<i32>} : memref<64x128xf32, #tpu.memory_space<vmem>>, vector<64x128xf32>,
    return
  }
}

</mosaic_0001>

<bundles_post_ra>
// kernel: seq_classifier_forward.1
= control target key start
LH: loop header
LB: loop body
LE: loop exit
PB: predicated region body
PF: predicated region fallthrough
CT: control target
= control target key end

     0   :  { %vm161_vm0 = vcmask 1043456   ;;  %vm136_vm1 = vcmask 359424   ;;  %vm4476_vm2 = vmmov 1   ;;  %vm674_vm4 = vcmask 261120   ;;  %s5754_s2 = inlined_call_operand.vmem [shape: f32[300,96], index: 2, kind: input, shape index: {}]   ;;  %s5755_s0 = inlined_call_operand.vmem [shape: f32[64,300], index: 0, kind: input, shape index: {}]   ;;  %s5756_s4 = inlined_call_operand.vmem [shape: f32[300,96], index: 4, kind: input, shape index: {}]   ;;  %s5757_s1 = inlined_call_operand.vmem [shape: f32[4,8,32], index: 1, kind: input, shape index: {}]   ;;  %s5758_s6 = inlined_call_operand.vmem [shape: f32[64,192], index: 6, kind: input, shape index: {}]   ;;  %s5759_s3 = inlined_call_operand.vmem [shape: f32[1,96], index: 3, kind: input, shape index: {}]   ;;  %s5760_s5 = inlined_call_operand.vmem [shape: f32[1,96], index: 5, kind: input, shape index: {}]   ;;  %s5761_s7 = inlined_call_operand.vmem [shape: f32[1,64], index: 7, kind: input, shape index: {}]   ;;  %s5762_s8 = inlined_call_operand.vmem [shape: f32[64,96], index: 8, kind: input, shape index: {}]   ;;  %s5763_s10 = inlined_call_operand.vmem [shape: f32[64,96], index: 10, kind: input, shape index: {}]   ;;  %s5764_s12 = inlined_call_operand.vmem [shape: f32[64,192], index: 12, kind: input, shape index: {}]   ;;  %s5765_s21 = inlined_call_operand.vmem [shape: f32[4,8,32], index: 21, kind: output, shape index: {1}]   ;;  %s5766_s9 = inlined_call_operand.vmem [shape: f32[1,96], index: 9, kind: input, shape index: {}]   ;;  %s5767_s11 = inlined_call_operand.vmem [shape: f32[1,96], index: 11, kind: input, shape index: {}]   ;;  %s5768_s13 = inlined_call_operand.vmem [shape: f32[1,64], index: 13, kind: input, shape index: {}]   ;;  %s5769_s14 = inlined_call_operand.vmem [shape: f32[64,32], index: 14, kind: input, shape index: {}]   ;;  %s5770_s16 = inlined_call_operand.vmem [shape: f32[32,16], index: 16, kind: input, shape index: {}]   ;;  %s5771_s18 = inlined_call_operand.vmem [shape: f32[16,128], index: 18, kind: input, shape index: {}]   ;;  %s5772_s15 = inlined_call_operand.vmem [shape: f32[1,32], index: 15, kind: input, shape index: {}]   ;;  %s5773_s17 = inlined_call_operand.vmem [shape: f32[1,16], index: 17, kind: input, shape index: {}]   ;;  %s5774_s19 = inlined_call_operand.vmem [shape: f32[1,128], index: 19, kind: input, shape index: {}]   ;;  %s5775_s20 = inlined_call_operand.vmem [shape: f32[64,128], index: 20, kind: output, shape index: {0}]  }
   0x1   :  { %5781 = sst [smem:[#allocation5_spill]] %s5754_s2  ;;  %vm4654_vm3 = vmpackc.low %vm161_vm0, %vm4476_vm2  ;;  %s4477_s2 = smov 32   ;;  %vm690_vm5 = vcmask 523264   ;;  %vm375_vm6 = vcmask 785408   ;;  %vm807_vm7 = vcmask 523520  }
   0x2   :  { %5782 = sst [smem:[#allocation6_spill]] %s5755_s0  ;;  %s5787_s26 = sld [smem:[#allocation5_spill]] }
   0x3   :  { %5783 = sst [smem:[#allocation7_spill]] %s5756_s4  ;;  %s5788_s22 = sld [smem:[#allocation6_spill]] }
   0x4   :  { %5784 = sst [smem:[#allocation8_spill]] %s5757_s1  ;;  %s5791_s1 = sld [smem:[#allocation7_spill]] }
   0x5   :  { %5785 = sst [smem:[#allocation9_spill]] %s5758_s6  ;;  %s5792_s0 = sld [smem:[#allocation8_spill]] }
   0x6   :  { %5786 = sst [smem:[#allocation10_spill]] %s5759_s3  ;;  %s5793_s23 = sld [smem:[#allocation9_spill]] }
   0x7   :  { %s5794_s3 = sld [smem:[#allocation10_spill]]  ;;  %s4480_s4 = smov 96  }
   0x8   :  { %v107_v0 = vld [vmem:[%s5787_s26 + $0x80] sm:$0xff]  ;;  %v108_v1 = vld [vmem:[%s5787_s26 + $0x88] sm:$0xff]  ;;  %v109_v9 = vld [vmem:[%s5787_s26 + $0x90] sm:$0xff] }
   0x9   :  { %v123_v2 = vld [vmem:[%s5787_s26 + $0x100] sm:$0xff]  ;;  %v3963_v3 = vpack.c.bf16 %v108_v1, %v107_v0  ;;  %v124_v4 = vld [vmem:[%s5787_s26 + $0x108] sm:$0xff]  ;;  %v110_v10 = vld [vmem:[%s5787_s26 + $0x98] sm:$0xff] }
   0xa   :  { %v91_v5 = vld [vmem:[%s5787_s26] sm:$0xff]  ;;  %v92_v6 = vld [vmem:[%s5787_s26 + $0x8] sm:$0xff]  ;;  %v3995_v7 = vpack.c.bf16 %v124_v4, %v123_v2  ;;  %v125_v11 = vld [vmem:[%s5787_s26 + $0x110] sm:$0xff]  ;;  %v3967_v12 = vpack.c.bf16 %v110_v10, %v109_v9 }
   0xb   :  { %v3965_v8 = vpack.c.bf16 %v92_v6, %v91_v5  ;;  %3964 = vmatprep.subr.bf16.mxu0 %v3963_v3  ;;  %v126_v13 = vld [vmem:[%s5787_s26 + $0x118] sm:$0xff]  ;;  %v93_v14 = vld [vmem:[%s5787_s26 + $0x10] sm:$0xff]  ;;  %v111_v18 = vld [vmem:[%s5787_s26 + $0xa0] sm:$0xff] }
   0xc   :  { %v94_v15 = vld [vmem:[%s5787_s26 + $0x18] sm:$0xff]  ;;  %3996 = vmatprep.subr.bf16.mxu1 %v3995_v7  ;;  %v3999_v16 = vpack.c.bf16 %v126_v13, %v125_v11  ;;  %v112_v19 = vld [vmem:[%s5787_s26 + $0xa8] sm:$0xff]  ;;  %v127_v20 = vld [vmem:[%s5787_s26 + $0x120] sm:$0xff] }
   0xd   :  { %3966 = vmatpush3.bf16.msra.mxu0 %v3965_v8  ;;  %v3969_v17 = vpack.c.bf16 %v94_v15, %v93_v14  ;;  %3998 = vmatpush3.bf16.msra.mxu1 %v3995_v7  ;;  %v3971_v21 = vpack.c.bf16 %v112_v19, %v111_v18  ;;  %v128_v22 = vld [vmem:[%s5787_s26 + $0x128] sm:$0xf]  ;;  %v95_v23 = vld [vmem:[%s5787_s26 + $0x20] sm:$0xff]  ;;  %v4648_v26 = vld [vmem:[%s5788_s22 + $0x10] sm:$0xff] }
   0xe   :  { %3968 = vmatprep.subr.bf16.mxu0 %v3967_v12  ;;  %4000 = vmatprep.subr.bf16.mxu1 %v3999_v16  ;;  %v4003_v24 = vpack.c.bf16 %v128_v22, %v127_v20  ;;  %v96_v25 = vld [vmem:[%s5787_s26 + $0x28] sm:$0xff]  ;;  %v113_v27 = vld [vmem:[%s5787_s26 + $0xb0] sm:$0xff]  ;;  %v114_v29 = vld [vmem:[%s5787_s26 + $0xb8] sm:$0xff] }
   0xf   :  { %3807 = vmatprep.mubr.msk.f32.mxu1 %vm136_vm1, %v4648_v26  ;;  %v400_v30 = vld [vmem:[%s5791_s1 + $0x80] sm:$0xff]  ;;  %v3973_v31 = vpack.c.bf16 %v96_v25, %v95_v23  ;;  %v401_v32 = vld [vmem:[%s5791_s1 + $0x88] sm:$0xff]  ;;  %v3975_v33 = vpack.c.bf16 %v114_v29, %v113_v27  ;;  %v97_v34 = vld [vmem:[%s5787_s26 + $0x30] sm:$0xff] }
  0x10   :  { %v98_v35 = vld [vmem:[%s5787_s26 + $0x38] sm:$0xff]  ;;  %v384_v36 = vld [vmem:[%s5791_s1] sm:$0xff]  ;;  %v4009_v37 = vpack.c.bf16 %v401_v32, %v400_v30  ;;  %v385_v38 = vld [vmem:[%s5791_s1 + $0x8] sm:$0xff] }
  0x11   :  { %3970 = vmatpush3.bf16.msra.mxu0 %v3969_v17  ;;  %4002 = vmatpush3.bf16.msra.mxu1 %v3999_v16  ;;  %v115_v39 = vld [vmem:[%s5787_s26 + $0xc0] sm:$0xff]  ;;  %v116_v40 = vld [vmem:[%s5787_s26 + $0xc8] sm:$0xff]  ;;  %v402_v41 = vld [vmem:[%s5791_s1 + $0x90] sm:$0xff]  ;;  %v3977_v44 = vpack.c.bf16 %v98_v35, %v97_v34  ;;  %v4011_v45 = vpack.c.bf16 %v385_v38, %v384_v36 }
  0x12   :  { %3972 = vmatprep.subr.bf16.mxu0 %v3971_v21  ;;  %4005 = vmatprep.subr.msk.bf16.mxu1 %vm4654_vm3, %v4003_v24  ;;  %v403_v42 = vld [vmem:[%s5791_s1 + $0x98] sm:$0xff]  ;;  %v4698_v43 = vld [vmem:[%s5788_s22 + $0x28] sm:$0xff]  ;;  %v3979_v46 = vpack.c.bf16 %v116_v40, %v115_v39  ;;  %v99_v47 = vld [vmem:[%s5787_s26 + $0x40] sm:$0xff] }
  0x13   :  { %v100_v48 = vld [vmem:[%s5787_s26 + $0x48] sm:$0xff]  ;;  %v386_v49 = vld [vmem:[%s5791_s1 + $0x10] sm:$0xff]  ;;  %v4013_v50 = vpack.c.bf16 %v403_v42, %v402_v41  ;;  %v387_v51 = vld [vmem:[%s5791_s1 + $0x18] sm:$0xff] }
  0x14   :  { %v117_v52 = vld [vmem:[%s5787_s26 + $0xd0] sm:$0xff]  ;;  %v118_v53 = vld [vmem:[%s5787_s26 + $0xd8] sm:$0xff]  ;;  %v404_v54 = vld [vmem:[%s5791_s1 + $0xa0] sm:$0xff]  ;;  %v3981_v56 = vpack.c.bf16 %v100_v48, %v99_v47  ;;  %v4015_v57 = vpack.c.bf16 %v387_v51, %v386_v49 }
  0x15   :  { %3974 = vmatpush3.bf16.msra.mxu0 %v3973_v31  ;;  %4008 = vmatpush3.bf16.msk.msra.mxu1 %vm4654_vm3, %v4003_v24  ;;  %v405_v55 = vld [vmem:[%s5791_s1 + $0xa8] sm:$0xff]  ;;  %v3983_v58 = vpack.c.bf16 %v118_v53, %v117_v52  ;;  %v101_v59 = vld [vmem:[%s5787_s26 + $0x50] sm:$0xff]  ;;  %v102_v60 = vld [vmem:[%s5787_s26 + $0x58] sm:$0xff] }
  0x16   :  { %3976 = vmatprep.subr.bf16.mxu0 %v3975_v33  ;;  %4010 = vmatprep.subr.bf16.mxu1 %v4009_v37  ;;  %v388_v61 = vld [vmem:[%s5791_s1 + $0x20] sm:$0xff]  ;;  %v4017_v62 = vpack.c.bf16 %v405_v55, %v404_v54  ;;  %v389_v63 = vld [vmem:[%s5791_s1 + $0x28] sm:$0xff]  ;;  %v406_v2 = vld [vmem:[%s5791_s1 + $0xb0] sm:$0xff]  ;;  %v3985_v4 = vpack.c.bf16 %v102_v60, %v101_v59 }
  0x17   :  { %v119_v0 = vld [vmem:[%s5787_s26 + $0xe0] sm:$0xff]  ;;  %v120_v1 = vld [vmem:[%s5787_s26 + $0xe8] sm:$0xff]  ;;  %v407_v3 = vld [vmem:[%s5791_s1 + $0xb8] sm:$0xff]  ;;  %v4019_v8 = vpack.c.bf16 %v389_v63, %v388_v61 }
  0x18   :  { %3808 = vmatmul.mubr.msk.f32.vlgmr.msra.gmra.mrb[0].mxu1 %vm136_vm1, %v4698_v43  ;;  %v103_v5 = vld [vmem:[%s5787_s26 + $0x60] sm:$0xff]  ;;  %v68_v7 = vld [vmem:[%s5788_s22 + $0x8] sm:$0xff]  ;;  %v3987_v9 = vpack.c.bf16 %v120_v1, %v119_v0  ;;  %v390_v11 = vld [vmem:[%s5791_s1 + $0x30] sm:$0xff]  ;;  %v4021_v13 = vpack.c.bf16 %v407_v3, %v406_v2 }
  0x19   :  { %3978 = vmatpush3.bf16.msra.mxu0 %v3977_v44  ;;  %4012 = vmatpush3.bf16.msra.mxu1 %v4011_v45  ;;  %v4758_v6 = vld [vmem:[%s5788_s22 + $0x40] sm:$0xff]  ;;  %v104_v10 = vld [vmem:[%s5787_s26 + $0x68] sm:$0xff]  ;;  %v4772_v12 = vld [vmem:[%s5788_s22 + $0x58] sm:$0xff] }
  0x1a   :  { %3980 = vmatprep.subr.bf16.mxu0 %v3979_v46  ;;  %4014 = vmatprep.subr.bf16.mxu1 %v4013_v50  ;;  %v391_v14 = vld [vmem:[%s5791_s1 + $0x38] sm:$0xff]  ;;  %v121_v15 = vld [vmem:[%s5787_s26 + $0xf0] sm:$0xff]  ;;  %v408_v17 = vld [vmem:[%s5791_s1 + $0xc0] sm:$0xff]  ;;  %v3989_v20 = vpack.c.bf16 %v104_v10, %v103_v5 }
  0x1b   :  { %v122_v16 = vld [vmem:[%s5787_s26 + $0xf8] sm:$0xff]  ;;  %3810 = vmatprep.mubr.msk.f32.mxu1 %vm136_vm1, %v4758_v6  ;;  %v409_v18 = vld [vmem:[%s5791_s1 + $0xc8] sm:$0xff]  ;;  %229 = vmatprep.mubr.f32.mxu0 %v68_v7  ;;  %v4796_v19 = vld [vmem:[%s5788_s22 + $0x70] sm:$0xff]  ;;  %v4023_v23 = vpack.c.bf16 %v391_v14, %v390_v11 }
  0x1c   :  { %3811 = vmatmul.mubr.msk.f32.gmra.mrb[2].mxu1 %vm136_vm1, %v4772_v12  ;;  %v105_v21 = vld [vmem:[%s5787_s26 + $0x70] sm:$0xff]  ;;  %v4806_v22 = vld [vmem:[%s5788_s22 + $0x88] sm:$0xff]  ;;  %v3991_v24 = vpack.c.bf16 %v122_v16, %v121_v15  ;;  %v106_v25 = vld [vmem:[%s5787_s26 + $0x78] sm:$0xff]  ;;  %v4025_v30 = vpack.c.bf16 %v409_v18, %v408_v17 }
  0x1d   :  { %3982 = vmatpush3.bf16.msra.mxu0 %v3981_v56  ;;  %4016 = vmatpush3.bf16.msra.mxu1 %v4015_v57  ;;  %v392_v27 = vld [vmem:[%s5791_s1 + $0x40] sm:$0xff]  ;;  %v393_v29 = vld [vmem:[%s5791_s1 + $0x48] sm:$0xff]  ;;  %v410_v34 = vld [vmem:[%s5791_s1 + $0xd0] sm:$0xff]  ;;  %v3993_v36 = vpack.c.bf16 %v106_v25, %v105_v21 }
  0x1e   :  { %3984 = vmatprep.subr.bf16.mxu0 %v3983_v58  ;;  %4018 = vmatprep.subr.bf16.mxu1 %v4017_v62  ;;  %v416_v31 = vld [vmem:[%s5791_s1 + $0x100] sm:$0xff]  ;;  %v417_v32 = vld [vmem:[%s5791_s1 + $0x108] sm:$0xff]  ;;  %v411_v35 = vld [vmem:[%s5791_s1 + $0xd8] sm:$0xff]  ;;  %v4027_v38 = vpack.c.bf16 %v393_v29, %v392_v27 }
  0x1f   :  { %3813 = vmatprep.mubr.msk.f32.mxu1 %vm136_vm1, %v4796_v19  ;;  %v4826_v33 = vld [vmem:[%s5788_s22 + $0xa0] sm:$0xff]  ;;  %v4841_v37 = vld [vmem:[%s5788_s22 + $0xb8] sm:$0xff]  ;;  %v4041_v39 = vpack.c.bf16 %v417_v32, %v416_v31  ;;  %v394_v40 = vld [vmem:[%s5791_s1 + $0x50] sm:$0xff]  ;;  %v4029_v41 = vpack.c.bf16 %v411_v35, %v410_v34 }
  0x20   :  { %3814 = vmatmul.mubr.msk.f32.gmra.mrb[4].mxu1 %vm136_vm1, %v4806_v22  ;;  %v395_v42 = vld [vmem:[%s5791_s1 + $0x58] sm:$0xff]  ;;  %v418_v44 = vld [vmem:[%s5791_s1 + $0x110] sm:$0xff]  ;;  %v412_v46 = vld [vmem:[%s5791_s1 + $0xe0] sm:$0xff] }
  0x21   :  { %3986 = vmatpush3.bf16.msra.mxu0 %v3985_v4  ;;  %4020 = vmatpush3.bf16.msra.mxu1 %v4019_v8  ;;  %v419_v45 = vld [vmem:[%s5791_s1 + $0x118] sm:$0xff]  ;;  %v413_v47 = vld [vmem:[%s5791_s1 + $0xe8] sm:$0xff]  ;;  %v67_v48 = vld [vmem:[%s5788_s22] sm:$0xff]  ;;  %v4031_v49 = vpack.c.bf16 %v395_v42, %v394_v40 }
  0x22   :  { %3988 = vmatprep.subr.bf16.mxu0 %v3987_v9  ;;  %4022 = vmatprep.subr.bf16.mxu1 %v4021_v13  ;;  %v71_v50 = vld [vmem:[%s5788_s22 + $0x20] sm:$0xff]  ;;  %v4045_v52 = vpack.c.bf16 %v419_v45, %v418_v44  ;;  %v3500_v53 = vld [vmem:[%s5792_s0 + $0x8] sm:$0xff]  ;;  %v4033_v54 = vpack.c.bf16 %v413_v47, %v412_v46  ;;  %v414_v58 = vld [vmem:[%s5791_s1 + $0xf0] sm:$0xff] }
  0x23   :  { %3816 = vmatprep.mubr.msk.f32.mxu1 %vm136_vm1, %v4826_v33  ;;  %v396_v51 = vld [vmem:[%s5791_s1 + $0x60] sm:$0xff]  ;;  %v397_v55 = vld [vmem:[%s5791_s1 + $0x68] sm:$0xff]  ;;  %671 = vrot.lane.b32.xlu0 %v3500_v53, %s4477_s2  ;;  %v415_v59 = vld [vmem:[%s5791_s1 + $0xf8] sm:$0xff] }
  0x24   :  { %3817 = vmatmul.mubr.msk.f32.gmra.mrb[6].mxu1 %vm136_vm1, %v4841_v37  ;;  %v420_v56 = vld [vmem:[%s5791_s1 + $0x120] sm:$0xff]  ;;  %v421_v57 = vld [vmem:[%s5791_s1 + $0x128] sm:$0xf]  ;;  %v70_v60 = vld [vmem:[%s5788_s22 + $0x18] sm:$0xff]  ;;  %v4035_v61 = vpack.c.bf16 %v397_v55, %v396_v51  ;;  %v4037_v0 = vpack.c.bf16 %v415_v59, %v414_v58 }
  0x25   :  { %3990 = vmatpush3.bf16.msra.mxu0 %v3989_v20  ;;  %4024 = vmatpush3.bf16.msra.mxu1 %v4023_v23  ;;  %v74_v62 = vld [vmem:[%s5788_s22 + $0x38] sm:$0xff]  ;;  %v4049_v63 = vpack.c.bf16 %v421_v57, %v420_v56  ;;  %v398_v1 = vld [vmem:[%s5791_s1 + $0x70] sm:$0xff]  ;;  %v651_v3 = vld [vmem:[%s5793_s23 + $0x8] sm:$0xff] }
  0x26   :  { %3992 = vmatprep.subr.bf16.mxu0 %v3991_v24  ;;  %4026 = vmatprep.subr.bf16.mxu1 %v4025_v30  ;;  %v399_v2 = vld [vmem:[%s5791_s1 + $0x78] sm:$0xff]  ;;  %v73_v5 = vld [vmem:[%s5788_s22 + $0x30] sm:$0xff]  ;;  %v650_v10 = vld [vmem:[%s5793_s23] sm:$0xff] }
  0x27   :  { %496 = vmatprep.mubr.f32.mxu1 %v68_v7  ;;  %v653_v4 = vld [vmem:[%s5793_s23 + $0x18] sm:$0xff]  ;;  %v4039_v7 = vpack.c.bf16 %v399_v2, %v398_v1  ;;  %v77_v8 = vld [vmem:[%s5788_s22 + $0x50] sm:$0xff]  ;;  %v655_v13 = vld [vmem:[%s5793_s23 + $0x28] sm:$0xff] }
  0x28   :  { %v4917_v9 = vpack.c.bf16 %v653_v4, %v651_v3  ;;  %v652_v11 = vld [vmem:[%s5793_s23 + $0x10] sm:$0xff]  ;;  %v657_v14 = vld [vmem:[%s5793_s23 + $0x38] sm:$0xff]  ;;  %v76_v15 = vld [vmem:[%s5788_s22 + $0x48] sm:$0xff] }
  0x29   :  { %3994 = vmatpush3.bf16.msra.mxu0 %v3993_v36  ;;  %4028 = vmatpush3.bf16.msra.mxu1 %v4027_v38  ;;  %v80_v16 = vld [vmem:[%s5788_s22 + $0x68] sm:$0xff]  ;;  %v4939_v17 = vpack.c.bf16 %v652_v11, %v650_v10  ;;  %v4943_v18 = vpack.c.bf16 %v657_v14, %v655_v13  ;;  %v654_v20 = vld [vmem:[%s5793_s23 + $0x20] sm:$0xff]  ;;  %v656_v28 = vld [vmem:[%s5793_s23 + $0x30] sm:$0xff] }
  0x2a   :  { %4042 = vmatprep.subr.bf16.mxu0 %v4041_v39  ;;  %4030 = vmatprep.subr.bf16.mxu1 %v4029_v41  ;;  %v659_v21 = vld [vmem:[%s5793_s23 + $0x48] sm:$0xff]  ;;  %v661_v23 = vld [vmem:[%s5793_s23 + $0x58] sm:$0xff]  ;;  %v79_v24 = vld [vmem:[%s5788_s22 + $0x60] sm:$0xff]  ;;  %v4964_v27 = vpack.c.bf16 %v656_v28, %v654_v20 }
  0x2b   :  { %v83_v25 = vld [vmem:[%s5788_s22 + $0x80] sm:$0xff]  ;;  %v4967_v29 = vpack.c.bf16 %v661_v23, %v659_v21  ;;  %v660_v31 = vld [vmem:[%s5793_s23 + $0x50] sm:$0xff]  ;;  %v663_v32 = vld [vmem:[%s5793_s23 + $0x68] sm:$0xff] }
  0x2c   :  { %230 = vmatmul.mubr.f32.vlgmr.msra.gmra.mrb[0].mxu0 %v67_v48  ;;  %v658_v30 = vld [vmem:[%s5793_s23 + $0x40] sm:$0xff]  ;;  %v665_v34 = vld [vmem:[%s5793_s23 + $0x78] sm:$0xff]  ;;  %v664_v41 = vld [vmem:[%s5793_s23 + $0x70] sm:$0xff] }
  0x2d   :  { %4044 = vmatpush3.bf16.msra.mxu0 %v4041_v39  ;;  %234 = vmatprep.mubr.f32.mxu0 %v71_v50  ;;  %v82_v35 = vld [vmem:[%s5788_s22 + $0x78] sm:$0xff]  ;;  %v4988_v38 = vpack.c.bf16 %v660_v31, %v658_v30  ;;  %v4991_v39 = vpack.c.bf16 %v665_v34, %v663_v32  ;;  %v662_v40 = vld [vmem:[%s5793_s23 + $0x60] sm:$0xff]  ;;  %v85_v42 = vld [vmem:[%s5788_s22 + $0x90] sm:$0xff] }
  0x2e   :  { %4032 = vmatpush3.bf16.msra.mxu1 %v4031_v49  ;;  %4046 = vmatprep.subr.bf16.mxu0 %v4045_v52  ;;  %v86_v36 = vld [vmem:[%s5788_s22 + $0x98] sm:$0xff]  ;;  %v89_v44 = vld [vmem:[%s5788_s22 + $0xb0] sm:$0xff]  ;;  %v5006_v45 = vpack.c.bf16 %v664_v41, %v662_v40  ;;  %v88_v46 = vld [vmem:[%s5788_s22 + $0xa8] sm:$0xff] }
  0x2f   :  { %4034 = vmatprep.subr.bf16.mxu1 %v4033_v54 }
  0x30   :  { %235 = vmatmul.mubr.f32.gmra.mrb[2].mxu0 %v70_v60 }
  0x31   :  { %239 = vmatprep.mubr.f32.mxu0 %v74_v62  ;;  %4048 = vmatpush3.bf16.msra.mxu0 %v4045_v52  ;;  %v5064_v52 = vld [vmem:[%s5794_s3] ss:$0 sm:$0xff] }
  0x32   :  { %4036 = vmatpush3.bf16.msra.mxu1 %v4035_v61  ;;  %4051 = vmatprep.subr.msk.bf16.mxu0 %vm4654_vm3, %v4049_v63 }
  0x33   :  { %4038 = vmatprep.subr.bf16.mxu1 %v4037_v0 }
  0x34   :  { %240 = vmatmul.mubr.f32.gmra.mrb[4].mxu0 %v73_v5 }
  0x35   :  { %244 = vmatprep.mubr.f32.mxu0 %v77_v8  ;;  %4054 = vmatpush3.bf16.msk.msra.mxu0 %vm4654_vm3, %v4049_v63 }
  0x36   :  { %4040 = vmatpush3.bf16.msra.mxu1 %v4039_v7  ;;  %4072 = vmatprep.subr.bf16.mxu0 %v4917_v9 }
  0x37   :  { %4056 = vmatprep.subr.bf16.mxu1 %v4917_v9 }
  0x38   :  { %245 = vmatmul.mubr.f32.gmra.mrb[6].mxu0 %v76_v15 }
  0x39   :  { %497 = vmatmul.mubr.f32.vlgmr.msra.gmra.mrb[8].mxu1 %v67_v48  ;;  %249 = vmatprep.mubr.f32.mxu0 %v80_v16 }
  0x3a   :  { %501 = vmatprep.mubr.f32.mxu1 %v71_v50  ;;  %4058 = vmatpush1.bf16.msra.mxu1 %v4939_v17 }
  0x3b   :  { %4060 = vmatprep.subr.bf16.mxu1 %v4943_v18 }
  0x3c   :  { %250 = vmatmul.mubr.f32.gmra.mrb[8].mxu0 %v79_v24 }
  0x3d   :  { %502 = vmatmul.mubr.f32.gmra.mrb[10].mxu1 %v70_v60  ;;  %254 = vmatprep.mubr.f32.mxu0 %v83_v25 }
  0x3e   :  { %506 = vmatprep.mubr.f32.mxu1 %v74_v62  ;;  %4062 = vmatpush1.bf16.msra.mxu1 %v4964_v27 }
  0x3f   :  { %4064 = vmatprep.subr.bf16.mxu1 %v4967_v29 }
  0x40   :  { %255 = vmatmul.mubr.f32.gmra.mrb[10].mxu0 %v82_v35 }
  0x41   :  { %507 = vmatmul.mubr.f32.gmra.mrb[12].mxu1 %v73_v5  ;;  %259 = vmatprep.mubr.f32.mxu0 %v86_v36 }
  0x42   :  { %511 = vmatprep.mubr.f32.mxu1 %v77_v8  ;;  %4066 = vmatpush1.bf16.msra.mxu1 %v4988_v38 }
  0x43   :  { %4068 = vmatprep.subr.bf16.mxu1 %v4991_v39 }
  0x44   :  { %260 = vmatmul.mubr.f32.gmra.mrb[12].mxu0 %v85_v42 }
  0x45   :  { %512 = vmatmul.mubr.f32.gmra.mrb[14].mxu1 %v76_v15  ;;  %264 = vmatprep.mubr.f32.mxu0 %v89_v44 }
  0x46   :  { %516 = vmatprep.mubr.f32.mxu1 %v80_v16  ;;  %4070 = vmatpush1.bf16.msra.mxu1 %v5006_v45 }
  0x47   :  { %4088 = vmatprep.subr.bf16.mxu1 %v4917_v9 }
  0x48   :  { %265 = vmatmul.mubr.f32.gmra.mrb[14].mxu0 %v88_v46 }
  0x49   :  { %517 = vmatmul.mubr.f32.gmra.mrb[16].mxu1 %v79_v24  ;;  %3831 = vmatprep.mubr.msk.f32.mxu0 %vm136_vm1, %v4648_v26  ;;  %v4478_v26 = vmov 0.0  }
  0x4a   :  { %521 = vmatprep.mubr.f32.mxu1 %v83_v25 }
  0x4c   :  { %3832 = vmatmul.mubr.msk.f32.vlgmr.msra.gmra.mrb[16].mxu0 %vm136_vm1, %v4698_v43  ;;  %v667_v43 = vld [vmem:[%s5792_s0] sm:$0xff] }
  0x4d   :  { %522 = vmatmul.mubr.f32.gmra.mrb[18].mxu1 %v82_v35  ;;  %3834 = vmatprep.mubr.msk.f32.mxu0 %vm136_vm1, %v4758_v6 }
  0x4e   :  { %526 = vmatprep.mubr.f32.mxu1 %v86_v36  ;;  %4074 = vmatpush1.bf16.msra.mxu0 %v4939_v17 }
  0x4f   :  { %4076 = vmatprep.subr.bf16.mxu0 %v4943_v18 }
  0x50   :  { %3835 = vmatmul.mubr.msk.f32.gmra.mrb[18].mxu0 %vm136_vm1, %v4772_v12 }
  0x51   :  { %527 = vmatmul.mubr.f32.gmra.mrb[20].mxu1 %v85_v42  ;;  %3837 = vmatprep.mubr.msk.f32.mxu0 %vm136_vm1, %v4796_v19 }
  0x52   :  { %531 = vmatprep.mubr.f32.mxu1 %v89_v44  ;;  %4078 = vmatpush1.bf16.msra.mxu0 %v4964_v27 }
  0x53   :  { %4080 = vmatprep.subr.bf16.mxu0 %v4967_v29 }
  0x54   :  { %3838 = vmatmul.mubr.msk.f32.gmra.mrb[20].mxu0 %vm136_vm1, %v4806_v22 }
  0x55   :  { %532 = vmatmul.mubr.f32.gmra.mrb[22].mxu1 %v88_v46  ;;  %3840 = vmatprep.mubr.msk.f32.mxu0 %vm136_vm1, %v4826_v33 }
  0x56   :  { %767 = vmatprep.mubr.f32.mxu1 %v4478_v26  ;;  %4082 = vmatpush1.bf16.msra.mxu0 %v4988_v38 }
  0x57   :  { %4084 = vmatprep.subr.bf16.mxu0 %v4991_v39 }
  0x58   :  { %3841 = vmatmul.mubr.msk.f32.gmra.mrb[22].mxu0 %vm136_vm1, %v4841_v37 }
  0x59   :  { %898 = vmatprep.mubr.f32.mxu0 %v4478_v26 }
  0x5a   :  { %4086 = vmatpush1.bf16.msra.mxu0 %v5006_v45 }
  0x5b   :  { %4104 = vmatprep.subr.bf16.mxu0 %v4917_v9 }
  0x95   :  { %v672_v6 = vpop.permute.xlu0 %671 }
  0x96   :  { %v5044_v12 = vsel %vm674_vm4, %v667_v43, %v672_v6 }
  0x97   :  { %3501 = vmatmul.mubr.msk.f32.vlgmr.msra.gmra.mrb[24].mxu1 %vm690_vm5, %v5044_v12 }
  0x98   :  { %4090 = vmatpush1.bf16.msra.mxu1 %v4939_v17  ;;  %1019 = vmatprep.mubr.f32.mxu1 %v4478_v26 }
  0x99   :  { %4092 = vmatprep.subr.bf16.mxu1 %v4943_v18 }
  0x9c   :  { %4094 = vmatpush1.bf16.msra.mxu1 %v4964_v27 }
  0x9d   :  { %4096 = vmatprep.subr.bf16.mxu1 %v4967_v29 }
  0xa0   :  { %4098 = vmatpush1.bf16.msra.mxu1 %v4988_v38 }
  0xa1   :  { %4100 = vmatprep.subr.bf16.mxu1 %v4991_v39 }
  0xa4   :  { %4102 = vmatpush1.bf16.msra.mxu1 %v5006_v45 }
  0xa5   :  { %4120 = vmatprep.subr.bf16.mxu1 %v4917_v9 }
  0xeb   :  { %v3809_v19 = vpop.f32.mrb[0].mxu1 }
  0xec   :  { %v336_v22 = vpop.f32.mrb[1].mxu1 }
  0xef   :  { %v3812_v33 = vpop.f32.mrb[2].mxu1 }
  0xf0   :  { %v346_v37 = vpop.f32.mrb[3].mxu1 }
  0xf3   :  { %v3815_v47 = vpop.f32.mrb[4].mxu1 }
  0xf4   :  { %v356_v48 = vpop.f32.mrb[5].mxu1 }
  0xf7   :  { %v5057_v49 = vpop.f32.mrb[6].mxu1 }
  0xf8   :  { %v5059_v50 = vpop.f32.mrb[7].mxu1 }
  0xff   :  { %v3617_v51 = vpop.f32.mrb[0].mxu0 }
 0x100   :  { %v3618_v53 = vpop.f32.mrb[1].mxu0 }
 0x101   :  { %v3619_v54 = vadd.f32 %v3618_v53, %v3617_v51  ;;  %v3490_v51 = vld [vmem:[%s5760_s5] ss:$0 sm:$0xff]  ;;  %s4479_s5 = smov 64  }
 0x103   :  { %v232_v55 = vadd.f32 %v3619_v54, %v5064_v52  ;;  %v3620_v56 = vpop.f32.mrb[2].mxu0 }
 0x104   :  { %v3621_v57 = vpop.f32.mrb[3].mxu0 }
 0x105   :  { %v337_v58 = vadd.f32 %v336_v22, %v232_v55  ;;  %v3622_v59 = vadd.f32 %v3621_v57, %v3620_v56 }
 0x107   :  { %376 = vst.msk [vmem:[#allocation2] sm:$0xff] %vm375_vm6, %v337_v58  ;;  %v237_v60 = vadd.f32 %v3622_v59, %v5064_v52  ;;  %v3623_v61 = vpop.f32.mrb[4].mxu0 }
 0x108   :  { %v3624_v62 = vpop.f32.mrb[5].mxu0 }
 0x109   :  { %v342_v63 = vadd.f32 %v3809_v19, %v237_v60  ;;  %v3625_v0 = vadd.f32 %v3624_v62, %v3623_v61 }
 0x10b   :  { %377 = vst.msk [vmem:[#allocation2 + $0x8] sm:$0xff] %vm375_vm6, %v342_v63  ;;  %v242_v1 = vadd.f32 %v3625_v0, %v5064_v52  ;;  %v3626_v2 = vpop.f32.mrb[6].mxu0 }
 0x10c   :  { %v3687_v3 = vpop.f32.mrb[8].mxu1  ;;  %v3627_v4 = vpop.f32.mrb[7].mxu0 }
 0x10d   :  { %v347_v5 = vadd.f32 %v346_v37, %v242_v1  ;;  %v3628_v7 = vadd.f32 %v3627_v4, %v3626_v2  ;;  %v3688_v8 = vpop.f32.mrb[9].mxu1 }
 0x10e   :  { %v3689_v10 = vadd.f32 %v3688_v8, %v3687_v3  ;;  %v5071_v11 = vld [vmem:[#allocation2] sm:$0xff] }
 0x10f   :  { %378 = vst.msk [vmem:[#allocation2 + $0x10] sm:$0xff] %vm375_vm6, %v347_v5  ;;  %v247_v13 = vadd.f32 %v3628_v7, %v5064_v52  ;;  %v3629_v14 = vpop.f32.mrb[8].mxu0  ;;  %683 = vrot.lane.b32.xlu1 %v5071_v11, %s4477_s2 }
 0x110   :  { %v3690_v15 = vpop.f32.mrb[10].mxu1  ;;  %v3630_v16 = vpop.f32.mrb[9].mxu0  ;;  %v499_v59 = vadd.f32 %v3689_v10, %v3490_v51 }
 0x111   :  { %v352_v20 = vadd.f32 %v3812_v33, %v247_v13  ;;  %v3631_v28 = vadd.f32 %v3630_v16, %v3629_v14  ;;  %v3691_v21 = vpop.f32.mrb[11].mxu1 }
 0x112   :  { %v3692_v23 = vadd.f32 %v3691_v21, %v3690_v15 }
 0x113   :  { %379 = vst.msk [vmem:[#allocation2 + $0x18] sm:$0xff] %vm375_vm6, %v352_v20  ;;  %v252_v24 = vadd.f32 %v3631_v28, %v5064_v52  ;;  %v3632_v25 = vpop.f32.mrb[10].mxu0 }
 0x114   :  { %v3693_v30 = vpop.f32.mrb[12].mxu1  ;;  %v3633_v31 = vpop.f32.mrb[11].mxu0 }
 0x115   :  { %v357_v32 = vadd.f32 %v356_v48, %v252_v24  ;;  %v3634_v34 = vadd.f32 %v3633_v31, %v3632_v25  ;;  %v3694_v35 = vpop.f32.mrb[13].mxu1 }
 0x116   :  { %v3695_v36 = vadd.f32 %v3694_v35, %v3693_v30 }
 0x117   :  { %380 = vst.msk [vmem:[#allocation2 + $0x20] sm:$0xff] %vm375_vm6, %v357_v32  ;;  %v257_v40 = vadd.f32 %v3634_v34, %v5064_v52  ;;  %v3635_v41 = vpop.f32.mrb[12].mxu0 }
 0x118   :  { %v3696_v42 = vpop.f32.mrb[14].mxu1  ;;  %v3636_v44 = vpop.f32.mrb[13].mxu0  ;;  %v509_v4 = vadd.f32 %v3695_v36, %v3490_v51 }
 0x119   :  { %v362_v46 = vadd.f32 %v3815_v47, %v257_v40  ;;  %v3637_v43 = vadd.f32 %v3636_v44, %v3635_v41  ;;  %v3697_v6 = vpop.f32.mrb[15].mxu1  ;;  %v504_v47 = vadd.f32 %v3692_v23, %v3490_v51 }
 0x11a   :  { %v3698_v19 = vadd.f32 %v3697_v6, %v3696_v42 }
 0x11b   :  { %381 = vst.msk [vmem:[#allocation2 + $0x28] sm:$0xff] %vm375_vm6, %v362_v46  ;;  %v262_v22 = vadd.f32 %v3637_v43, %v5064_v52  ;;  %v3638_v33 = vpop.f32.mrb[14].mxu0 }
 0x11c   :  { %v3699_v37 = vpop.f32.mrb[16].mxu1  ;;  %v3639_v48 = vpop.f32.mrb[15].mxu0  ;;  %v514_v2 = vadd.f32 %v3698_v19, %v3490_v51 }
 0x11d   :  { %v367_v53 = vadd.f32 %v5059_v50, %v262_v22  ;;  %v3640_v54 = vadd.f32 %v3639_v48, %v3638_v33  ;;  %v3700_v55 = vpop.f32.mrb[17].mxu1 }
 0x11e   :  { %v3701_v56 = vadd.f32 %v3700_v55, %v3699_v37 }
 0x11f   :  { %382 = vst.msk [vmem:[#allocation2 + $0x30] sm:$0xff] %vm375_vm6, %v367_v53  ;;  %v267_v57 = vadd.f32 %v3640_v54, %v5064_v52  ;;  %v3833_v58 = vpop.f32.mrb[16].mxu0 }
 0x120   :  { %v3702_v60 = vpop.f32.mrb[18].mxu1  ;;  %v609_v61 = vadd.f32 %v3833_v58, %v504_v47  ;;  %v603_v62 = vpop.f32.mrb[17].mxu0  ;;  %v519_v15 = vadd.f32 %v3701_v56, %v3490_v51 }
 0x121   :  { %v372_v63 = vadd.f32 %v5057_v49, %v267_v57  ;;  %v3703_v0 = vpop.f32.mrb[19].mxu1  ;;  %v604_v1 = vadd.f32 %v603_v62, %v499_v59 }
 0x122   :  { %643 = vst.msk [vmem:[#allocation3 + $0x8] sm:$0xff] %vm375_vm6, %v609_v61  ;;  %v3704_v50 = vadd.f32 %v3703_v0, %v3702_v60 }
 0x123   :  { %383 = vst.msk [vmem:[#allocation2 + $0x38] sm:$0xff] %vm375_vm6, %v372_v63  ;;  %642 = vst.msk [vmem:[#allocation3] sm:$0xff] %vm375_vm6, %v604_v1  ;;  %v3836_v3 = vpop.f32.mrb[18].mxu0  ;;  %v809_v1 = vld [vmem:[#allocation2 + $0x8] sm:$0xff] }
 0x124   :  { %v3705_v52 = vpop.f32.mrb[20].mxu1  ;;  %v619_v5 = vadd.f32 %v3836_v3, %v514_v2  ;;  %v613_v7 = vpop.f32.mrb[19].mxu0  ;;  %v524_v13 = vadd.f32 %v3704_v50, %v3490_v51 }
 0x125   :  { %v3706_v8 = vpop.f32.mrb[21].mxu1  ;;  %v614_v10 = vadd.f32 %v613_v7, %v509_v4 }
 0x126   :  { %645 = vst.msk [vmem:[#allocation3 + $0x18] sm:$0xff] %vm375_vm6, %v619_v5  ;;  %v3707_v49 = vadd.f32 %v3706_v8, %v3705_v52 }
 0x127   :  { %644 = vst.msk [vmem:[#allocation3 + $0x10] sm:$0xff] %vm375_vm6, %v614_v10  ;;  %v3839_v14 = vpop.f32.mrb[20].mxu0 }
 0x128   :  { %v3708_v16 = vpop.f32.mrb[22].mxu1  ;;  %v629_v20 = vadd.f32 %v3839_v14, %v524_v13  ;;  %v623_v28 = vpop.f32.mrb[21].mxu0  ;;  %v529_v30 = vadd.f32 %v3707_v49, %v3490_v51 }
 0x129   :  { %v3709_v21 = vpop.f32.mrb[23].mxu1  ;;  %v624_v23 = vadd.f32 %v623_v28, %v519_v15 }
 0x12a   :  { %647 = vst.msk [vmem:[#allocation3 + $0x28] sm:$0xff] %vm375_vm6, %v629_v20  ;;  %v3710_v24 = vadd.f32 %v3709_v21, %v3708_v16 }
 0x12b   :  { %646 = vst.msk [vmem:[#allocation3 + $0x20] sm:$0xff] %vm375_vm6, %v624_v23  ;;  %v3842_v25 = vpop.f32.mrb[22].mxu0 }
 0x12c   :  { %v534_v31 = vadd.f32 %v3710_v24, %v3490_v51  ;;  %v633_v32 = vpop.f32.mrb[23].mxu0  ;;  %v5116_v51 = vld [vmem:[%s5761_s7] ss:$0 sm:$0xff] }
 0x12d   :  { %v634_v34 = vadd.f32 %v633_v32, %v529_v30 }
 0x12e   :  { %v639_v35 = vadd.f32 %v3842_v25, %v534_v31 }
 0x12f   :  { %648 = vst.msk [vmem:[#allocation3 + $0x30] sm:$0xff] %vm375_vm6, %v634_v34 }
 0x130   :  { %649 = vst.msk [vmem:[#allocation3 + $0x38] sm:$0xff] %vm375_vm6, %v639_v35 }
 0x131   :  { %v931_v31 = vld [vmem:[#allocation3 + $0x28] sm:$0xff] }
 0x136   :  { %v810_v40 = vld [vmem:[#allocation3 + $0x30] sm:$0xff] }
 0x137   :  { %v677_v36 = vld [vmem:[#allocation3 + $0x38] sm:$0xff] }
 0x138   :  { %679 = vrot.lane.b32.xlu0 %v677_v36, %s4477_s2  ;;  %686 = vrot.lane.b32.xlu1 %v677_v36, %s4479_s5 }
 0x13c   :  { %693 = vrot.lane.b32.xlu0 %v5071_v11, %s4479_s5  ;;  %696 = vrot.lane.b32.xlu1 %v677_v36, %s4480_s4 }
 0x140   :  { %797 = vrot.lane.b32.xlu1 %v5044_v12, %s4479_s5 }
 0x144   :  { %812 = vrot.lane.b32.xlu1 %v810_v40, %s4477_s2 }
 0x148   :  { %819 = vrot.lane.b32.xlu1 %v810_v40, %s4479_s5 }
 0x14c   :  { %828 = vrot.lane.b32.xlu1 %v810_v40, %s4480_s4 }
 0x16a   :  { %v769_v41 = vpop.f32.mrb[24].mxu1 }
 0x16b   :  { %v771_v42 = vpop.f32.mrb[25].mxu1 }
 0x16c   :  { %v787_v53 = vadd.f32 %v5116_v51, %v771_v42 }
 0x181   :  { %v684_v44 = vpop.permute.xlu1 %683 }
 0x1aa   :  { %v680_v46 = vpop.permute.xlu0 %679  ;;  %v687_v6 = vpop.permute.xlu1 %686 }
 0x1ab   :  { %v689_v43 = vsel %vm674_vm4, %v5071_v11, %v680_v46 }
 0x1ac   :  { %v691_v19 = vsel %vm690_vm5, %v689_v43, %v684_v44 }
 0x1ad   :  { %v692_v22 = vsel %vm375_vm6, %v691_v19, %v687_v6 }
 0x1ae   :  { %v774_v12 = vadd.f32 %v769_v41, %v692_v22  ;;  %v694_v54 = vpop.permute.xlu0 %693  ;;  %v697_v11 = vpop.permute.xlu1 %696  ;;  %v930_v41 = vld [vmem:[#allocation2 + $0x10] sm:$0xff] }
 0x1af   :  { %v699_v47 = vsel %vm674_vm4, %v694_v54, %v697_v11 }
 0x1b0   :  { %v3502_v33 = vmul.f32 -1.442695, %v774_v12 }
 0x1b2   :  { %4380 = vpow2.f32 %v3502_v33  ;;  %v798_v60 = vpop.permute.xlu1 %797 }
 0x1b6   :  { %v813_v2 = vpop.permute.xlu1 %812 }
 0x1b7   :  { %v822_v4 = vsel %vm674_vm4, %v809_v1, %v813_v2  ;;  %v1051_v2 = vld [vmem:[#allocation2 + $0x18] sm:$0xff] }
 0x1ba   :  { %v820_v5 = vpop.permute.xlu1 %819 }
 0x1bc   :  { %v4381_v37 = vpop.eup %4380 }
 0x1bd   :  { %v778_v48 = vadd.f32 1.0, %v4381_v37 }
 0x1be   :  { %v829_v21 = vpop.permute.xlu1 %828 }
 0x1bf   :  { %4382 = vrcp.f32 %v778_v48 }
 0x1c9   :  { %v4383_v55 = vpop.eup %4382 }
 0x1ca   :  { %v788_v56 = vmul.f32 %v4383_v55, %v787_v53  ;;  %v791_v59 = vsub.f32 1.0, %v4383_v55  ;;  %v800_v62 = vmul.f32 %v4383_v55, %v798_v60 }
 0x1cc   :  { %v789_v57 = vadd.f32 %v788_v56, %v699_v47 }
 0x1ce   :  { %4384 = vtanh.f32 %v789_v57 }
 0x1d8   :  { %v4385_v58 = vpop.eup %4384 }
 0x1d9   :  { %793 = vrot.lane.b32.xlu0 %v4385_v58, %s4479_s5 }
 0x24b   :  { %v794_v61 = vpop.permute.xlu0 %793 }
 0x24c   :  { %v796_v63 = vmul.f32 %v794_v61, %v791_v59  ;;  %v1052_v61 = vld [vmem:[#allocation3 + $0x20] sm:$0xff] }
 0x24e   :  { %v801_v0 = vadd.f32 %v800_v62, %v796_v63 }
 0x250   :  { %803 = vrot.lane.b32.xlu0 %v801_v0, %s4479_s5 }
 0x254   :  { %816 = vrot.lane.b32.xlu0 %v809_v1, %s4477_s2 }
 0x258   :  { %825 = vrot.lane.b32.xlu0 %v809_v1, %s4479_s5 }
 0x2c2   :  { %v804_v50 = vpop.permute.xlu0 %803 }
 0x2c3   :  { %806 = vst.msk [vmem:[#allocation4] sm:$0xff] %vm674_vm4, %v804_v50  ;;  %3504 = vmatmul.mubr.msk.f32.vlgmr.msra.gmra.mrb[24].mxu0 %vm690_vm5, %v804_v50 }
 0x2c4   :  { %808 = vst.msk [vmem:[#allocation4 + $0x38] sm:$0xff] %vm807_vm7, %v804_v50  ;;  %4106 = vmatpush1.bf16.msra.mxu0 %v4939_v17  ;;  %1140 = vmatprep.mubr.f32.mxu0 %v4478_v26 }
 0x2c5   :  { %4108 = vmatprep.subr.bf16.mxu0 %v4943_v18 }
 0x2c6   :  { %v817_v3 = vpop.permute.xlu0 %816 }
 0x2c7   :  { %v823_v52 = vsel %vm690_vm5, %v822_v4, %v817_v3 }
 0x2c8   :  { %4110 = vmatpush1.bf16.msra.mxu0 %v4964_v27  ;;  %v824_v7 = vsel %vm375_vm6, %v823_v52, %v820_v5 }
 0x2c9   :  { %4112 = vmatprep.subr.bf16.mxu0 %v4967_v29 }
 0x2ca   :  { %v826_v16 = vpop.permute.xlu0 %825 }
 0x2cb   :  { %v831_v24 = vsel %vm674_vm4, %v826_v16, %v829_v21 }
 0x2cc   :  { %4114 = vmatpush1.bf16.msra.mxu0 %v4988_v38 }
 0x2cd   :  { %4116 = vmatprep.subr.bf16.mxu0 %v4991_v39 }
 0x2d0   :  { %4118 = vmatpush1.bf16.msra.mxu0 %v5006_v45 }
 0x2d1   :  { %4136 = vmatprep.subr.bf16.mxu0 %v4917_v9 }
 0x396   :  { %v900_v8 = vpop.f32.mrb[24].mxu0 }
 0x397   :  { %v905_v10 = vadd.f32 %v900_v8, %v824_v7  ;;  %v902_v49 = vpop.f32.mrb[25].mxu0 }
 0x398   :  { %v912_v20 = vadd.f32 %v5116_v51, %v902_v49 }
 0x399   :  { %v3505_v13 = vmul.f32 -1.442695, %v905_v10 }
 0x39b   :  { %4386 = vpow2.f32 %v3505_v13 }
 0x3a5   :  { %v4387_v14 = vpop.eup %4386 }
 0x3a6   :  { %v909_v15 = vadd.f32 1.0, %v4387_v14 }
 0x3a8   :  { %4388 = vrcp.f32 %v909_v15 }
 0x3b2   :  { %v4389_v28 = vpop.eup %4388 }
 0x3b3   :  { %v913_v23 = vmul.f32 %v4389_v28, %v912_v20  ;;  %v916_v32 = vsub.f32 1.0, %v4389_v28  ;;  %v922_v35 = vmul.f32 %v4389_v28, %v801_v0 }
 0x3b5   :  { %v914_v25 = vadd.f32 %v913_v23, %v831_v24 }
 0x3b7   :  { %4390 = vtanh.f32 %v914_v25 }
 0x3c1   :  { %v4391_v30 = vpop.eup %4390 }
 0x3c2   :  { %918 = vrot.lane.b32.xlu0 %v4391_v30, %s4479_s5 }
 0x3c6   :  { %933 = vrot.lane.b32.xlu0 %v931_v31, %s4477_s2 }
 0x3ca   :  { %940 = vrot.lane.b32.xlu0 %v931_v31, %s4479_s5 }
 0x3ce   :  { %949 = vrot.lane.b32.xlu0 %v931_v31, %s4480_s4 }
 0x434   :  { %v919_v34 = vpop.permute.xlu0 %918 }
 0x435   :  { %v921_v36 = vmul.f32 %v919_v34, %v916_v32  ;;  %v1173_v32 = vld [vmem:[#allocation3 + $0x18] sm:$0xff] }
 0x437   :  { %v923_v40 = vadd.f32 %v922_v35, %v921_v36 }
 0x438   :  { %v934_v44 = vpop.permute.xlu0 %933 }
 0x439   :  { %925 = vrot.lane.b32.xlu1 %v923_v40, %s4479_s5  ;;  %v943_v43 = vsel %vm674_vm4, %v930_v41, %v934_v44 }
 0x43c   :  { %v941_v19 = vpop.permute.xlu0 %940 }
 0x43d   :  { %937 = vrot.lane.b32.xlu1 %v930_v41, %s4477_s2 }
 0x440   :  { %v950_v47 = vpop.permute.xlu0 %949 }
 0x441   :  { %946 = vrot.lane.b32.xlu1 %v930_v41, %s4479_s5 }
 0x4ab   :  { %v926_v42 = vpop.permute.xlu1 %925 }
 0x4ac   :  { %928 = vst.msk [vmem:[#allocation4 + $0x8] sm:$0xff] %vm674_vm4, %v926_v42  ;;  %3506 = vmatmul.mubr.msk.f32.vlgmr.msra.gmra.mrb[26].mxu1 %vm690_vm5, %v926_v42 }
 0x4ad   :  { %929 = vst.msk [vmem:[#allocation4 + $0x30] sm:$0xff] %vm807_vm7, %v926_v42  ;;  %4122 = vmatpush1.bf16.msra.mxu1 %v4939_v17  ;;  %1261 = vmatprep.mubr.f32.mxu1 %v4478_v26  ;;  %v1172_v42 = vld [vmem:[#allocation2 + $0x20] sm:$0xff] }
 0x4ae   :  { %4124 = vmatprep.subr.bf16.mxu1 %v4943_v18 }
 0x4af   :  { %v938_v46 = vpop.permute.xlu1 %937 }
 0x4b0   :  { %v944_v6 = vsel %vm690_vm5, %v943_v43, %v938_v46 }
 0x4b1   :  { %4126 = vmatpush1.bf16.msra.mxu1 %v4964_v27  ;;  %v945_v22 = vsel %vm375_vm6, %v944_v6, %v941_v19 }
 0x4b2   :  { %4128 = vmatprep.subr.bf16.mxu1 %v4967_v29 }
 0x4b3   :  { %v947_v11 = vpop.permute.xlu1 %946 }
 0x4b4   :  { %v952_v58 = vsel %vm674_vm4, %v947_v11, %v950_v47 }
 0x4b5   :  { %4130 = vmatpush1.bf16.msra.mxu1 %v4988_v38 }
 0x4b6   :  { %4132 = vmatprep.subr.bf16.mxu1 %v4991_v39 }
 0x4b9   :  { %4134 = vmatpush1.bf16.msra.mxu1 %v5006_v45 }
 0x4ba   :  { %4152 = vmatprep.subr.bf16.mxu1 %v4917_v9 }
 0x57f   :  { %v1021_v12 = vpop.f32.mrb[26].mxu1 }
 0x580   :  { %v1026_v33 = vadd.f32 %v1021_v12, %v945_v22  ;;  %v1023_v37 = vpop.f32.mrb[27].mxu1 }
 0x581   :  { %v1033_v55 = vadd.f32 %v5116_v51, %v1023_v37 }
 0x582   :  { %v3507_v48 = vmul.f32 -1.442695, %v1026_v33 }
 0x584   :  { %4392 = vpow2.f32 %v3507_v48 }
 0x58e   :  { %v4393_v53 = vpop.eup %4392 }
 0x58f   :  { %v1030_v54 = vadd.f32 1.0, %v4393_v53 }
 0x591   :  { %4394 = vrcp.f32 %v1030_v54 }
 0x59b   :  { %v4395_v56 = vpop.eup %4394 }
 0x59c   :  { %v1034_v57 = vmul.f32 %v4395_v56, %v1033_v55  ;;  %v1037_v62 = vsub.f32 1.0, %v4395_v56  ;;  %v1043_v0 = vmul.f32 %v4395_v56, %v923_v40 }
 0x59e   :  { %v1035_v59 = vadd.f32 %v1034_v57, %v952_v58 }
 0x5a0   :  { %4396 = vtanh.f32 %v1035_v59 }
 0x5aa   :  { %v4397_v60 = vpop.eup %4396 }
 0x5ab   :  { %1039 = vrot.lane.b32.xlu1 %v4397_v60, %s4479_s5 }
 0x5af   :  { %1054 = vrot.lane.b32.xlu1 %v1052_v61, %s4477_s2 }
 0x5b3   :  { %1061 = vrot.lane.b32.xlu1 %v1052_v61, %s4479_s5 }
 0x5b7   :  { %1070 = vrot.lane.b32.xlu1 %v1052_v61, %s4480_s4 }
 0x61d   :  { %v1040_v63 = vpop.permute.xlu1 %1039 }
 0x61e   :  { %v1042_v1 = vmul.f32 %v1040_v63, %v1037_v62  ;;  %v1294_v62 = vld [vmem:[#allocation3 + $0x10] sm:$0xff] }
 0x620   :  { %v1044_v50 = vadd.f32 %v1043_v0, %v1042_v1 }
 0x621   :  { %v1055_v4 = vpop.permute.xlu1 %1054 }
 0x622   :  { %1046 = vrot.lane.b32.xlu0 %v1044_v50, %s4479_s5  ;;  %v1064_v5 = vsel %vm674_vm4, %v1051_v2, %v1055_v4 }
 0x625   :  { %v1062_v8 = vpop.permute.xlu1 %1061 }
 0x626   :  { %1058 = vrot.lane.b32.xlu0 %v1051_v2, %s4477_s2 }
 0x629   :  { %v1071_v23 = vpop.permute.xlu1 %1070 }
 0x62a   :  { %1067 = vrot.lane.b32.xlu0 %v1051_v2, %s4479_s5 }
 0x694   :  { %v1047_v3 = vpop.permute.xlu0 %1046 }
 0x695   :  { %1049 = vst.msk [vmem:[#allocation4 + $0x10] sm:$0xff] %vm674_vm4, %v1047_v3  ;;  %3508 = vmatmul.mubr.msk.f32.vlgmr.msra.gmra.mrb[26].mxu0 %vm690_vm5, %v1047_v3 }
 0x696   :  { %1050 = vst.msk [vmem:[#allocation4 + $0x28] sm:$0xff] %vm807_vm7, %v1047_v3  ;;  %4138 = vmatpush1.bf16.msra.mxu0 %v4939_v17  ;;  %1382 = vmatprep.mubr.f32.mxu0 %v4478_v26  ;;  %v1293_v3 = vld [vmem:[#allocation2 + $0x28] sm:$0xff] }
 0x697   :  { %4140 = vmatprep.subr.bf16.mxu0 %v4943_v18 }
 0x698   :  { %v1059_v52 = vpop.permute.xlu0 %1058 }
 0x699   :  { %v1065_v7 = vsel %vm690_vm5, %v1064_v5, %v1059_v52 }
 0x69a   :  { %4142 = vmatpush1.bf16.msra.mxu0 %v4964_v27  ;;  %v1066_v10 = vsel %vm375_vm6, %v1065_v7, %v1062_v8 }
 0x69b   :  { %4144 = vmatprep.subr.bf16.mxu0 %v4967_v29 }
 0x69c   :  { %v1068_v28 = vpop.permute.xlu0 %1067 }
 0x69d   :  { %v1073_v25 = vsel %vm674_vm4, %v1068_v28, %v1071_v23 }
 0x69e   :  { %4146 = vmatpush1.bf16.msra.mxu0 %v4988_v38 }
 0x69f   :  { %4148 = vmatprep.subr.bf16.mxu0 %v4991_v39 }
 0x6a2   :  { %4150 = vmatpush1.bf16.msra.mxu0 %v5006_v45 }
 0x6a3   :  { %4168 = vmatprep.subr.bf16.mxu0 %v4917_v9 }
 0x768   :  { %v1142_v49 = vpop.f32.mrb[26].mxu0 }
 0x769   :  { %v1147_v13 = vadd.f32 %v1142_v49, %v1066_v10  ;;  %v1144_v14 = vpop.f32.mrb[27].mxu0 }
 0x76a   :  { %v1154_v9 = vadd.f32 %v5116_v51, %v1144_v14 }
 0x76b   :  { %v3509_v15 = vmul.f32 -1.442695, %v1147_v13 }
 0x76d   :  { %4398 = vpow2.f32 %v3509_v15 }
 0x777   :  { %v4399_v16 = vpop.eup %4398 }
 0x778   :  { %v1151_v20 = vadd.f32 1.0, %v4399_v16 }
 0x77a   :  { %4400 = vrcp.f32 %v1151_v20 }
 0x784   :  { %v4401_v21 = vpop.eup %4400 }
 0x785   :  { %v1155_v24 = vmul.f32 %v4401_v21, %v1154_v9  ;;  %v1158_v34 = vsub.f32 1.0, %v4401_v21  ;;  %v1164_v36 = vmul.f32 %v4401_v21, %v1044_v50  ;;  %v1415_v21 = vld [vmem:[#allocation3 + $0x8] sm:$0xff] }
 0x787   :  { %v1156_v30 = vadd.f32 %v1155_v24, %v1073_v25 }
 0x789   :  { %4402 = vtanh.f32 %v1156_v30 }
 0x793   :  { %v4403_v31 = vpop.eup %4402 }
 0x794   :  { %1160 = vrot.lane.b32.xlu0 %v4403_v31, %s4479_s5 }
 0x798   :  { %1175 = vrot.lane.b32.xlu0 %v1173_v32, %s4477_s2 }
 0x79c   :  { %1182 = vrot.lane.b32.xlu0 %v1173_v32, %s4479_s5 }
 0x7a0   :  { %1191 = vrot.lane.b32.xlu0 %v1173_v32, %s4480_s4  ;;  %v1414_v32 = vld [vmem:[#allocation2 + $0x30] sm:$0xff] }
 0x806   :  { %v1161_v35 = vpop.permute.xlu0 %1160 }
 0x807   :  { %v1163_v40 = vmul.f32 %v1161_v35, %v1158_v34 }
 0x809   :  { %v1165_v41 = vadd.f32 %v1164_v36, %v1163_v40 }
 0x80a   :  { %v1176_v46 = vpop.permute.xlu0 %1175 }
 0x80b   :  { %1167 = vrot.lane.b32.xlu1 %v1165_v41, %s4479_s5  ;;  %v1185_v6 = vsel %vm674_vm4, %v1172_v42, %v1176_v46 }
 0x80e   :  { %v1183_v22 = vpop.permute.xlu0 %1182 }
 0x80f   :  { %1179 = vrot.lane.b32.xlu1 %v1172_v42, %s4477_s2 }
 0x812   :  { %v1192_v57 = vpop.permute.xlu0 %1191 }
 0x813   :  { %1188 = vrot.lane.b32.xlu1 %v1172_v42, %s4479_s5 }
 0x87d   :  { %v1168_v44 = vpop.permute.xlu1 %1167 }
 0x87e   :  { %1170 = vst.msk [vmem:[#allocation4 + $0x18] sm:$0xff] %vm674_vm4, %v1168_v44  ;;  %3510 = vmatmul.mubr.msk.f32.vlgmr.msra.gmra.mrb[28].mxu1 %vm690_vm5, %v1168_v44 }
 0x87f   :  { %1171 = vst.msk [vmem:[#allocation4 + $0x20] sm:$0xff] %vm807_vm7, %v1168_v44  ;;  %4154 = vmatpush1.bf16.msra.mxu1 %v4939_v17  ;;  %1503 = vmatprep.mubr.f32.mxu1 %v4478_v26 }
 0x880   :  { %4156 = vmatprep.subr.bf16.mxu1 %v4943_v18 }
 0x881   :  { %v1180_v43 = vpop.permute.xlu1 %1179 }
 0x882   :  { %v1186_v19 = vsel %vm690_vm5, %v1185_v6, %v1180_v43 }
 0x883   :  { %4158 = vmatpush1.bf16.msra.mxu1 %v4964_v27  ;;  %v1187_v12 = vsel %vm375_vm6, %v1186_v19, %v1183_v22 }
 0x884   :  { %4160 = vmatprep.subr.bf16.mxu1 %v4967_v29 }
 0x885   :  { %v1189_v55 = vpop.permute.xlu1 %1188 }
 0x886   :  { %v1194_v59 = vsel %vm674_vm4, %v1189_v55, %v1192_v57 }
 0x887   :  { %4162 = vmatpush1.bf16.msra.mxu1 %v4988_v38 }
 0x888   :  { %4164 = vmatprep.subr.bf16.mxu1 %v4991_v39 }
 0x88b   :  { %4166 = vmatpush1.bf16.msra.mxu1 %v5006_v45 }
 0x951   :  { %v1263_v33 = vpop.f32.mrb[28].mxu1 }
 0x952   :  { %v1268_v37 = vadd.f32 %v1263_v33, %v1187_v12  ;;  %v1265_v48 = vpop.f32.mrb[29].mxu1 }
 0x953   :  { %v1275_v56 = vadd.f32 %v5116_v51, %v1265_v48 }
 0x954   :  { %v3511_v53 = vmul.f32 -1.442695, %v1268_v37 }
 0x956   :  { %4404 = vpow2.f32 %v3511_v53 }
 0x960   :  { %v4405_v54 = vpop.eup %4404 }
 0x961   :  { %v1272_v11 = vadd.f32 1.0, %v4405_v54 }
 0x963   :  { %4406 = vrcp.f32 %v1272_v11 }
 0x96d   :  { %v4407_v47 = vpop.eup %4406 }
 0x96e   :  { %v1276_v58 = vmul.f32 %v4407_v47, %v1275_v56  ;;  %v1279_v63 = vsub.f32 1.0, %v4407_v47  ;;  %v1285_v1 = vmul.f32 %v4407_v47, %v1165_v41  ;;  %v1536_v47 = vld [vmem:[#allocation3] sm:$0xff] }
 0x970   :  { %v1277_v60 = vadd.f32 %v1276_v58, %v1194_v59 }
 0x972   :  { %4408 = vtanh.f32 %v1277_v60 }
 0x97c   :  { %v4409_v61 = vpop.eup %4408 }
 0x97d   :  { %1281 = vrot.lane.b32.xlu1 %v4409_v61, %s4479_s5 }
 0x981   :  { %1296 = vrot.lane.b32.xlu1 %v1294_v62, %s4477_s2 }
 0x985   :  { %1303 = vrot.lane.b32.xlu1 %v1294_v62, %s4479_s5 }
 0x989   :  { %1312 = vrot.lane.b32.xlu1 %v1294_v62, %s4480_s4  ;;  %v1535_v62 = vld [vmem:[#allocation2 + $0x38] sm:$0xff] }
 0x9ef   :  { %v1282_v0 = vpop.permute.xlu1 %1281 }
 0x9f0   :  { %v1284_v50 = vmul.f32 %v1282_v0, %v1279_v63 }
 0x9f2   :  { %v1286_v2 = vadd.f32 %v1285_v1, %v1284_v50 }
 0x9f3   :  { %v1297_v52 = vpop.permute.xlu1 %1296 }
 0x9f4   :  { %1288 = vrot.lane.b32.xlu0 %v1286_v2, %s4479_s5  ;;  %v1306_v7 = vsel %vm674_vm4, %v1293_v3, %v1297_v52 }
 0x9f7   :  { %v1304_v8 = vpop.permute.xlu1 %1303 }
 0x9f8   :  { %1300 = vrot.lane.b32.xlu0 %v1293_v3, %s4477_s2 }
 0x9fb   :  { %v1313_v15 = vpop.permute.xlu1 %1312 }
 0x9fc   :  { %1309 = vrot.lane.b32.xlu0 %v1293_v3, %s4479_s5 }
 0xa66   :  { %v1289_v4 = vpop.permute.xlu0 %1288 }
 0xa67   :  { %1291 = vst.msk [vmem:[#allocation4 + $0x20] sm:$0xff] %vm674_vm4, %v1289_v4  ;;  %3512 = vmatmul.mubr.msk.f32.vlgmr.msra.gmra.mrb[28].mxu0 %vm690_vm5, %v1289_v4 }
 0xa68   :  { %1292 = vst.msk [vmem:[#allocation4 + $0x18] sm:$0xff] %vm807_vm7, %v1289_v4  ;;  %4170 = vmatpush1.bf16.msra.mxu0 %v4939_v17  ;;  %1624 = vmatprep.mubr.f32.mxu0 %v4478_v26 }
 0xa69   :  { %4172 = vmatprep.subr.bf16.mxu0 %v4943_v18 }
 0xa6a   :  { %v1301_v5 = vpop.permute.xlu0 %1300 }
 0xa6b   :  { %v1307_v17 = vsel %vm690_vm5, %v1306_v7, %v1301_v5 }
 0xa6c   :  { %4174 = vmatpush1.bf16.msra.mxu0 %v4964_v27  ;;  %v1308_v10 = vsel %vm375_vm6, %v1307_v17, %v1304_v8 }
 0xa6d   :  { %4176 = vmatprep.subr.bf16.mxu0 %v4967_v29 }
 0xa70   :  { %4178 = vmatpush1.bf16.msra.mxu0 %v4988_v38 }
 0xa71   :  { %4180 = vmatprep.subr.bf16.mxu0 %v4991_v39  ;;  %v1310_v39 = vpop.permute.xlu0 %1309 }
 0xa72   :  { %v1315_v20 = vsel %vm674_vm4, %v1310_v39, %v1313_v15  ;;  %v1822_v15 = vld [vmem:[%s5763_s10] sm:$0xff] }
 0xa74   :  { %4182 = vmatpush1.bf16.msra.mxu0 %v5006_v45 }
 0xb3a   :  { %v1384_v18 = vpop.f32.mrb[28].mxu0 }
 0xb3b   :  { %v1389_v49 = vadd.f32 %v1384_v18, %v1308_v10  ;;  %v1386_v27 = vpop.f32.mrb[29].mxu0 }
 0xb3c   :  { %v1396_v45 = vadd.f32 %v5116_v51, %v1386_v27 }
 0xb3d   :  { %v3513_v13 = vmul.f32 -1.442695, %v1389_v49 }
 0xb3f   :  { %4410 = vpow2.f32 %v3513_v13 }
 0xb49   :  { %v4411_v29 = vpop.eup %4410 }
 0xb4a   :  { %v1393_v38 = vadd.f32 1.0, %v4411_v29 }
 0xb4c   :  { %4412 = vrcp.f32 %v1393_v38 }
 0xb56   :  { %v4413_v14 = vpop.eup %4412 }
 0xb57   :  { %v1397_v16 = vmul.f32 %v4413_v14, %v1396_v45  ;;  %v1400_v23 = vsub.f32 1.0, %v4413_v14  ;;  %v1406_v25 = vmul.f32 %v4413_v14, %v1286_v2  ;;  %v1670_v45 = vld [vmem:[%s5762_s8] sm:$0xff]  ;;  %v1671_v14 = vld [vmem:[%s5762_s8 + $0x8] sm:$0xff] }
 0xb59   :  { %v1398_v28 = vadd.f32 %v1397_v16, %v1315_v20  ;;  %v1823_v16 = vld [vmem:[%s5763_s10 + $0x8] sm:$0xff]  ;;  %v1672_v20 = vld [vmem:[%s5762_s8 + $0x10] sm:$0xff] }
 0xb5b   :  { %4414 = vtanh.f32 %v1398_v28  ;;  %v1673_v28 = vld [vmem:[%s5762_s8 + $0x18] sm:$0xff] }
 0xb65   :  { %v4415_v9 = vpop.eup %4414 }
 0xb66   :  { %1402 = vrot.lane.b32.xlu0 %v4415_v9, %s4479_s5  ;;  %v4199_v9 = vpack.c.bf16 %v1823_v16, %v1822_v15  ;;  %v3519_v16 = vld [vmem:[%s5766_s9] ss:$0 sm:$0xff] }
 0xb68   :  { %4200 = vmatprep.subr.bf16.mxu0 %v4199_v9 }
 0xb6a   :  { %1417 = vrot.lane.b32.xlu0 %v1415_v21, %s4477_s2 }
 0xb6e   :  { %1424 = vrot.lane.b32.xlu0 %v1415_v21, %s4479_s5 }
 0xb72   :  { %1433 = vrot.lane.b32.xlu0 %v1415_v21, %s4480_s4  ;;  %v4187_v21 = vpack.c.bf16 %v1673_v28, %v1672_v20  ;;  %v3528_v20 = vld [vmem:[%s5767_s11] ss:$0 sm:$0xff] }
 0xbd8   :  { %v1403_v24 = vpop.permute.xlu0 %1402 }
 0xbd9   :  { %v1405_v30 = vmul.f32 %v1403_v24, %v1400_v23  ;;  %v1824_v23 = vld [vmem:[%s5763_s10 + $0x10] sm:$0xff]  ;;  %v1825_v24 = vld [vmem:[%s5763_s10 + $0x18] sm:$0xff] }
 0xbdb   :  { %v1407_v31 = vadd.f32 %v1406_v25, %v1405_v30  ;;  %v4203_v25 = vpack.c.bf16 %v1825_v24, %v1824_v23 }
 0xbdc   :  { %v1418_v35 = vpop.permute.xlu0 %1417 }
 0xbdd   :  { %1409 = vrot.lane.b32.xlu1 %v1407_v31, %s4479_s5  ;;  %v1427_v40 = vsel %vm674_vm4, %v1414_v32, %v1418_v35 }
 0xbe0   :  { %v1425_v42 = vpop.permute.xlu0 %1424 }
 0xbe1   :  { %1421 = vrot.lane.b32.xlu1 %v1414_v32, %s4477_s2 }
 0xbe4   :  { %v1434_v53 = vpop.permute.xlu0 %1433 }
 0xbe5   :  { %1430 = vrot.lane.b32.xlu1 %v1414_v32, %s4479_s5  ;;  %v1675_v32 = vld [vmem:[%s5762_s8 + $0x28] sm:$0xff] }
 0xc4f   :  { %v1410_v34 = vpop.permute.xlu1 %1409 }
 0xc50   :  { %1412 = vst.msk [vmem:[#allocation4 + $0x28] sm:$0xff] %vm674_vm4, %v1410_v34  ;;  %3514 = vmatmul.mubr.msk.f32.vlgmr.msra.gmra.mrb[30].mxu1 %vm690_vm5, %v1410_v34 }
 0xc51   :  { %1413 = vst.msk [vmem:[#allocation4 + $0x10] sm:$0xff] %vm807_vm7, %v1410_v34  ;;  %v1826_v34 = vld [vmem:[%s5763_s10 + $0x20] sm:$0xff] }
 0xc53   :  { %v1422_v36 = vpop.permute.xlu1 %1421 }
 0xc54   :  { %v1428_v41 = vsel %vm690_vm5, %v1427_v40, %v1422_v36  ;;  %v1827_v36 = vld [vmem:[%s5763_s10 + $0x28] sm:$0xff] }
 0xc55   :  { %v1429_v44 = vsel %vm375_vm6, %v1428_v41, %v1425_v42  ;;  %v4207_v40 = vpack.c.bf16 %v1827_v36, %v1826_v34  ;;  %v1676_v41 = vld [vmem:[%s5762_s8 + $0x30] sm:$0xff]  ;;  %v1677_v42 = vld [vmem:[%s5762_s8 + $0x38] sm:$0xff] }
 0xc57   :  { %v1431_v33 = vpop.permute.xlu1 %1430 }
 0xc58   :  { %v1436_v11 = vsel %vm674_vm4, %v1431_v33, %v1434_v53  ;;  %v1951_v53 = vld [vmem:[%s5764_s12 + $0x8] sm:$0xff] }
 0xd23   :  { %v1505_v46 = vpop.f32.mrb[30].mxu1 }
 0xd24   :  { %v1510_v43 = vadd.f32 %v1505_v46, %v1429_v44  ;;  %v1507_v6 = vpop.f32.mrb[31].mxu1  ;;  %v1828_v44 = vld [vmem:[%s5763_s10 + $0x30] sm:$0xff]  ;;  %v4195_v46 = vpack.c.bf16 %v1677_v42, %v1676_v41 }
 0xd25   :  { %v1517_v37 = vadd.f32 %v5116_v51, %v1507_v6 }
 0xd26   :  { %v3515_v19 = vmul.f32 -1.442695, %v1510_v43  ;;  %v1829_v43 = vld [vmem:[%s5763_s10 + $0x38] sm:$0xff] }
 0xd27   :  { %v4211_v6 = vpack.c.bf16 %v1829_v43, %v1828_v44 }
 0xd28   :  { %4416 = vpow2.f32 %v3515_v19 }
 0xd32   :  { %v4417_v22 = vpop.eup %4416 }
 0xd33   :  { %v1514_v12 = vadd.f32 1.0, %v4417_v22 }
 0xd35   :  { %4418 = vrcp.f32 %v1514_v12 }
 0xd3f   :  { %v4419_v48 = vpop.eup %4418 }
 0xd40   :  { %v1518_v54 = vmul.f32 %v4419_v48, %v1517_v37  ;;  %v1521_v57 = vsub.f32 1.0, %v4419_v48  ;;  %v1527_v59 = vmul.f32 %v4419_v48, %v1407_v31  ;;  %v1674_v31 = vld [vmem:[%s5762_s8 + $0x20] sm:$0xff]  ;;  %v3538_v48 = vld [vmem:[%s5792_s0 + $0x18] sm:$0xff] }
 0xd41   :  { %v4191_v35 = vpack.c.bf16 %v1675_v32, %v1674_v31 }
 0xd42   :  { %v1519_v55 = vadd.f32 %v1518_v54, %v1436_v11  ;;  %v1953_v54 = vld [vmem:[%s5764_s12 + $0x18] sm:$0xff] }
 0xd43   :  { %v5332_v11 = vpack.c.bf16 %v1953_v54, %v1951_v53 }
 0xd44   :  { %4420 = vtanh.f32 %v1519_v55 }
 0xd4e   :  { %v4421_v56 = vpop.eup %4420 }
 0xd4f   :  { %1523 = vrot.lane.b32.xlu1 %v4421_v56, %s4479_s5  ;;  %v1950_v56 = vld [vmem:[%s5764_s12] sm:$0xff] }
 0xd53   :  { %1538 = vrot.lane.b32.xlu1 %v1536_v47, %s4477_s2 }
 0xd57   :  { %1545 = vrot.lane.b32.xlu1 %v1536_v47, %s4479_s5 }
 0xd5b   :  { %1554 = vrot.lane.b32.xlu1 %v1536_v47, %s4480_s4  ;;  %v1952_v47 = vld [vmem:[%s5764_s12 + $0x10] sm:$0xff] }
 0xdc1   :  { %v1524_v58 = vpop.permute.xlu1 %1523 }
 0xdc2   :  { %v1526_v60 = vmul.f32 %v1524_v58, %v1521_v57  ;;  %v1955_v57 = vld [vmem:[%s5764_s12 + $0x28] sm:$0xff]  ;;  %v1957_v58 = vld [vmem:[%s5764_s12 + $0x38] sm:$0xff] }
 0xdc4   :  { %v5254_v61 = vadd.f32 %v1527_v59, %v1526_v60  ;;  %v5354_v60 = vpack.c.bf16 %v1952_v47, %v1950_v56 }
 0xdc5   :  { %v1539_v0 = vpop.permute.xlu1 %1538 }
 0xdc6   :  { %1530 = vrot.lane.b32.xlu0 %v5254_v61, %s4479_s5  ;;  %v1548_v50 = vsel %vm674_vm4, %v1535_v62, %v1539_v0  ;;  %v1956_v0 = vld [vmem:[%s5764_s12 + $0x30] sm:$0xff] }
 0xdc9   :  { %v1546_v3 = vpop.permute.xlu1 %1545 }
 0xdca   :  { %1542 = vrot.lane.b32.xlu0 %v1535_v62, %s4477_s2 }
 0xdcd   :  { %v1555_v13 = vpop.permute.xlu1 %1554 }
 0xdce   :  { %1551 = vrot.lane.b32.xlu0 %v1535_v62, %s4479_s5  ;;  %v5358_v62 = vpack.c.bf16 %v1957_v58, %v1955_v57 }
 0xe38   :  { %v1531_v63 = vpop.permute.xlu0 %1530 }
 0xe39   :  { %1533 = vst.msk [vmem:[#allocation4 + $0x30] sm:$0xff] %vm674_vm4, %v1531_v63  ;;  %3516 = vmatmul.mubr.msk.f32.vlgmr.msra.gmra.mrb[30].mxu0 %vm690_vm5, %v1531_v63 }
 0xe3a   :  { %1534 = vst.msk [vmem:[#allocation4 + $0x8] sm:$0xff] %vm807_vm7, %v1531_v63  ;;  %4202 = vmatpush3.bf16.msra.mxu0 %v4199_v9  ;;  %v1954_v63 = vld [vmem:[%s5764_s12 + $0x20] sm:$0xff] }
 0xe3b   :  { %4204 = vmatprep.subr.bf16.mxu0 %v4203_v25 }
 0xe3c   :  { %v1543_v1 = vpop.permute.xlu0 %1542 }
 0xe3d   :  { %v1549_v2 = vsel %vm690_vm5, %v1548_v50, %v1543_v1  ;;  %v1664_v1 = vld [vmem:[#allocation4 + $0x10] sm:$0xff]  ;;  %v1959_v50 = vld [vmem:[%s5764_s12 + $0x48] sm:$0xff] }
 0xe3e   :  { %v1550_v4 = vsel %vm375_vm6, %v1549_v2, %v1546_v3  ;;  %4206 = vmatpush3.bf16.msra.mxu0 %v4203_v25  ;;  %v1961_v2 = vld [vmem:[%s5764_s12 + $0x58] sm:$0xff]  ;;  %v5377_v3 = vpack.c.bf16 %v1956_v0, %v1954_v63 }
 0xe3f   :  { %4208 = vmatprep.subr.bf16.mxu0 %v4207_v40 }
 0xe40   :  { %v1552_v18 = vpop.permute.xlu0 %1551 }
 0xe41   :  { %v1557_v38 = vsel %vm674_vm4, %v1552_v18, %v1555_v13  ;;  %v1962_v13 = vld [vmem:[%s5764_s12 + $0x60] sm:$0xff] }
 0xe42   :  { %4210 = vmatpush3.bf16.msra.mxu0 %v4207_v40 }
 0xe43   :  { %4212 = vmatprep.subr.bf16.mxu0 %v4211_v6 }
 0xe46   :  { %4214 = vmatpush3.bf16.msra.mxu0 %v4211_v6 }
 0xe47   :  { %4232 = vmatprep.subr.bf16.mxu0 %v5332_v11 }
 0xf0c   :  { %v1626_v52 = vpop.f32.mrb[30].mxu0 }
 0xf0d   :  { %v1631_v5 = vadd.f32 %v1626_v52, %v1550_v4  ;;  %v1628_v7 = vpop.f32.mrb[31].mxu0  ;;  %v1665_v4 = vld [vmem:[#allocation4 + $0x18] sm:$0xff]  ;;  %v5381_v52 = vpack.c.bf16 %v1961_v2, %v1959_v50 }
 0xf0e   :  { %v1638_v49 = vadd.f32 %v5116_v51, %v1628_v7  ;;  %v4183_v51 = vpack.c.bf16 %v1671_v14, %v1670_v45  ;;  %v1960_v7 = vld [vmem:[%s5764_s12 + $0x50] sm:$0xff] }
 0xf0f   :  { %v3517_v17 = vmul.f32 -1.442695, %v1631_v5  ;;  %v1958_v5 = vld [vmem:[%s5764_s12 + $0x40] sm:$0xff]  ;;  %v3537_v14 = vld [vmem:[%s5792_s0 + $0x10] sm:$0xff] }
 0xf10   :  { %4184 = vmatprep.subr.bf16.mxu1 %v4183_v51  ;;  %v5401_v18 = vpack.c.bf16 %v1960_v7, %v1958_v5 }
 0xf11   :  { %4422 = vpow2.f32 %v3517_v17  ;;  %4186 = vmatpush3.bf16.msra.mxu1 %v4183_v51  ;;  %v1666_v17 = vld [vmem:[#allocation4 + $0x20] sm:$0xff] }
 0xf12   :  { %4188 = vmatprep.subr.bf16.mxu1 %v4187_v21 }
 0xf15   :  { %4190 = vmatpush3.bf16.msra.mxu1 %v4187_v21 }
 0xf16   :  { %4192 = vmatprep.subr.bf16.mxu1 %v4191_v35 }
 0xf19   :  { %4194 = vmatpush3.bf16.msra.mxu1 %v4191_v35 }
 0xf1a   :  { %4196 = vmatprep.subr.bf16.mxu1 %v4195_v46 }
 0xf1b   :  { %v4423_v8 = vpop.eup %4422 }
 0xf1c   :  { %v1635_v10 = vadd.f32 1.0, %v4423_v8  ;;  %v1963_v8 = vld [vmem:[%s5764_s12 + $0x68] sm:$0xff] }
 0xf1d   :  { %4198 = vmatpush3.bf16.msra.mxu1 %v4195_v46 }
 0xf1e   :  { %4424 = vrcp.f32 %v1635_v10  ;;  %4216 = vmatprep.subr.bf16.mxu1 %v5332_v11  ;;  %v1965_v10 = vld [vmem:[%s5764_s12 + $0x78] sm:$0xff] }
 0xf28   :  { %v4425_v27 = vpop.eup %4424 }
 0xf29   :  { %v1639_v29 = vmul.f32 %v4425_v27, %v1638_v49  ;;  %v1642_v19 = vsub.f32 1.0, %v4425_v27  ;;  %v1648_v12 = vmul.f32 %v4425_v27, %v5254_v61  ;;  %v1663_v61 = vld [vmem:[#allocation4 + $0x8] sm:$0xff]  ;;  %v5405_v27 = vpack.c.bf16 %v1965_v10, %v1963_v8 }
 0xf2a   :  { %v1667_v49 = vld [vmem:[#allocation4 + $0x28] sm:$0xff] }
 0xf2b   :  { %v1640_v39 = vadd.f32 %v1639_v29, %v1557_v38  ;;  %v1964_v29 = vld [vmem:[%s5764_s12 + $0x70] sm:$0xff] }
 0xf2c   :  { %v1668_v38 = vld [vmem:[#allocation4 + $0x30] sm:$0xff] }
 0xf2d   :  { %4426 = vtanh.f32 %v1640_v39  ;;  %v5419_v39 = vpack.c.bf16 %v1964_v29, %v1962_v13 }
 0xf37   :  { %v4427_v30 = vpop.eup %4426 }
 0xf38   :  { %1644 = vrot.lane.b32.xlu0 %v4427_v30, %s4479_s5 }
 0xf3c   :  { %1972 = vrot.lane.b32.xlu0 %v3538_v48, %s4477_s2 }
 0xfaa   :  { %v1645_v22 = vpop.permute.xlu0 %1644 }
 0xfab   :  { %v1647_v33 = vmul.f32 %v1645_v22, %v1642_v19 }
 0xfad   :  { %v5318_v37 = vadd.f32 %v1648_v12, %v1647_v33 }
 0xfae   :  { %v1973_v15 = vpop.permute.xlu0 %1972 }
 0xfaf   :  { %1651 = vrot.lane.b32.xlu1 %v5318_v37, %s4479_s5  ;;  %v5433_v51 = vsel %vm674_vm4, %v3537_v14, %v1973_v15 }
0x1021   :  { %v1652_v55 = vpop.permute.xlu1 %1651 }
0x1022   :  { %1654 = vst.msk [vmem:[#allocation4 + $0x38] sm:$0xff] %vm674_vm4, %v1652_v55  ;;  %1656 = vst.msk [vmem:[%s5765_s21] sm:$0xff] %vm674_vm4, %v1652_v55 }
0x1023   :  { %1655 = vst.msk [vmem:[#allocation4] sm:$0xff] %vm807_vm7, %v1652_v55 }
0x1029   :  { %v1669_v45 = vld [vmem:[#allocation4 + $0x38] sm:$0xff] }
0x102a   :  { %v1662_v59 = vld [vmem:[#allocation4] sm:$0xff] }
0x102b   :  { %3859 = vmatprep.mubr.msk.f32.mxu1 %vm690_vm5, %v1662_v59  ;;  %3887 = vmatprep.mubr.msk.f32.mxu0 %vm690_vm5, %v1662_v59 }
0x102c   :  { %3860 = vmatmul.mubr.msk.f32.vlgmr.msra.gmra.mrb[32].mxu1 %vm690_vm5, %v1663_v61  ;;  %3888 = vmatmul.mubr.msk.f32.vlgmr.msra.gmra.mrb[32].mxu0 %vm690_vm5, %v1663_v61 }
0x102d   :  { %3862 = vmatprep.mubr.msk.f32.mxu1 %vm690_vm5, %v1664_v1  ;;  %3890 = vmatprep.mubr.msk.f32.mxu0 %vm690_vm5, %v1664_v1 }
0x102e   :  { %4218 = vmatpush1.bf16.msra.mxu1 %v5354_v60  ;;  %4234 = vmatpush1.bf16.msra.mxu0 %v5354_v60 }
0x102f   :  { %4220 = vmatprep.subr.bf16.mxu1 %v5358_v62  ;;  %4236 = vmatprep.subr.bf16.mxu0 %v5358_v62 }
0x1030   :  { %3863 = vmatmul.mubr.msk.f32.gmra.mrb[34].mxu1 %vm690_vm5, %v1665_v4  ;;  %3891 = vmatmul.mubr.msk.f32.gmra.mrb[34].mxu0 %vm690_vm5, %v1665_v4 }
0x1031   :  { %3865 = vmatprep.mubr.msk.f32.mxu1 %vm690_vm5, %v1666_v17  ;;  %3893 = vmatprep.mubr.msk.f32.mxu0 %vm690_vm5, %v1666_v17 }
0x1032   :  { %4222 = vmatpush1.bf16.msra.mxu1 %v5377_v3  ;;  %4238 = vmatpush1.bf16.msra.mxu0 %v5377_v3 }
0x1033   :  { %4224 = vmatprep.subr.bf16.mxu1 %v5381_v52  ;;  %4240 = vmatprep.subr.bf16.mxu0 %v5381_v52 }
0x1034   :  { %3866 = vmatmul.mubr.msk.f32.gmra.mrb[36].mxu1 %vm690_vm5, %v1667_v49  ;;  %3894 = vmatmul.mubr.msk.f32.gmra.mrb[36].mxu0 %vm690_vm5, %v1667_v49 }
0x1035   :  { %3868 = vmatprep.mubr.msk.f32.mxu1 %vm690_vm5, %v1668_v38  ;;  %3896 = vmatprep.mubr.msk.f32.mxu0 %vm690_vm5, %v1668_v38  ;;  %v5487_v38 = vld [vmem:[%s5768_s13] ss:$0 sm:$0xff] }
0x1036   :  { %4226 = vmatpush1.bf16.msra.mxu1 %v5401_v18  ;;  %4242 = vmatpush1.bf16.msra.mxu0 %v5401_v18 }
0x1037   :  { %4228 = vmatprep.subr.bf16.mxu1 %v5405_v27  ;;  %4244 = vmatprep.subr.bf16.mxu0 %v5405_v27 }
0x1038   :  { %3869 = vmatmul.mubr.msk.f32.gmra.mrb[38].mxu1 %vm690_vm5, %v1669_v45  ;;  %3897 = vmatmul.mubr.msk.f32.gmra.mrb[38].mxu0 %vm690_vm5, %v1669_v45 }
0x1039   :  { %2066 = vmatprep.mubr.f32.mxu1 %v4478_v26  ;;  %2196 = vmatprep.mubr.f32.mxu0 %v4478_v26 }
0x103a   :  { %4230 = vmatpush1.bf16.msra.mxu1 %v5419_v39  ;;  %4246 = vmatpush1.bf16.msra.mxu0 %v5419_v39 }
0x103b   :  { %4248 = vmatprep.subr.bf16.mxu1 %v5332_v11  ;;  %4264 = vmatprep.subr.bf16.mxu0 %v5332_v11 }
0x103d   :  { %3539 = vmatmul.mubr.msk.f32.vlgmr.msra.gmra.mrb[40].mxu1 %vm690_vm5, %v5433_v51 }
0x103e   :  { %4250 = vmatpush1.bf16.msra.mxu1 %v5354_v60  ;;  %2317 = vmatprep.mubr.f32.mxu1 %v4478_v26 }
0x103f   :  { %4252 = vmatprep.subr.bf16.mxu1 %v5358_v62 }
0x1042   :  { %4254 = vmatpush1.bf16.msra.mxu1 %v5377_v3 }
0x1043   :  { %4256 = vmatprep.subr.bf16.mxu1 %v5381_v52 }
0x1046   :  { %4258 = vmatpush1.bf16.msra.mxu1 %v5401_v18 }
0x1047   :  { %4260 = vmatprep.subr.bf16.mxu1 %v5405_v27 }
0x104a   :  { %4262 = vmatpush1.bf16.msra.mxu1 %v5419_v39 }
0x104b   :  { %4280 = vmatprep.subr.bf16.mxu1 %v5332_v11 }
0x10ff   :  { %v3861_v28 = vpop.f32.mrb[32].mxu1  ;;  %v3889_v9 = vpop.f32.mrb[32].mxu0 }
0x1100   :  { %v1781_v21 = vadd.f32 %v3861_v28, %v3519_v16  ;;  %v1909_v23 = vadd.f32 %v3889_v9, %v3528_v20  ;;  %v1775_v24 = vpop.f32.mrb[33].mxu1  ;;  %v1903_v25 = vpop.f32.mrb[33].mxu0 }
0x1101   :  { %v1776_v30 = vadd.f32 %v3519_v16, %v1775_v24  ;;  %v1904_v31 = vadd.f32 %v3528_v20, %v1903_v25 }
0x1102   :  { %1815 = vst.msk [vmem:[#allocation2 + $0x8] sm:$0xff] %vm375_vm6, %v1781_v21  ;;  %1943 = vst.msk [vmem:[#allocation3 + $0x8] sm:$0xff] %vm375_vm6, %v1909_v23 }
0x1103   :  { %1814 = vst.msk [vmem:[#allocation2] sm:$0xff] %vm375_vm6, %v1776_v30  ;;  %1942 = vst.msk [vmem:[#allocation3] sm:$0xff] %vm375_vm6, %v1904_v31  ;;  %v3864_v32 = vpop.f32.mrb[34].mxu1  ;;  %v3892_v34 = vpop.f32.mrb[34].mxu0 }
0x1104   :  { %v1791_v35 = vadd.f32 %v3864_v32, %v3519_v16  ;;  %v1919_v36 = vadd.f32 %v3892_v34, %v3528_v20  ;;  %v1785_v40 = vpop.f32.mrb[35].mxu1  ;;  %v1913_v41 = vpop.f32.mrb[35].mxu0 }
0x1105   :  { %v1786_v42 = vadd.f32 %v3519_v16, %v1785_v40  ;;  %v1914_v44 = vadd.f32 %v3528_v20, %v1913_v41 }
0x1106   :  { %1817 = vst.msk [vmem:[#allocation2 + $0x18] sm:$0xff] %vm375_vm6, %v1791_v35  ;;  %1945 = vst.msk [vmem:[#allocation3 + $0x18] sm:$0xff] %vm375_vm6, %v1919_v36 }
0x1107   :  { %1816 = vst.msk [vmem:[#allocation2 + $0x10] sm:$0xff] %vm375_vm6, %v1786_v42  ;;  %1944 = vst.msk [vmem:[#allocation3 + $0x10] sm:$0xff] %vm375_vm6, %v1914_v44  ;;  %v3867_v46 = vpop.f32.mrb[36].mxu1  ;;  %v3895_v43 = vpop.f32.mrb[36].mxu0 }
0x1108   :  { %v1801_v6 = vadd.f32 %v3867_v46, %v3519_v16  ;;  %v1929_v19 = vadd.f32 %v3895_v43, %v3528_v20  ;;  %v1795_v22 = vpop.f32.mrb[37].mxu1  ;;  %v1923_v12 = vpop.f32.mrb[37].mxu0 }
0x1109   :  { %v1796_v33 = vadd.f32 %v3519_v16, %v1795_v22  ;;  %v1924_v48 = vadd.f32 %v3528_v20, %v1923_v12  ;;  %v2107_v32 = vld [vmem:[#allocation2 + $0x8] sm:$0xff] }
0x110a   :  { %1819 = vst.msk [vmem:[#allocation2 + $0x28] sm:$0xff] %vm375_vm6, %v1801_v6  ;;  %1947 = vst.msk [vmem:[#allocation3 + $0x28] sm:$0xff] %vm375_vm6, %v1929_v19  ;;  %v1976_v53 = vld [vmem:[#allocation2] sm:$0xff] }
0x110b   :  { %1818 = vst.msk [vmem:[#allocation2 + $0x20] sm:$0xff] %vm375_vm6, %v1796_v33  ;;  %1946 = vst.msk [vmem:[#allocation3 + $0x20] sm:$0xff] %vm375_vm6, %v1924_v48  ;;  %1983 = vrot.lane.b32.xlu0 %v1976_v53, %s4477_s2  ;;  %v3870_v54 = vpop.f32.mrb[38].mxu1  ;;  %v3898_v55 = vpop.f32.mrb[38].mxu0 }
0x110c   :  { %v1811_v56 = vadd.f32 %v3870_v54, %v3519_v16  ;;  %v1939_v47 = vadd.f32 %v3898_v55, %v3528_v20  ;;  %v1805_v57 = vpop.f32.mrb[39].mxu1  ;;  %v1933_v58 = vpop.f32.mrb[39].mxu0 }
0x110d   :  { %v1806_v59 = vadd.f32 %v3519_v16, %v1805_v57  ;;  %v1934_v61 = vadd.f32 %v3528_v20, %v1933_v58 }
0x110e   :  { %1821 = vst.msk [vmem:[#allocation2 + $0x38] sm:$0xff] %vm375_vm6, %v1811_v56  ;;  %1949 = vst.msk [vmem:[#allocation3 + $0x38] sm:$0xff] %vm375_vm6, %v1939_v47 }
0x110f   :  { %1820 = vst.msk [vmem:[#allocation2 + $0x30] sm:$0xff] %vm375_vm6, %v1806_v59  ;;  %1948 = vst.msk [vmem:[#allocation3 + $0x30] sm:$0xff] %vm375_vm6, %v1934_v61  ;;  %1992 = vrot.lane.b32.xlu0 %v1976_v53, %s4479_s5 }
0x1110   :  { %v2068_v63 = vpop.f32.mrb[40].mxu1 }
0x1111   :  { %v2070_v0 = vpop.f32.mrb[41].mxu1  ;;  %v2229_v58 = vld [vmem:[#allocation3 + $0x28] sm:$0xff] }
0x1112   :  { %v2086_v45 = vadd.f32 %v5487_v38, %v2070_v0 }
0x1115   :  { %v1977_v1 = vld [vmem:[#allocation3 + $0x38] sm:$0xff] }
0x1116   :  { %1979 = vrot.lane.b32.xlu1 %v1977_v1, %s4477_s2  ;;  %v2108_v50 = vld [vmem:[#allocation3 + $0x30] sm:$0xff] }
0x111a   :  { %1986 = vrot.lane.b32.xlu1 %v1977_v1, %s4479_s5 }
0x111e   :  { %1995 = vrot.lane.b32.xlu1 %v1977_v1, %s4480_s4 }
0x1122   :  { %2096 = vrot.lane.b32.xlu1 %v5433_v51, %s4479_s5 }
0x1126   :  { %2110 = vrot.lane.b32.xlu1 %v2108_v50, %s4477_s2 }
0x112a   :  { %2117 = vrot.lane.b32.xlu1 %v2108_v50, %s4479_s5 }
0x112e   :  { %2126 = vrot.lane.b32.xlu1 %v2108_v50, %s4480_s4  ;;  %v2228_v50 = vld [vmem:[#allocation2 + $0x10] sm:$0xff] }
0x117d   :  { %v1984_v5 = vpop.permute.xlu0 %1983 }
0x1181   :  { %v1993_v51 = vpop.permute.xlu0 %1992 }
0x1188   :  { %v1980_v2 = vpop.permute.xlu1 %1979 }
0x1189   :  { %v1989_v4 = vsel %vm674_vm4, %v1976_v53, %v1980_v2 }
0x118a   :  { %v1990_v17 = vsel %vm690_vm5, %v1989_v4, %v1984_v5 }
0x118c   :  { %v1987_v7 = vpop.permute.xlu1 %1986 }
0x118d   :  { %v1991_v8 = vsel %vm375_vm6, %v1990_v17, %v1987_v7 }
0x118e   :  { %v2073_v10 = vadd.f32 %v2068_v63, %v1991_v8 }
0x1190   :  { %v3540_v49 = vmul.f32 -1.442695, %v2073_v10  ;;  %v1996_v14 = vpop.permute.xlu1 %1995 }
0x1191   :  { %v1998_v20 = vsel %vm674_vm4, %v1993_v51, %v1996_v14 }
0x1192   :  { %4428 = vpow2.f32 %v3540_v49 }
0x1194   :  { %v2097_v23 = vpop.permute.xlu1 %2096 }
0x1198   :  { %v2111_v35 = vpop.permute.xlu1 %2110 }
0x1199   :  { %v2120_v40 = vsel %vm674_vm4, %v2107_v32, %v2111_v35 }
0x119c   :  { %v4429_v13 = vpop.eup %4428  ;;  %v2118_v42 = vpop.permute.xlu1 %2117 }
0x119d   :  { %v2077_v29 = vadd.f32 1.0, %v4429_v13 }
0x119f   :  { %4430 = vrcp.f32 %v2077_v29 }
0x11a0   :  { %v2127_v54 = vpop.permute.xlu1 %2126 }
0x11a9   :  { %v4431_v15 = vpop.eup %4430 }
0x11aa   :  { %v2087_v16 = vmul.f32 %v4431_v15, %v2086_v45  ;;  %v2090_v21 = vsub.f32 1.0, %v4431_v15  ;;  %v2099_v25 = vmul.f32 %v4431_v15, %v2097_v23 }
0x11ac   :  { %v2088_v28 = vadd.f32 %v2087_v16, %v1998_v20 }
0x11ae   :  { %4432 = vtanh.f32 %v2088_v28 }
0x11b8   :  { %v4433_v9 = vpop.eup %4432 }
0x11b9   :  { %2092 = vrot.lane.b32.xlu0 %v4433_v9, %s4479_s5 }
0x122b   :  { %v2093_v24 = vpop.permute.xlu0 %2092 }
0x122c   :  { %v2095_v30 = vmul.f32 %v2093_v24, %v2090_v21 }
0x122e   :  { %v2100_v31 = vadd.f32 %v2099_v25, %v2095_v30  ;;  %v2350_v25 = vld [vmem:[#allocation3 + $0x20] sm:$0xff] }
0x1230   :  { %2102 = vrot.lane.b32.xlu0 %v2100_v31, %s4479_s5 }
0x1234   :  { %2114 = vrot.lane.b32.xlu0 %v2107_v32, %s4477_s2 }
0x1238   :  { %2123 = vrot.lane.b32.xlu0 %v2107_v32, %s4479_s5 }
0x12a2   :  { %v2103_v34 = vpop.permute.xlu0 %2102 }
0x12a3   :  { %2105 = vst.msk [vmem:[#allocation4] sm:$0xff] %vm674_vm4, %v2103_v34  ;;  %3542 = vmatmul.mubr.msk.f32.vlgmr.msra.gmra.mrb[40].mxu0 %vm690_vm5, %v2103_v34 }
0x12a4   :  { %2106 = vst.msk [vmem:[#allocation4 + $0x38] sm:$0xff] %vm807_vm7, %v2103_v34  ;;  %4266 = vmatpush1.bf16.msra.mxu0 %v5354_v60  ;;  %2438 = vmatprep.mubr.f32.mxu0 %v4478_v26 }
0x12a5   :  { %4268 = vmatprep.subr.bf16.mxu0 %v5358_v62 }
0x12a6   :  { %v2115_v36 = vpop.permute.xlu0 %2114 }
0x12a7   :  { %v2121_v41 = vsel %vm690_vm5, %v2120_v40, %v2115_v36  ;;  %v2349_v36 = vld [vmem:[#allocation2 + $0x18] sm:$0xff] }
0x12a8   :  { %4270 = vmatpush1.bf16.msra.mxu0 %v5377_v3  ;;  %v2122_v44 = vsel %vm375_vm6, %v2121_v41, %v2118_v42 }
0x12a9   :  { %4272 = vmatprep.subr.bf16.mxu0 %v5381_v52 }
0x12aa   :  { %v2124_v33 = vpop.permute.xlu0 %2123 }
0x12ab   :  { %v2129_v56 = vsel %vm674_vm4, %v2124_v33, %v2127_v54 }
0x12ac   :  { %4274 = vmatpush1.bf16.msra.mxu0 %v5401_v18 }
0x12ad   :  { %4276 = vmatprep.subr.bf16.mxu0 %v5405_v27 }
0x12b0   :  { %4278 = vmatpush1.bf16.msra.mxu0 %v5419_v39 }
0x12b1   :  { %4296 = vmatprep.subr.bf16.mxu0 %v5332_v11 }
0x1376   :  { %v2198_v46 = vpop.f32.mrb[40].mxu0 }
0x1377   :  { %v2203_v43 = vadd.f32 %v2198_v46, %v2122_v44  ;;  %v2200_v6 = vpop.f32.mrb[41].mxu0 }
0x1378   :  { %v2210_v48 = vadd.f32 %v5487_v38, %v2200_v6 }
0x1379   :  { %v3543_v19 = vmul.f32 -1.442695, %v2203_v43 }
0x137b   :  { %4434 = vpow2.f32 %v3543_v19 }
0x1385   :  { %v4435_v22 = vpop.eup %4434 }
0x1386   :  { %v2207_v12 = vadd.f32 1.0, %v4435_v22 }
0x1388   :  { %4436 = vrcp.f32 %v2207_v12 }
0x1392   :  { %v4437_v53 = vpop.eup %4436 }
0x1393   :  { %v2211_v55 = vmul.f32 %v4437_v53, %v2210_v48  ;;  %v2214_v59 = vsub.f32 1.0, %v4437_v53  ;;  %v2220_v63 = vmul.f32 %v4437_v53, %v2100_v31 }
0x1395   :  { %v2212_v47 = vadd.f32 %v2211_v55, %v2129_v56 }
0x1397   :  { %4438 = vtanh.f32 %v2212_v47 }
0x13a1   :  { %v4439_v57 = vpop.eup %4438 }
0x13a2   :  { %2216 = vrot.lane.b32.xlu0 %v4439_v57, %s4479_s5 }
0x13a6   :  { %2231 = vrot.lane.b32.xlu0 %v2229_v58, %s4477_s2 }
0x13aa   :  { %2238 = vrot.lane.b32.xlu0 %v2229_v58, %s4479_s5 }
0x13ae   :  { %2247 = vrot.lane.b32.xlu0 %v2229_v58, %s4480_s4 }
0x1414   :  { %v2217_v61 = vpop.permute.xlu0 %2216 }
0x1415   :  { %v2219_v0 = vmul.f32 %v2217_v61, %v2214_v59  ;;  %v2471_v61 = vld [vmem:[#allocation3 + $0x18] sm:$0xff] }
0x1417   :  { %v2221_v1 = vadd.f32 %v2220_v63, %v2219_v0 }
0x1418   :  { %v2232_v4 = vpop.permute.xlu0 %2231 }
0x1419   :  { %2223 = vrot.lane.b32.xlu1 %v2221_v1, %s4479_s5  ;;  %v2241_v7 = vsel %vm674_vm4, %v2228_v50, %v2232_v4  ;;  %v2470_v4 = vld [vmem:[#allocation2 + $0x20] sm:$0xff] }
0x141c   :  { %v2239_v8 = vpop.permute.xlu0 %2238 }
0x141d   :  { %2235 = vrot.lane.b32.xlu1 %v2228_v50, %s4477_s2 }
0x1420   :  { %v2248_v28 = vpop.permute.xlu0 %2247 }
0x1421   :  { %2244 = vrot.lane.b32.xlu1 %v2228_v50, %s4479_s5 }
0x148b   :  { %v2224_v2 = vpop.permute.xlu1 %2223 }
0x148c   :  { %2226 = vst.msk [vmem:[#allocation4 + $0x8] sm:$0xff] %vm674_vm4, %v2224_v2  ;;  %3544 = vmatmul.mubr.msk.f32.vlgmr.msra.gmra.mrb[42].mxu1 %vm690_vm5, %v2224_v2 }
0x148d   :  { %2227 = vst.msk [vmem:[#allocation4 + $0x30] sm:$0xff] %vm807_vm7, %v2224_v2  ;;  %4282 = vmatpush1.bf16.msra.mxu1 %v5354_v60  ;;  %2559 = vmatprep.mubr.f32.mxu1 %v4478_v26 }
0x148e   :  { %4284 = vmatprep.subr.bf16.mxu1 %v5358_v62 }
0x148f   :  { %v2236_v5 = vpop.permute.xlu1 %2235 }
0x1490   :  { %v2242_v17 = vsel %vm690_vm5, %v2241_v7, %v2236_v5 }
0x1491   :  { %4286 = vmatpush1.bf16.msra.mxu1 %v5377_v3  ;;  %v2243_v10 = vsel %vm375_vm6, %v2242_v17, %v2239_v8 }
0x1492   :  { %4288 = vmatprep.subr.bf16.mxu1 %v5381_v52 }
0x1493   :  { %v2245_v51 = vpop.permute.xlu1 %2244 }
0x1494   :  { %v2250_v21 = vsel %vm674_vm4, %v2245_v51, %v2248_v28 }
0x1495   :  { %4290 = vmatpush1.bf16.msra.mxu1 %v5401_v18 }
0x1496   :  { %4292 = vmatprep.subr.bf16.mxu1 %v5405_v27 }
0x1499   :  { %4294 = vmatpush1.bf16.msra.mxu1 %v5419_v39 }
0x149a   :  { %4312 = vmatprep.subr.bf16.mxu1 %v5332_v11 }
0x155f   :  { %v2319_v49 = vpop.f32.mrb[42].mxu1 }
0x1560   :  { %v2324_v13 = vadd.f32 %v2319_v49, %v2243_v10  ;;  %v2321_v29 = vpop.f32.mrb[43].mxu1 }
0x1561   :  { %v2331_v16 = vadd.f32 %v5487_v38, %v2321_v29 }
0x1562   :  { %v3545_v45 = vmul.f32 -1.442695, %v2324_v13 }
0x1564   :  { %4440 = vpow2.f32 %v3545_v45 }
0x156e   :  { %v4441_v14 = vpop.eup %4440 }
0x156f   :  { %v2328_v15 = vadd.f32 1.0, %v4441_v14 }
0x1571   :  { %4442 = vrcp.f32 %v2328_v15 }
0x157b   :  { %v4443_v20 = vpop.eup %4442 }
0x157c   :  { %v2332_v9 = vmul.f32 %v4443_v20, %v2331_v16  ;;  %v2335_v30 = vsub.f32 1.0, %v4443_v20  ;;  %v2341_v32 = vmul.f32 %v4443_v20, %v2221_v1 }
0x157e   :  { %v2333_v23 = vadd.f32 %v2332_v9, %v2250_v21 }
0x1580   :  { %4444 = vtanh.f32 %v2333_v23 }
0x158a   :  { %v4445_v24 = vpop.eup %4444 }
0x158b   :  { %2337 = vrot.lane.b32.xlu1 %v4445_v24, %s4479_s5 }
0x158f   :  { %2352 = vrot.lane.b32.xlu1 %v2350_v25, %s4477_s2 }
0x1593   :  { %2359 = vrot.lane.b32.xlu1 %v2350_v25, %s4479_s5 }
0x1597   :  { %2368 = vrot.lane.b32.xlu1 %v2350_v25, %s4480_s4 }
0x15fd   :  { %v2338_v31 = vpop.permute.xlu1 %2337 }
0x15fe   :  { %v2340_v34 = vmul.f32 %v2338_v31, %v2335_v30  ;;  %v2592_v31 = vld [vmem:[#allocation3 + $0x10] sm:$0xff] }
0x1600   :  { %v2342_v35 = vadd.f32 %v2341_v32, %v2340_v34 }
0x1601   :  { %v2353_v41 = vpop.permute.xlu1 %2352 }
0x1602   :  { %2344 = vrot.lane.b32.xlu0 %v2342_v35, %s4479_s5  ;;  %v2362_v44 = vsel %vm674_vm4, %v2349_v36, %v2353_v41  ;;  %v2591_v41 = vld [vmem:[#allocation2 + $0x28] sm:$0xff] }
0x1605   :  { %v2360_v43 = vpop.permute.xlu1 %2359 }
0x1606   :  { %2356 = vrot.lane.b32.xlu0 %v2349_v36, %s4477_s2 }
0x1609   :  { %v2369_v56 = vpop.permute.xlu1 %2368 }
0x160a   :  { %2365 = vrot.lane.b32.xlu0 %v2349_v36, %s4479_s5 }
0x1674   :  { %v2345_v40 = vpop.permute.xlu0 %2344 }
0x1675   :  { %2347 = vst.msk [vmem:[#allocation4 + $0x10] sm:$0xff] %vm674_vm4, %v2345_v40  ;;  %3546 = vmatmul.mubr.msk.f32.vlgmr.msra.gmra.mrb[42].mxu0 %vm690_vm5, %v2345_v40 }
0x1676   :  { %2348 = vst.msk [vmem:[#allocation4 + $0x28] sm:$0xff] %vm807_vm7, %v2345_v40  ;;  %4298 = vmatpush1.bf16.msra.mxu0 %v5354_v60  ;;  %2680 = vmatprep.mubr.f32.mxu0 %v4478_v26 }
0x1677   :  { %4300 = vmatprep.subr.bf16.mxu0 %v5358_v62 }
0x1678   :  { %v2357_v42 = vpop.permute.xlu0 %2356 }
0x1679   :  { %v2363_v46 = vsel %vm690_vm5, %v2362_v44, %v2357_v42 }
0x167a   :  { %4302 = vmatpush1.bf16.msra.mxu0 %v5377_v3  ;;  %v2364_v6 = vsel %vm375_vm6, %v2363_v46, %v2360_v43 }
0x167b   :  { %4304 = vmatprep.subr.bf16.mxu0 %v5381_v52 }
0x167c   :  { %v2366_v54 = vpop.permute.xlu0 %2365 }
0x167d   :  { %v2371_v57 = vsel %vm674_vm4, %v2366_v54, %v2369_v56 }
0x167e   :  { %4306 = vmatpush1.bf16.msra.mxu0 %v5401_v18 }
0x167f   :  { %4308 = vmatprep.subr.bf16.mxu0 %v5405_v27 }
0x1682   :  { %4310 = vmatpush1.bf16.msra.mxu0 %v5419_v39 }
0x1683   :  { %4328 = vmatprep.subr.bf16.mxu0 %v5332_v11 }
0x1748   :  { %v2440_v19 = vpop.f32.mrb[42].mxu0 }
0x1749   :  { %v2445_v22 = vadd.f32 %v2440_v19, %v2364_v6  ;;  %v2442_v12 = vpop.f32.mrb[43].mxu0 }
0x174a   :  { %v2452_v11 = vadd.f32 %v5487_v38, %v2442_v12 }
0x174b   :  { %v3547_v33 = vmul.f32 -1.442695, %v2445_v22 }
0x174d   :  { %4446 = vpow2.f32 %v3547_v33 }
0x1757   :  { %v4447_v48 = vpop.eup %4446 }
0x1758   :  { %v2449_v53 = vadd.f32 1.0, %v4447_v48 }
0x175a   :  { %4448 = vrcp.f32 %v2449_v53 }
0x1764   :  { %v4449_v55 = vpop.eup %4448 }
0x1765   :  { %v2453_v47 = vmul.f32 %v4449_v55, %v2452_v11  ;;  %v2456_v63 = vsub.f32 1.0, %v4449_v55  ;;  %v2462_v1 = vmul.f32 %v4449_v55, %v2342_v35  ;;  %v2713_v55 = vld [vmem:[#allocation3 + $0x8] sm:$0xff] }
0x1767   :  { %v2454_v58 = vadd.f32 %v2453_v47, %v2371_v57 }
0x1769   :  { %4450 = vtanh.f32 %v2454_v58 }
0x1773   :  { %v4451_v59 = vpop.eup %4450 }
0x1774   :  { %2458 = vrot.lane.b32.xlu0 %v4451_v59, %s4479_s5 }
0x1778   :  { %2473 = vrot.lane.b32.xlu0 %v2471_v61, %s4477_s2 }
0x177c   :  { %2480 = vrot.lane.b32.xlu0 %v2471_v61, %s4479_s5 }
0x1780   :  { %2489 = vrot.lane.b32.xlu0 %v2471_v61, %s4480_s4  ;;  %v2712_v61 = vld [vmem:[#allocation2 + $0x30] sm:$0xff] }
0x17e6   :  { %v2459_v0 = vpop.permute.xlu0 %2458 }
0x17e7   :  { %v2461_v50 = vmul.f32 %v2459_v0, %v2456_v63 }
0x17e9   :  { %v2463_v2 = vadd.f32 %v2462_v1, %v2461_v50 }
0x17ea   :  { %v2474_v7 = vpop.permute.xlu0 %2473 }
0x17eb   :  { %2465 = vrot.lane.b32.xlu1 %v2463_v2, %s4479_s5  ;;  %v2483_v8 = vsel %vm674_vm4, %v2470_v4, %v2474_v7 }
0x17ee   :  { %v2481_v49 = vpop.permute.xlu0 %2480 }
0x17ef   :  { %2477 = vrot.lane.b32.xlu1 %v2470_v4, %s4477_s2 }
0x17f2   :  { %v2490_v21 = vpop.permute.xlu0 %2489 }
0x17f3   :  { %2486 = vrot.lane.b32.xlu1 %v2470_v4, %s4479_s5 }
0x185d   :  { %v2466_v5 = vpop.permute.xlu1 %2465 }
0x185e   :  { %2468 = vst.msk [vmem:[#allocation4 + $0x18] sm:$0xff] %vm674_vm4, %v2466_v5  ;;  %3548 = vmatmul.mubr.msk.f32.vlgmr.msra.gmra.mrb[44].mxu1 %vm690_vm5, %v2466_v5 }
0x185f   :  { %2469 = vst.msk [vmem:[#allocation4 + $0x20] sm:$0xff] %vm807_vm7, %v2466_v5  ;;  %4314 = vmatpush1.bf16.msra.mxu1 %v5354_v60  ;;  %2801 = vmatprep.mubr.f32.mxu1 %v4478_v26 }
0x1860   :  { %4316 = vmatprep.subr.bf16.mxu1 %v5358_v62 }
0x1861   :  { %v2478_v17 = vpop.permute.xlu1 %2477 }
0x1862   :  { %v2484_v10 = vsel %vm690_vm5, %v2483_v8, %v2478_v17 }
0x1863   :  { %4318 = vmatpush1.bf16.msra.mxu1 %v5377_v3  ;;  %v2485_v13 = vsel %vm375_vm6, %v2484_v10, %v2481_v49 }
0x1864   :  { %4320 = vmatprep.subr.bf16.mxu1 %v5381_v52 }
0x1865   :  { %v2487_v20 = vpop.permute.xlu1 %2486 }
0x1866   :  { %v2492_v24 = vsel %vm674_vm4, %v2487_v20, %v2490_v21 }
0x1867   :  { %4322 = vmatpush1.bf16.msra.mxu1 %v5401_v18 }
0x1868   :  { %4324 = vmatprep.subr.bf16.mxu1 %v5405_v27 }
0x186b   :  { %4326 = vmatpush1.bf16.msra.mxu1 %v5419_v39 }
0x1931   :  { %v2561_v29 = vpop.f32.mrb[44].mxu1 }
0x1932   :  { %v2566_v45 = vadd.f32 %v2561_v29, %v2485_v13  ;;  %v2563_v14 = vpop.f32.mrb[45].mxu1 }
0x1933   :  { %v2573_v28 = vadd.f32 %v5487_v38, %v2563_v14 }
0x1934   :  { %v3549_v15 = vmul.f32 -1.442695, %v2566_v45 }
0x1936   :  { %4452 = vpow2.f32 %v3549_v15 }
0x1940   :  { %v4453_v51 = vpop.eup %4452 }
0x1941   :  { %v2570_v16 = vadd.f32 1.0, %v4453_v51 }
0x1943   :  { %4454 = vrcp.f32 %v2570_v16 }
0x194d   :  { %v4455_v9 = vpop.eup %4454 }
0x194e   :  { %v2574_v23 = vmul.f32 %v4455_v9, %v2573_v28  ;;  %v2577_v32 = vsub.f32 1.0, %v4455_v9  ;;  %v2583_v35 = vmul.f32 %v4455_v9, %v2463_v2  ;;  %v2834_v9 = vld [vmem:[#allocation3] sm:$0xff] }
0x1950   :  { %v2575_v25 = vadd.f32 %v2574_v23, %v2492_v24 }
0x1952   :  { %4456 = vtanh.f32 %v2575_v25 }
0x195c   :  { %v4457_v30 = vpop.eup %4456 }
0x195d   :  { %2579 = vrot.lane.b32.xlu1 %v4457_v30, %s4479_s5 }
0x1961   :  { %2594 = vrot.lane.b32.xlu1 %v2592_v31, %s4477_s2 }
0x1965   :  { %2601 = vrot.lane.b32.xlu1 %v2592_v31, %s4479_s5 }
0x1969   :  { %2610 = vrot.lane.b32.xlu1 %v2592_v31, %s4480_s4  ;;  %v2833_v31 = vld [vmem:[#allocation2 + $0x38] sm:$0xff] }
0x19cf   :  { %v2580_v34 = vpop.permute.xlu1 %2579 }
0x19d0   :  { %v2582_v36 = vmul.f32 %v2580_v34, %v2577_v32 }
0x19d2   :  { %v2584_v40 = vadd.f32 %v2583_v35, %v2582_v36 }
0x19d3   :  { %v2595_v44 = vpop.permute.xlu1 %2594 }
0x19d4   :  { %2586 = vrot.lane.b32.xlu0 %v2584_v40, %s4479_s5  ;;  %v2604_v43 = vsel %vm674_vm4, %v2591_v41, %v2595_v44 }
0x19d7   :  { %v2602_v6 = vpop.permute.xlu1 %2601 }
0x19d8   :  { %2598 = vrot.lane.b32.xlu0 %v2591_v41, %s4477_s2 }
0x19db   :  { %v2611_v33 = vpop.permute.xlu1 %2610 }
0x19dc   :  { %2607 = vrot.lane.b32.xlu0 %v2591_v41, %s4479_s5 }
0x1a46   :  { %v2587_v42 = vpop.permute.xlu0 %2586 }
0x1a47   :  { %2589 = vst.msk [vmem:[#allocation4 + $0x20] sm:$0xff] %vm674_vm4, %v2587_v42  ;;  %3550 = vmatmul.mubr.msk.f32.vlgmr.msra.gmra.mrb[44].mxu0 %vm690_vm5, %v2587_v42 }
0x1a48   :  { %2590 = vst.msk [vmem:[#allocation4 + $0x18] sm:$0xff] %vm807_vm7, %v2587_v42  ;;  %4330 = vmatpush1.bf16.msra.mxu0 %v5354_v60  ;;  %2922 = vmatprep.mubr.f32.mxu0 %v4478_v26 }
0x1a49   :  { %4332 = vmatprep.subr.bf16.mxu0 %v5358_v62 }
0x1a4a   :  { %v2599_v46 = vpop.permute.xlu0 %2598 }
0x1a4b   :  { %v2605_v60 = vsel %vm690_vm5, %v2604_v43, %v2599_v46 }
0x1a4c   :  { %4334 = vmatpush1.bf16.msra.mxu0 %v5377_v3  ;;  %v2606_v26 = vsel %vm375_vm6, %v2605_v60, %v2602_v6 }
0x1a4d   :  { %4336 = vmatprep.subr.bf16.mxu0 %v5381_v52 }
0x1a50   :  { %4338 = vmatpush1.bf16.msra.mxu0 %v5401_v18 }
0x1a51   :  { %4340 = vmatprep.subr.bf16.mxu0 %v5405_v27  ;;  %v2608_v27 = vpop.permute.xlu0 %2607 }
0x1a52   :  { %v2613_v53 = vsel %vm674_vm4, %v2608_v27, %v2611_v33 }
0x1a54   :  { %4342 = vmatpush1.bf16.msra.mxu0 %v5419_v39 }
0x1b1a   :  { %v2682_v62 = vpop.f32.mrb[44].mxu0 }
0x1b1b   :  { %v2687_v19 = vadd.f32 %v2682_v62, %v2606_v26  ;;  %v2684_v3 = vpop.f32.mrb[45].mxu0 }
0x1b1c   :  { %v2694_v39 = vadd.f32 %v5487_v38, %v2684_v3 }
0x1b1d   :  { %v3551_v22 = vmul.f32 -1.442695, %v2687_v19 }
0x1b1f   :  { %4458 = vpow2.f32 %v3551_v22 }
0x1b29   :  { %v4459_v52 = vpop.eup %4458 }
0x1b2a   :  { %v2691_v18 = vadd.f32 1.0, %v4459_v52 }
0x1b2c   :  { %4460 = vrcp.f32 %v2691_v18 }
0x1b36   :  { %v4461_v12 = vpop.eup %4460 }
0x1b37   :  { %v2695_v48 = vmul.f32 %v4461_v12, %v2694_v39  ;;  %v2698_v56 = vsub.f32 1.0, %v4461_v12  ;;  %v2704_v57 = vmul.f32 %v4461_v12, %v2584_v40  ;;  %v2993_v39 = vld [vmem:[%s5769_s14] sm:$0xff]  ;;  %v2994_v12 = vld [vmem:[%s5769_s14 + $0x8] sm:$0xff] }
0x1b38   :  { %v4343_v33 = vpack.c.bf16 %v2994_v12, %v2993_v39 }
0x1b39   :  { %v2696_v54 = vadd.f32 %v2695_v48, %v2613_v53  ;;  %v2996_v53 = vld [vmem:[%s5769_s14 + $0x18] sm:$0xff] }
0x1b3a   :  { %4344 = vmatprep.subr.bf16.mxu1 %v4343_v33 }
0x1b3b   :  { %4462 = vtanh.f32 %v2696_v54 }
0x1b45   :  { %v4463_v11 = vpop.eup %4462 }
0x1b46   :  { %2700 = vrot.lane.b32.xlu0 %v4463_v11, %s4479_s5  ;;  %v2997_v11 = vld [vmem:[%s5769_s14 + $0x20] sm:$0xff] }
0x1b4a   :  { %2715 = vrot.lane.b32.xlu0 %v2713_v55, %s4477_s2 }
0x1b4e   :  { %2722 = vrot.lane.b32.xlu0 %v2713_v55, %s4479_s5 }
0x1b52   :  { %2731 = vrot.lane.b32.xlu0 %v2713_v55, %s4480_s4  ;;  %v2998_v55 = vld [vmem:[%s5769_s14 + $0x28] sm:$0xff] }
0x1bb8   :  { %v2701_v47 = vpop.permute.xlu0 %2700 }
0x1bb9   :  { %v2703_v58 = vmul.f32 %v2701_v47, %v2698_v56  ;;  %v2999_v56 = vld [vmem:[%s5769_s14 + $0x30] sm:$0xff]  ;;  %v3000_v47 = vld [vmem:[%s5769_s14 + $0x38] sm:$0xff] }
0x1bbb   :  { %v2705_v59 = vadd.f32 %v2704_v57, %v2703_v58  ;;  %v4355_v57 = vpack.c.bf16 %v3000_v47, %v2999_v56 }
0x1bbc   :  { %v2716_v0 = vpop.permute.xlu0 %2715 }
0x1bbd   :  { %2707 = vrot.lane.b32.xlu1 %v2705_v59, %s4479_s5  ;;  %v2725_v50 = vsel %vm674_vm4, %v2712_v61, %v2716_v0 }
0x1bc0   :  { %v2723_v4 = vpop.permute.xlu0 %2722 }
0x1bc1   :  { %2719 = vrot.lane.b32.xlu1 %v2712_v61, %s4477_s2 }
0x1bc4   :  { %v2732_v15 = vpop.permute.xlu0 %2731 }
0x1bc5   :  { %2728 = vrot.lane.b32.xlu1 %v2712_v61, %s4479_s5 }
0x1c2f   :  { %v2708_v63 = vpop.permute.xlu1 %2707 }
0x1c30   :  { %2710 = vst.msk [vmem:[#allocation4 + $0x28] sm:$0xff] %vm674_vm4, %v2708_v63  ;;  %3552 = vmatmul.mubr.msk.f32.vlgmr.msra.gmra.mrb[46].mxu1 %vm690_vm5, %v2708_v63 }
0x1c31   :  { %2711 = vst.msk [vmem:[#allocation4 + $0x10] sm:$0xff] %vm807_vm7, %v2708_v63  ;;  %4346 = vmatpush3.bf16.msra.mxu1 %v4343_v33 }
0x1c33   :  { %v2720_v1 = vpop.permute.xlu1 %2719 }
0x1c34   :  { %v2726_v2 = vsel %vm690_vm5, %v2725_v50, %v2720_v1 }
0x1c35   :  { %v2727_v5 = vsel %vm375_vm6, %v2726_v2, %v2723_v4 }
0x1c37   :  { %v2729_v29 = vpop.permute.xlu1 %2728 }
0x1c38   :  { %v2734_v16 = vsel %vm674_vm4, %v2729_v29, %v2732_v15 }
0x1d03   :  { %v2803_v7 = vpop.f32.mrb[46].mxu1 }
0x1d04   :  { %v2808_v17 = vadd.f32 %v2803_v7, %v2727_v5  ;;  %v2805_v8 = vpop.f32.mrb[47].mxu1  ;;  %v2963_v5 = vld [vmem:[#allocation4 + $0x10] sm:$0xff] }
0x1d05   :  { %v2815_v45 = vadd.f32 %v5487_v38, %v2805_v8  ;;  %v2964_v8 = vld [vmem:[#allocation4 + $0x18] sm:$0xff]  ;;  %vm2971_vm10 = vcmp.gt.f32.partialorder %v2963_v5, 0.0 }
0x1d06   :  { %v3553_v10 = vmul.f32 -1.442695, %v2808_v17  ;;  %vm2972_vm11 = vcmp.gt.f32.partialorder %v2964_v8, 0.0 }
0x1d08   :  { %4464 = vpow2.f32 %v3553_v10 }
0x1d12   :  { %v4465_v49 = vpop.eup %4464 }
0x1d13   :  { %v2812_v13 = vadd.f32 1.0, %v4465_v49  ;;  %v2979_v49 = vmul.f32 0.1, %v2963_v5 }
0x1d15   :  { %4466 = vrcp.f32 %v2812_v13  ;;  %v2965_v13 = vld [vmem:[#allocation4 + $0x20] sm:$0xff]  ;;  %v2987_v15 = vsel %vm2971_vm10, %v2963_v5, %v2979_v49 }
0x1d16   :  { %vm2973_vm12 = vcmp.gt.f32.partialorder %v2965_v13, 0.0 }
0x1d1f   :  { %v4467_v14 = vpop.eup %4466 }
0x1d20   :  { %v2816_v51 = vmul.f32 %v4467_v14, %v2815_v45  ;;  %v2819_v21 = vsub.f32 1.0, %v4467_v14  ;;  %v2825_v24 = vmul.f32 %v4467_v14, %v2705_v59  ;;  %v2980_v14 = vmul.f32 0.1, %v2964_v8 }
0x1d22   :  { %v2817_v20 = vadd.f32 %v2816_v51, %v2734_v16  ;;  %v2981_v51 = vmul.f32 0.1, %v2965_v13  ;;  %v2966_v16 = vld [vmem:[#allocation4 + $0x28] sm:$0xff] }
0x1d23   :  { %vm2974_vm13 = vcmp.gt.f32.partialorder %v2966_v16, 0.0 }
0x1d24   :  { %4468 = vtanh.f32 %v2817_v20 }
0x1d2e   :  { %v4469_v28 = vpop.eup %4468 }
0x1d2f   :  { %2821 = vrot.lane.b32.xlu1 %v4469_v28, %s4479_s5  ;;  %v2988_v28 = vsel %vm2972_vm11, %v2964_v8, %v2980_v14  ;;  %vm3334_vm11 = vcmask 130048  }
0x1d33   :  { %2836 = vrot.lane.b32.xlu1 %v2834_v9, %s4477_s2 }
0x1d37   :  { %2843 = vrot.lane.b32.xlu1 %v2834_v9, %s4479_s5 }
0x1d3b   :  { %2852 = vrot.lane.b32.xlu1 %v2834_v9, %s4480_s4  ;;  %v2982_v9 = vmul.f32 0.1, %v2966_v16 }
0x1da1   :  { %v2822_v23 = vpop.permute.xlu1 %2821 }
0x1da2   :  { %v2824_v25 = vmul.f32 %v2822_v23, %v2819_v21  ;;  %v2989_v21 = vsel %vm2973_vm12, %v2965_v13, %v2981_v51 }
0x1da4   :  { %v2826_v30 = vadd.f32 %v2825_v24, %v2824_v25  ;;  %v2990_v25 = vsel %vm2974_vm13, %v2966_v16, %v2982_v9 }
0x1da5   :  { %v2837_v34 = vpop.permute.xlu1 %2836 }
0x1da6   :  { %2828 = vrot.lane.b32.xlu0 %v2826_v30, %s4479_s5  ;;  %v2846_v36 = vsel %vm674_vm4, %v2833_v31, %v2837_v34  ;;  %v3161_v34 = vld [vmem:[%s5770_s16] sm:$0xff] }
0x1da9   :  { %v2844_v41 = vpop.permute.xlu1 %2843 }
0x1daa   :  { %2840 = vrot.lane.b32.xlu0 %v2833_v31, %s4477_s2 }
0x1dad   :  { %v2853_v22 = vpop.permute.xlu1 %2852 }
0x1dae   :  { %2849 = vrot.lane.b32.xlu0 %v2833_v31, %s4479_s5 }
0x1e18   :  { %v2829_v32 = vpop.permute.xlu0 %2828 }
0x1e19   :  { %2831 = vst.msk [vmem:[#allocation4 + $0x30] sm:$0xff] %vm674_vm4, %v2829_v32  ;;  %3554 = vmatmul.mubr.msk.f32.vlgmr.msra.gmra.mrb[46].mxu0 %vm690_vm5, %v2829_v32 }
0x1e1a   :  { %2832 = vst.msk [vmem:[#allocation4 + $0x8] sm:$0xff] %vm807_vm7, %v2829_v32 }
0x1e1c   :  { %v2841_v35 = vpop.permute.xlu0 %2840 }
0x1e1d   :  { %v2847_v40 = vsel %vm690_vm5, %v2846_v36, %v2841_v35  ;;  %v3162_v35 = vld [vmem:[%s5770_s16 + $0x8] sm:$0xff] }
0x1e1e   :  { %v2848_v42 = vsel %vm375_vm6, %v2847_v40, %v2844_v41  ;;  %v4359_v36 = vpack.c.bf16 %v3162_v35, %v3161_v34  ;;  %v3163_v40 = vld [vmem:[%s5770_s16 + $0x10] sm:$0xff]  ;;  %v3164_v41 = vld [vmem:[%s5770_s16 + $0x18] sm:$0xff] }
0x1e20   :  { %v2850_v62 = vpop.permute.xlu0 %2849  ;;  %v2967_v20 = vld [vmem:[#allocation4 + $0x30] sm:$0xff]  ;;  %4360 = vmatprep.subr.bf16.mxu0 %v4359_v36 }
0x1e21   :  { %v2855_v18 = vsel %vm674_vm4, %v2850_v62, %v2853_v22  ;;  %v2962_v4 = vld [vmem:[#allocation4 + $0x8] sm:$0xff]  ;;  %v2983_v23 = vmul.f32 0.1, %v2967_v20  ;;  %vm2975_vm14 = vcmp.gt.f32.partialorder %v2967_v20, 0.0  ;;  %4362 = vmatpush3.bf16.msra.mxu0 %v4359_v36 }
0x1e22   :  { %v2978_v17 = vmul.f32 0.1, %v2962_v4  ;;  %vm2970_vm9 = vcmp.gt.f32.partialorder %v2962_v4, 0.0 }
0x1e23   :  { %v2991_v31 = vsel %vm2975_vm14, %v2967_v20, %v2983_v23 }
0x1e24   :  { %v2986_v45 = vsel %vm2970_vm9, %v2962_v4, %v2978_v17 }
0x1eec   :  { %v2924_v44 = vpop.f32.mrb[46].mxu0 }
0x1eed   :  { %v2929_v46 = vadd.f32 %v2924_v44, %v2848_v42  ;;  %v2926_v43 = vpop.f32.mrb[47].mxu0  ;;  %v4363_v42 = vpack.c.bf16 %v3164_v41, %v3163_v40  ;;  %v3325_v44 = vld [vmem:[%s5771_s18] sm:$0xff] }
0x1eee   :  { %v2936_v19 = vadd.f32 %v5487_v38, %v2926_v43  ;;  %v2995_v38 = vld [vmem:[%s5769_s14 + $0x10] sm:$0xff] }
0x1eef   :  { %v3555_v60 = vmul.f32 -1.442695, %v2929_v46  ;;  %v4347_v54 = vpack.c.bf16 %v2996_v53, %v2995_v38  ;;  %4364 = vmatprep.subr.bf16.mxu0 %v4363_v42  ;;  %v3326_v46 = vld [vmem:[%s5771_s18 + $0x8] sm:$0xff] }
0x1ef0   :  { %4366 = vmatpush3.bf16.msra.mxu0 %v4363_v42  ;;  %v4367_v43 = vpack.c.bf16 %v3326_v46, %v3325_v44 }
0x1ef1   :  { %4470 = vpow2.f32 %v3555_v60  ;;  %4348 = vmatprep.subr.bf16.mxu1 %v4347_v54  ;;  %v3558_v60 = vld [vmem:[%s5772_s15] ss:$0 sm:$0xff] }
0x1ef2   :  { %4350 = vmatpush3.bf16.msra.mxu1 %v4347_v54  ;;  %4368 = vmatprep.subr.bf16.mxu0 %v4367_v43 }
0x1efb   :  { %v4471_v6 = vpop.eup %4470 }
0x1efc   :  { %v2933_v26 = vadd.f32 1.0, %v4471_v6 }
0x1efe   :  { %4472 = vrcp.f32 %v2933_v26 }
0x1f08   :  { %v4473_v3 = vpop.eup %4472 }
0x1f09   :  { %v2937_v52 = vmul.f32 %v4473_v3, %v2936_v19  ;;  %v2940_v58 = vsub.f32 1.0, %v4473_v3  ;;  %v2946_v61 = vmul.f32 %v4473_v3, %v2826_v30 }
0x1f0b   :  { %v2938_v27 = vadd.f32 %v2937_v52, %v2855_v18 }
0x1f0d   :  { %4474 = vtanh.f32 %v2938_v27 }
0x1f17   :  { %v4475_v48 = vpop.eup %4474 }
0x1f18   :  { %2942 = vrot.lane.b32.xlu0 %v4475_v48, %s4479_s5 }
0x1f1c   :  { %1657 = vrot.lane.b32.xlu0 %v5318_v37, %s4477_s2  ;;  %v4351_v37 = vpack.c.bf16 %v2998_v55, %v2997_v11 }
0x1f1e   :  { %4352 = vmatprep.subr.bf16.mxu1 %v4351_v37 }
0x1f1f   :  { %4354 = vmatpush3.bf16.msra.mxu1 %v4351_v37 }
0x1f20   :  { %4356 = vmatprep.subr.bf16.mxu1 %v4355_v57 }
0x1f23   :  { %4358 = vmatpush3.bf16.msra.mxu1 %v4355_v57 }
0x1f24   :  { %4371 = vmatprep.subr.bf16.mxu1 %v4359_v36 }
0x1f8a   :  { %v2943_v59 = vpop.permute.xlu0 %2942 }
0x1f8b   :  { %v2945_v63 = vmul.f32 %v2943_v59, %v2940_v58 }
0x1f8d   :  { %v2947_v0 = vadd.f32 %v2946_v61, %v2945_v63 }
0x1f8e   :  { %v1658_v1 = vpop.permute.xlu0 %1657 }
0x1f8f   :  { %3518 = vst.msk [vmem:[%s5765_s21 + $0x8] sm:$0xff] %vm674_vm4, %v1658_v1  ;;  %2949 = vrot.lane.b32.xlu1 %v2947_v0, %s4479_s5 }
0x1f93   :  { %2956 = vrot.lane.b32.xlu1 %v2947_v0, %s4477_s2 }
0x2001   :  { %v2950_v50 = vpop.permute.xlu1 %2949 }
0x2002   :  { %2952 = vst.msk [vmem:[#allocation4 + $0x38] sm:$0xff] %vm674_vm4, %v2950_v50  ;;  %3556 = vst.msk [vmem:[%s5765_s21 + $0x10] sm:$0xff] %vm674_vm4, %v2950_v50 }
0x2003   :  { %2953 = vst.msk [vmem:[#allocation4] sm:$0xff] %vm807_vm7, %v2950_v50 }
0x2005   :  { %v2957_v2 = vpop.permute.xlu1 %2956 }
0x2006   :  { %3557 = vst.msk [vmem:[%s5765_s21 + $0x18] sm:$0xff] %vm674_vm4, %v2957_v2 }
0x2009   :  { %v2968_v24 = vld [vmem:[#allocation4 + $0x38] sm:$0xff] }
0x200a   :  { %v2961_v7 = vld [vmem:[#allocation4] sm:$0xff]  ;;  %v2984_v30 = vmul.f32 0.1, %v2968_v24  ;;  %vm2976_vm15 = vcmp.gt.f32.partialorder %v2968_v24, 0.0 }
0x200b   :  { %vm2969_vm8 = vcmp.gt.f32.partialorder %v2961_v7, 0.0  ;;  %v2977_v10 = vmul.f32 0.1, %v2961_v7 }
0x200c   :  { %v2992_v32 = vsel %vm2976_vm15, %v2968_v24, %v2984_v30 }
0x200d   :  { %v2985_v29 = vsel %vm2969_vm8, %v2961_v7, %v2977_v10  ;;  %v3567_v7 = vld [vmem:[%s5773_s17] ss:$0 sm:$0xff] }
0x200e   :  { %3915 = vmatprep.mubr.msk.f32.mxu1 %vm690_vm5, %v2985_v29 }
0x200f   :  { %3916 = vmatmul.mubr.msk.f32.vlgmr.msra.gmra.mrb[48].mxu1 %vm690_vm5, %v2986_v45 }
0x2010   :  { %3918 = vmatprep.mubr.msk.f32.mxu1 %vm690_vm5, %v2987_v15  ;;  %4373 = vmatpush3.bf16.msra.mxu1 %v4359_v36 }
0x2011   :  { %4372 = vmatprep.subr.bf16.mxu1 %v4363_v42 }
0x2013   :  { %3919 = vmatmul.mubr.msk.f32.gmra.mrb[50].mxu1 %vm690_vm5, %v2988_v28 }
0x2014   :  { %3921 = vmatprep.mubr.msk.f32.mxu1 %vm690_vm5, %v2989_v21  ;;  %4374 = vmatpush3.bf16.msra.mxu1 %v4363_v42 }
0x2017   :  { %3922 = vmatmul.mubr.msk.f32.gmra.mrb[52].mxu1 %vm690_vm5, %v2990_v25 }
0x2018   :  { %3924 = vmatprep.mubr.msk.f32.mxu1 %vm690_vm5, %v2991_v31 }
0x201b   :  { %3925 = vmatmul.mubr.msk.f32.gmra.mrb[54].mxu1 %vm690_vm5, %v2992_v32 }
0x20e2   :  { %v3917_v6 = vpop.f32.mrb[48].mxu1 }
0x20e3   :  { %v3104_v26 = vadd.f32 %v3917_v6, %v3558_v60  ;;  %v3098_v62 = vpop.f32.mrb[49].mxu1 }
0x20e4   :  { %v3099_v19 = vadd.f32 %v3558_v60, %v3098_v62 }
0x20e5   :  { %v3146_v3 = vmul.f32 0.1, %v3104_v26  ;;  %vm3138_vm0 = vcmp.gt.f32.partialorder %v3104_v26, 0.0 }
0x20e6   :  { %vm3137_vm1 = vcmp.gt.f32.partialorder %v3099_v19, 0.0  ;;  %v3145_v22 = vmul.f32 0.1, %v3099_v19  ;;  %v3920_v52 = vpop.f32.mrb[50].mxu1 }
0x20e7   :  { %v3114_v18 = vadd.f32 %v3920_v52, %v3558_v60  ;;  %v3108_v27 = vpop.f32.mrb[51].mxu1  ;;  %v3154_v33 = vsel %vm3138_vm0, %v3104_v26, %v3146_v3  ;;  %v3576_v26 = vld [vmem:[%s5774_s19] ss:$0 sm:$0xff] }
0x20e8   :  { %v3109_v39 = vadd.f32 %v3558_v60, %v3108_v27  ;;  %v3153_v12 = vsel %vm3137_vm1, %v3099_v19, %v3145_v22 }
0x20e9   :  { %v3148_v48 = vmul.f32 0.1, %v3114_v18  ;;  %3935 = vmatprep.mubr.msk.f32.mxu0 %vm674_vm4, %v3153_v12  ;;  %vm3140_vm2 = vcmp.gt.f32.partialorder %v3114_v18, 0.0 }
0x20ea   :  { %vm3139_vm3 = vcmp.gt.f32.partialorder %v3109_v39, 0.0  ;;  %v3147_v38 = vmul.f32 0.1, %v3109_v39  ;;  %v3923_v53 = vpop.f32.mrb[52].mxu1  ;;  %3936 = vmatmul.mubr.msk.f32.vlgmr.msra.gmra.mrb[48].mxu0 %vm674_vm4, %v3154_v33 }
0x20eb   :  { %v3124_v54 = vadd.f32 %v3923_v53, %v3558_v60  ;;  %v3118_v11 = vpop.f32.mrb[53].mxu1  ;;  %4370 = vmatpush3.bf16.msra.mxu0 %v4367_v43  ;;  %v3156_v47 = vsel %vm3140_vm2, %v3114_v18, %v3148_v48 }
0x20ec   :  { %v3119_v55 = vadd.f32 %v3558_v60, %v3118_v11  ;;  %v3155_v37 = vsel %vm3139_vm3, %v3109_v39, %v3147_v38 }
0x20ed   :  { %v3150_v56 = vmul.f32 0.1, %v3124_v54  ;;  %3938 = vmatprep.mubr.msk.f32.mxu0 %vm674_vm4, %v3155_v37  ;;  %vm3142_vm5 = vcmp.gt.f32.partialorder %v3124_v54, 0.0 }
0x20ee   :  { %vm3141_vm6 = vcmp.gt.f32.partialorder %v3119_v55, 0.0  ;;  %v3149_v57 = vmul.f32 0.1, %v3119_v55  ;;  %v3926_v58 = vpop.f32.mrb[54].mxu1  ;;  %3939 = vmatmul.mubr.msk.f32.gmra.mrb[50].mxu0 %vm674_vm4, %v3156_v47 }
0x20ef   :  { %v3134_v59 = vadd.f32 %v3926_v58, %v3558_v60  ;;  %v3128_v61 = vpop.f32.mrb[55].mxu1  ;;  %v3158_v50 = vsel %vm3142_vm5, %v3124_v54, %v3150_v56 }
0x20f0   :  { %v3129_v63 = vadd.f32 %v3558_v60, %v3128_v61  ;;  %v3157_v0 = vsel %vm3141_vm6, %v3119_v55, %v3149_v57 }
0x20f1   :  { %v3152_v1 = vmul.f32 0.1, %v3134_v59  ;;  %3941 = vmatprep.mubr.msk.f32.mxu0 %vm674_vm4, %v3157_v0  ;;  %vm3144_vm7 = vcmp.gt.f32.partialorder %v3134_v59, 0.0 }
0x20f2   :  { %vm3143_vm8 = vcmp.gt.f32.partialorder %v3129_v63, 0.0  ;;  %v3151_v2 = vmul.f32 0.1, %v3129_v63  ;;  %3942 = vmatmul.mubr.msk.f32.gmra.mrb[52].mxu0 %vm674_vm4, %v3158_v50 }
0x20f3   :  { %v3160_v5 = vsel %vm3144_vm7, %v3134_v59, %v3152_v1 }
0x20f4   :  { %v3159_v4 = vsel %vm3143_vm8, %v3129_v63, %v3151_v2 }
0x20f5   :  { %3944 = vmatprep.mubr.msk.f32.mxu1 %vm674_vm4, %v3159_v4 }
0x20f6   :  { %3945 = vmatmul.mubr.msk.f32.vlgmr.msra.gmra.mrb[56].mxu1 %vm674_vm4, %v3160_v5 }
0x21bd   :  { %v3937_v17 = vpop.f32.mrb[48].mxu0 }
0x21be   :  { %v3268_v8 = vadd.f32 %v3937_v17, %v3567_v7  ;;  %v3262_v10 = vpop.f32.mrb[49].mxu0 }
0x21bf   :  { %v3263_v49 = vadd.f32 %v3567_v7, %v3262_v10 }
0x21c0   :  { %v3310_v13 = vmul.f32 0.1, %v3268_v8  ;;  %vm3302_vm9 = vcmp.gt.f32.partialorder %v3268_v8, 0.0 }
0x21c1   :  { %vm3301_vm10 = vcmp.gt.f32.partialorder %v3263_v49, 0.0  ;;  %v3309_v29 = vmul.f32 0.1, %v3263_v49  ;;  %v3940_v45 = vpop.f32.mrb[50].mxu0 }
0x21c2   :  { %v3278_v14 = vadd.f32 %v3940_v45, %v3567_v7  ;;  %v3272_v15 = vpop.f32.mrb[51].mxu0  ;;  %v3318_v20 = vsel %vm3302_vm9, %v3268_v8, %v3310_v13 }
0x21c3   :  { %v3273_v51 = vadd.f32 %v3567_v7, %v3272_v15  ;;  %v3317_v16 = vsel %vm3301_vm10, %v3263_v49, %v3309_v29 }
0x21c4   :  { %v3312_v28 = vmul.f32 0.1, %v3278_v14  ;;  %3951 = vmatprep.mubr.msk.f32.mxu0 %vm3334_vm11, %v3317_v16  ;;  %vm3304_vm4 = vcmp.gt.f32.partialorder %v3278_v14, 0.0 }
0x21c5   :  { %vm3303_vm12 = vcmp.gt.f32.partialorder %v3273_v51, 0.0  ;;  %v3311_v9 = vmul.f32 0.1, %v3273_v51  ;;  %v3943_v21 = vpop.f32.mrb[52].mxu0  ;;  %3952 = vmatmul.mubr.msk.f32.vlgmr.msra.gmra.mrb[54].mxu0 %vm3334_vm11, %v3318_v20 }
0x21c6   :  { %v3288_v23 = vadd.f32 %v3943_v21, %v3567_v7  ;;  %v3282_v24 = vpop.f32.mrb[53].mxu0  ;;  %v3320_v32 = vsel %vm3304_vm4, %v3278_v14, %v3312_v28 }
0x21c7   :  { %v3283_v25 = vadd.f32 %v3567_v7, %v3282_v24  ;;  %v3319_v30 = vsel %vm3303_vm12, %v3273_v51, %v3311_v9 }
0x21c8   :  { %v3314_v31 = vmul.f32 0.1, %v3288_v23  ;;  %3954 = vmatprep.mubr.msk.f32.mxu0 %vm3334_vm11, %v3319_v30  ;;  %vm3306_vm13 = vcmp.gt.f32.partialorder %v3288_v23, 0.0 }
0x21c9   :  { %vm3305_vm14 = vcmp.gt.f32.partialorder %v3283_v25, 0.0  ;;  %v3313_v34 = vmul.f32 0.1, %v3283_v25  ;;  %v3946_v35 = vpop.f32.mrb[56].mxu1  ;;  %3955 = vmatmul.mubr.msk.f32.gmra.mrb[56].mxu0 %vm3334_vm11, %v3320_v32 }
0x21ca   :  { %v3298_v36 = vadd.f32 %v3946_v35, %v3567_v7  ;;  %v3292_v40 = vpop.f32.mrb[57].mxu1  ;;  %v3322_v46 = vsel %vm3306_vm13, %v3288_v23, %v3314_v31 }
0x21cb   :  { %v3293_v41 = vadd.f32 %v3567_v7, %v3292_v40  ;;  %v3321_v42 = vsel %vm3305_vm14, %v3283_v25, %v3313_v34 }
0x21cc   :  { %v3316_v44 = vmul.f32 0.1, %v3298_v36  ;;  %3957 = vmatprep.mubr.msk.f32.mxu0 %vm3334_vm11, %v3321_v42  ;;  %vm3308_vm15 = vcmp.gt.f32.partialorder %v3298_v36, 0.0 }
0x21cd   :  { %vm3307_vm0 = vcmp.gt.f32.partialorder %v3293_v41, 0.0  ;;  %v3315_v43 = vmul.f32 0.1, %v3293_v41  ;;  %3958 = vmatmul.mubr.msk.f32.gmra.mrb[58].mxu0 %vm3334_vm11, %v3322_v46 }
0x21ce   :  { %v3324_v6 = vsel %vm3308_vm15, %v3298_v36, %v3316_v44 }
0x21cf   :  { %v3323_v60 = vsel %vm3307_vm0, %v3293_v41, %v3315_v43 }
0x21d0   :  { %3960 = vmatprep.mubr.msk.f32.mxu0 %vm3334_vm11, %v3323_v60 }
0x21d1   :  { %3961 = vmatmul.mubr.msk.f32.gmra.mrb[60].mxu0 %vm3334_vm11, %v3324_v6 }
0x2298   :  { %v3953_v62 = vpop.f32.mrb[54].mxu0 }
0x2299   :  { %v3431_v19 = vadd.f32 %v3953_v62, %v3576_v26  ;;  %v3425_v3 = vpop.f32.mrb[55].mxu0 }
0x229a   :  { %v3426_v22 = vadd.f32 %v3576_v26, %v3425_v3 }
0x229b   :  { %3465 = vst [vmem:[%s5775_s20 + $0x8] sm:$0xff] %v3431_v19 }
0x229c   :  { %3464 = vst [vmem:[%s5775_s20] sm:$0xff] %v3426_v22  ;;  %v3956_v52 = vpop.f32.mrb[56].mxu0 }
0x229d   :  { %v3441_v18 = vadd.f32 %v3956_v52, %v3576_v26  ;;  %v3435_v27 = vpop.f32.mrb[57].mxu0 }
0x229e   :  { %v3436_v39 = vadd.f32 %v3576_v26, %v3435_v27 }
0x229f   :  { %3467 = vst [vmem:[%s5775_s20 + $0x18] sm:$0xff] %v3441_v18 }
0x22a0   :  { %3466 = vst [vmem:[%s5775_s20 + $0x10] sm:$0xff] %v3436_v39  ;;  %v3959_v12 = vpop.f32.mrb[58].mxu0 }
0x22a1   :  { %v3451_v33 = vadd.f32 %v3959_v12, %v3576_v26  ;;  %v3445_v48 = vpop.f32.mrb[59].mxu0 }
0x22a2   :  { %v3446_v38 = vadd.f32 %v3576_v26, %v3445_v48 }
0x22a3   :  { %3469 = vst [vmem:[%s5775_s20 + $0x28] sm:$0xff] %v3451_v33 }
0x22a4   :  { %3468 = vst [vmem:[%s5775_s20 + $0x20] sm:$0xff] %v3446_v38  ;;  %v3962_v53 = vpop.f32.mrb[60].mxu0 }
0x22a5   :  { %v3461_v54 = vadd.f32 %v3962_v53, %v3576_v26  ;;  %v3455_v11 = vpop.f32.mrb[61].mxu0 }
0x22a6   :  { %v3456_v55 = vadd.f32 %v3576_v26, %v3455_v11 }
0x22a7   :  { %3471 = vst [vmem:[%s5775_s20 + $0x38] sm:$0xff] %v3461_v54 }
0x22a8   :  { %3470 = vst [vmem:[%s5775_s20 + $0x30] sm:$0xff] %v3456_v55 }

</bundles_post_ra>
